<compile_context>
chip_gen: v5e
topology: v5e:2x2
jax: 0.10.0
libtpu: 0.0.40
codegen_flags: <defaults>
</compile_context>

<pallas_src>
import numpy as np
import jax
import jax.numpy as jnp
from jax.experimental import pallas as pl
from jax.experimental.pallas import tpu as pltpu


OUT_LANES = 128  # lane-dense padded width of the kernel output block


def _round_up(x, m):
    return ((x + m - 1) // m) * m


def _pool_bins(length, out_size=4):
    """torch.nn.AdaptiveAvgPool1d bin boundaries (static python ints)."""
    bins = []
    for j in range(out_size):
        s = (j * length) // out_size
        e = -((-(j + 1) * length) // out_size)  # ceil((j+1)*L/out)
        bins.append((s, e))
    return bins


def _adaptive_pool_matrix(length, out_size=4):
    """Pooling matrix (reference implementation only)."""
    P = np.zeros((out_size, length), dtype=np.float32)
    for j, (s, e) in enumerate(_pool_bins(length, out_size)):
        P[j, s:e] = 1.0 / (e - s)
    return jnp.asarray(P)


def _three_inputs_kernel(e1_ref, e2_ref, cat_ref,
                         wt_ref, bt_ref, wtc_ref,
                         wd_ref, bd_ref, wdc_ref,
                         wc1_ref, bc1_ref, wc2_ref, bc2_ref, wcc_ref,
                         bcl1_ref, wcl2_ref, bcl2_ref,
                         out_ref):
    f32 = jnp.float32
    mm_dtype = wt_ref.dtype  # matmul operand dtype (bf16 by default)

    def head(x_ref, w_ref, b_ref, wcls_ref, h):
        x = x_ref[...]                                   # (TB, L, hid)
        tb, length, hid = x.shape
        lout = length - 2
        two_h = w_ref.shape[2]
        # Conv1d(kernel_size=3, VALID): batch folded into the matmul M dim.
        # (best when lout is a multiple of 8 so the reshapes are tile-aligned)
        acc = jnp.dot(x[:, 0:lout, :].reshape(tb * lout, hid), w_ref[0],
                      preferred_element_type=f32)
        for k in (1, 2):
            acc = acc + jnp.dot(x[:, k:k + lout, :].reshape(tb * lout, hid),
                                w_ref[k], preferred_element_type=f32)
        z = jnp.maximum(acc + b_ref[...], 0.0)           # ReLU, f32
        z3 = z.reshape(tb, lout, two_h)                  # (TB, lout, 2h)
        # AdaptiveAvgPool1d(4) with trace-time bin constants (VPU), then the
        # per-bin block of classifier layer 1: (TB,2h)@(2h,4h) on the MXU.
        for j, (s, e) in enumerate(_pool_bins(lout, 4)):
            pj = jnp.sum(z3[:, s:e, :], axis=1) * (1.0 / (e - s))
            h = h + jnp.dot(pj.astype(mm_dtype), wcls_ref[j],
                            preferred_element_type=f32)
        return h

    h = bcl1_ref[...]                                    # classifier-1 bias
    h = head(e1_ref, wt_ref, bt_ref, wtc_ref, h)         # title head
    h = head(e2_ref, wd_ref, bd_ref, wdc_ref, h)         # description head

    # category head: Linear -> ReLU -> Linear, then its classifier-1 block
    c = cat_ref[...]                                     # (TB, n_cat)
    hc = jnp.maximum(jnp.dot(c, wc1_ref[...], preferred_element_type=f32)
                     + bc1_ref[...], 0.0)
    co = jnp.dot(hc.astype(mm_dtype), wc2_ref[...],
                 preferred_element_type=f32) + bc2_ref[...]
    h = h + jnp.dot(co.astype(mm_dtype), wcc_ref[...],
                    preferred_element_type=f32)

    h = jnp.maximum(h, 0.0)                              # classifier ReLU, f32
    # Final Linear(4h -> 1), zero-padded to 128 lanes for a dense store;
    # column 0 carries the real output.
    out_ref[...] = (jnp.dot(h, wcl2_ref[...], preferred_element_type=f32)
                    + bcl2_ref[...])


def prepare_params(params, dtype=jnp.bfloat16):
    """One-time (hoisted) weight preprocessing into kernel-ready layout."""
    hid = params["E1"].shape[1]
    two_h = 2 * hid

    # classifier layer 1: (4h, concat) -> (concat, 4h), then regroup the
    # channel-major (c*4 + j) flatten order into (j, c) blocks per head.
    Wcl1 = params["cls_w1"].T                            # (concat, 4h)
    four_h = Wcl1.shape[1]
    w_title = Wcl1[:4 * two_h].reshape(two_h, 4, four_h).transpose(1, 0, 2)
    w_desc = Wcl1[4 * two_h:8 * two_h].reshape(two_h, 4, four_h).transpose(1, 0, 2)
    w_cat = Wcl1[8 * two_h:]                             # (2h, 4h)

    # final Linear(4h,1): pad N to 128 lanes (real output in column 0).
    wcl2 = params["cls_w2"].T                            # (4h, 1)
    wcl2_pad = jnp.zeros((four_h, OUT_LANES), jnp.float32).at[:, 0].set(wcl2[:, 0])
    bcl2_pad = jnp.zeros((1, OUT_LANES), jnp.float32).at[0, 0].set(params["cls_b2"][0])

    return dict(
        E1=params["E1"].astype(dtype),
        E2=params["E2"].astype(dtype),
        # Conv weights: PyTorch (out, in, k) -> (k, in, out)
        conv_t_w=jnp.transpose(params["conv_t_w"], (2, 1, 0)).astype(dtype),
        conv_t_b=params["conv_t_b"][None, :].astype(jnp.float32),
        conv_d_w=jnp.transpose(params["conv_d_w"], (2, 1, 0)).astype(dtype),
        conv_d_b=params["conv_d_b"][None, :].astype(jnp.float32),
        cat_w1=params["cat_w1"].T.astype(dtype),
        cat_b1=params["cat_b1"][None, :].astype(jnp.float32),
        cat_w2=params["cat_w2"].T.astype(dtype),
        cat_b2=params["cat_b2"][None, :].astype(jnp.float32),
        cls_w_title=w_title.astype(dtype),
        cls_w_desc=w_desc.astype(dtype),
        cls_w_cat=w_cat.astype(dtype),
        cls_b1=params["cls_b1"][None, :].astype(jnp.float32),
        cls_w2_pad=wcl2_pad,
        cls_b2_pad=bcl2_pad,
    )


def three_inputs_net(tokens1, tokens2, cat, prep, *, block_b=128):
    E1, E2 = prep["E1"], prep["E2"]
    dtype = E1.dtype
    B, L1 = tokens1.shape
    _, L2 = tokens2.shape
    hid = E1.shape[1]
    n_cat = cat.shape[1]

    # TODO(synk): for large B*L move the embedding gather in-kernel
    # (scalar-prefetched token ids + manual DMA from HBM-resident tables).
    e1 = E1[tokens1]                                     # (B, L1, hid) bf16
    e2 = E2[tokens2]                                     # (B, L2, hid) bf16
    c = cat.astype(dtype)                                # (B, n_cat)

    # batch tile: multiple of 8 sublanes; pad B so the grid divides evenly.
    tb = min(block_b, _round_up(B, 8))
    b_pad = _round_up(B, tb)
    if b_pad != B:
        e1 = jnp.pad(e1, ((0, b_pad - B), (0, 0), (0, 0)))
        e2 = jnp.pad(e2, ((0, b_pad - B), (0, 0), (0, 0)))
        c = jnp.pad(c, ((0, b_pad - B), (0, 0)))
    nb = b_pad // tb

    def wspec(x):  # resident weight: full block, constant index map
        nd = x.ndim
        return pl.BlockSpec(x.shape, lambda b, _nd=nd: (0,) * _nd)

    weights = (prep["conv_t_w"], prep["conv_t_b"], prep["cls_w_title"],
               prep["conv_d_w"], prep["conv_d_b"], prep["cls_w_desc"],
               prep["cat_w1"], prep["cat_b1"], prep["cat_w2"], prep["cat_b2"],
               prep["cls_w_cat"], prep["cls_b1"],
               prep["cls_w2_pad"], prep["cls_b2_pad"])

    out = pl.pallas_call(
        _three_inputs_kernel,
        out_shape=jax.ShapeDtypeStruct((b_pad, OUT_LANES), jnp.float32),
        grid=(nb,),
        in_specs=[
            pl.BlockSpec((tb, L1, hid), lambda b: (b, 0, 0)),
            pl.BlockSpec((tb, L2, hid), lambda b: (b, 0, 0)),
            pl.BlockSpec((tb, n_cat), lambda b: (b, 0)),
        ] + [wspec(w) for w in weights],
        out_specs=pl.BlockSpec((tb, OUT_LANES), lambda b: (b, 0)),
        compiler_params=pltpu.CompilerParams(
            dimension_semantics=("parallel",)),
    )(e1, e2, c, *weights)
    return out[:B, :1]


def reference_forward(tokens1, tokens2, cat, params):
    """Pure-JAX f32 replica of the PyTorch forward (for verification)."""
    e1 = params["E1"][tokens1]
    e2 = params["E2"][tokens2]
    x1 = jnp.transpose(e1, (0, 2, 1))                    # (B, hid, L), NCL
    x2 = jnp.transpose(e2, (0, 2, 1))

    def conv_head(x, w, b):
        L = x.shape[-1]
        lout = L - 2
        y = sum(jnp.einsum("bcl,oc->bol", x[:, :, k:k + lout], w[:, :, k])
                for k in range(3))
        y = jax.nn.relu(y + b[None, :, None])
        P = _adaptive_pool_matrix(lout, 4)
        return jnp.einsum("bcl,ol->bco", y, P)           # (B, 2h, 4)

    t = conv_head(x1, params["conv_t_w"], params["conv_t_b"])
    d = conv_head(x2, params["conv_d_w"], params["conv_d_b"])
    c = jax.nn.relu(cat @ params["cat_w1"].T + params["cat_b1"])
    c = c @ params["cat_w2"].T + params["cat_b2"]
    concat = jnp.concatenate(
        [t.reshape(t.shape[0], -1), d.reshape(d.shape[0], -1), c], axis=1)
    h = jax.nn.relu(concat @ params["cls_w1"].T + params["cls_b1"])
    return h @ params["cls_w2"].T + params["cls_b2"]


def init_params(key, n_tokens, n_cat, hid):
    two_h, four_h = 2 * hid, 4 * hid
    concat = 2 * two_h * 4 + two_h
    ks = jax.random.split(key, 14)

    def u(k, shape, fan_in):
        bound = 1.0 / np.sqrt(fan_in)
        return jax.random.uniform(k, shape, jnp.float32, -bound, bound)

    return dict(
        E1=jax.random.normal(ks[0], (n_tokens, hid), jnp.float32),
        E2=jax.random.normal(ks[1], (n_tokens, hid), jnp.float32),
        conv_t_w=u(ks[2], (two_h, hid, 3), hid * 3),
        conv_t_b=u(ks[3], (two_h,), hid * 3),
        conv_d_w=u(ks[4], (two_h, hid, 3), hid * 3),
        conv_d_b=u(ks[5], (two_h,), hid * 3),
        cat_w1=u(ks[6], (hid, n_cat), n_cat),
        cat_b1=u(ks[7], (hid,), n_cat),
        cat_w2=u(ks[8], (two_h, hid), hid),
        cat_b2=u(ks[9], (two_h,), hid),
        cls_w1=u(ks[10], (four_h, concat), concat),
        cls_b1=u(ks[11], (four_h,), concat),
        cls_w2=u(ks[12], (1, four_h), four_h),
        cls_b2=u(ks[13], (1,), four_h),
    )


if __name__ == "__main__":
    # small but batch-tiling-friendly shapes: lout1 = 8, lout2 = 16
    B, L1, L2 = 6, 10, 18
    n_tokens, n_cat, hid = 50, 8, 64        # PyTorch default hid_size=64

    key = jax.random.PRNGKey(0)
    k1, k2, k3, kp = jax.random.split(key, 4)
    tokens1 = jax.random.randint(k1, (B, L1), 0, n_tokens)
    tokens2 = jax.random.randint(k2, (B, L2), 0, n_tokens)
    cat = jax.random.normal(k3, (B, n_cat), jnp.float32)
    params = init_params(kp, n_tokens, n_cat, hid)

    prep = prepare_params(params)            # one-time weight prep (hoisted)
    fwd = jax.jit(three_inputs_net)
    out = jax.block_until_ready(fwd(tokens1, tokens2, cat, prep))

    ref = reference_forward(tokens1, tokens2, cat, params)
    # bf16 MXU operands (f32 accumulate) -> loosened tolerance vs f32 reference
    np.testing.assert_allclose(np.asarray(out), np.asarray(ref),
                               rtol=2e-2, atol=2e-2)
    print("KERNEL_OK")
</pallas_src>

<mosaic_0001>
module attributes {stable_mosaic.version = 11 : i64} {
  func.func @_three_inputs_kernel(%arg0: i32, %arg1: memref<8x10x64xbf16, #tpu.memory_space<vmem>>, %arg2: memref<8x18x64xbf16, #tpu.memory_space<vmem>>, %arg3: memref<8x8xbf16, #tpu.memory_space<vmem>>, %arg4: memref<3x64x128xbf16, #tpu.memory_space<vmem>>, %arg5: memref<1x128xf32, #tpu.memory_space<vmem>>, %arg6: memref<4x128x256xbf16, #tpu.memory_space<vmem>>, %arg7: memref<3x64x128xbf16, #tpu.memory_space<vmem>>, %arg8: memref<1x128xf32, #tpu.memory_space<vmem>>, %arg9: memref<4x128x256xbf16, #tpu.memory_space<vmem>>, %arg10: memref<8x64xbf16, #tpu.memory_space<vmem>>, %arg11: memref<1x64xf32, #tpu.memory_space<vmem>>, %arg12: memref<64x128xbf16, #tpu.memory_space<vmem>>, %arg13: memref<1x128xf32, #tpu.memory_space<vmem>>, %arg14: memref<128x256xbf16, #tpu.memory_space<vmem>>, %arg15: memref<1x256xf32, #tpu.memory_space<vmem>>, %arg16: memref<256x128xf32, #tpu.memory_space<vmem>>, %arg17: memref<1x128xf32, #tpu.memory_space<vmem>>, %arg18: memref<8x128xf32, #tpu.memory_space<vmem>>) attributes {dimension_semantics = [#tpu.dimension_semantics<parallel>], iteration_bounds = array<i64: 1>, scalar_prefetch = 0 : i64, scratch_operands = 0 : i64, tpu.core_type = #tpu.core_type<tc>, window_params = [{transform_indices = @transform_0, window_bounds = array<i64: 8, 10, 64>}, {transform_indices = @transform_1, window_bounds = array<i64: 8, 18, 64>}, {transform_indices = @transform_2, window_bounds = array<i64: 8, 8>}, {pipeline_mode = #tpu.pipeline_mode<synchronous>, transform_indices = @transform_3, window_bounds = array<i64: 3, 64, 128>}, {pipeline_mode = #tpu.pipeline_mode<synchronous>, transform_indices = @transform_4, window_bounds = array<i64: 1, 128>}, {pipeline_mode = #tpu.pipeline_mode<synchronous>, transform_indices = @transform_5, window_bounds = array<i64: 4, 128, 256>}, {pipeline_mode = #tpu.pipeline_mode<synchronous>, transform_indices = @transform_6, window_bounds = array<i64: 3, 64, 128>}, {pipeline_mode = #tpu.pipeline_mode<synchronous>, transform_indices = @transform_7, window_bounds = array<i64: 1, 128>}, {pipeline_mode = #tpu.pipeline_mode<synchronous>, transform_indices = @transform_8, window_bounds = array<i64: 4, 128, 256>}, {pipeline_mode = #tpu.pipeline_mode<synchronous>, transform_indices = @transform_9, window_bounds = array<i64: 8, 64>}, {pipeline_mode = #tpu.pipeline_mode<synchronous>, transform_indices = @transform_10, window_bounds = array<i64: 1, 64>}, {pipeline_mode = #tpu.pipeline_mode<synchronous>, transform_indices = @transform_11, window_bounds = array<i64: 64, 128>}, {pipeline_mode = #tpu.pipeline_mode<synchronous>, transform_indices = @transform_12, window_bounds = array<i64: 1, 128>}, {pipeline_mode = #tpu.pipeline_mode<synchronous>, transform_indices = @transform_13, window_bounds = array<i64: 128, 256>}, {pipeline_mode = #tpu.pipeline_mode<synchronous>, transform_indices = @transform_14, window_bounds = array<i64: 1, 256>}, {pipeline_mode = #tpu.pipeline_mode<synchronous>, transform_indices = @transform_15, window_bounds = array<i64: 256, 128>}, {pipeline_mode = #tpu.pipeline_mode<synchronous>, transform_indices = @transform_16, window_bounds = array<i64: 1, 128>}, {transform_indices = @transform_17, window_bounds = array<i64: 8, 128>}]} {
    %c0 = arith.constant 0 : index
    %c0_0 = arith.constant 0 : index
    %0 = vector.load %arg15[%c0, %c0_0] : memref<1x256xf32, #tpu.memory_space<vmem>>, vector<1x256xf32>
    %c0_1 = arith.constant 0 : index
    %c0_2 = arith.constant 0 : index
    %c0_3 = arith.constant 0 : index
    %1 = vector.load %arg1[%c0_1, %c0_2, %c0_3] : memref<8x10x64xbf16, #tpu.memory_space<vmem>>, vector<8x10x64xbf16>
    %2 = vector.extract_strided_slice %1 {offsets = [0, 0, 0], sizes = [8, 8, 64], strides = [1, 1, 1]} : vector<8x10x64xbf16> to vector<8x8x64xbf16>
    %3 = vector.shape_cast %2 : vector<8x8x64xbf16> to vector<64x64xbf16>
    %c0_4 = arith.constant 0 : index
    %c0_5 = arith.constant 0 : index
    %c0_6 = arith.constant 0 : index
    %4 = vector.load %arg4[%c0_4, %c0_5, %c0_6] : memref<3x64x128xbf16, #tpu.memory_space<vmem>>, vector<1x64x128xbf16>
    %5 = vector.shape_cast %4 : vector<1x64x128xbf16> to vector<64x128xbf16>
    %cst = arith.constant dense<0.000000e+00> : vector<64x128xf32>
    %6 = tpu.matmul %3, %5, %cst {dimension_numbers = #tpu.dot_dimension_numbers<[1], [0], [0], [1], [0, 0, 1, 1], [], []>} : vector<64x64xbf16>, vector<64x128xbf16>, vector<64x128xf32> -> vector<64x128xf32>
    %7 = vector.extract_strided_slice %1 {offsets = [0, 1, 0], sizes = [8, 8, 64], strides = [1, 1, 1]} : vector<8x10x64xbf16> to vector<8x8x64xbf16>
    %8 = vector.shape_cast %7 : vector<8x8x64xbf16> to vector<64x64xbf16>
    %c1 = arith.constant 1 : index
    %c0_7 = arith.constant 0 : index
    %c0_8 = arith.constant 0 : index
    %9 = vector.load %arg4[%c1, %c0_7, %c0_8] : memref<3x64x128xbf16, #tpu.memory_space<vmem>>, vector<1x64x128xbf16>
    %10 = vector.shape_cast %9 : vector<1x64x128xbf16> to vector<64x128xbf16>
    %cst_9 = arith.constant dense<0.000000e+00> : vector<64x128xf32>
    %11 = tpu.matmul %8, %10, %cst_9 {dimension_numbers = #tpu.dot_dimension_numbers<[1], [0], [0], [1], [0, 0, 1, 1], [], []>} : vector<64x64xbf16>, vector<64x128xbf16>, vector<64x128xf32> -> vector<64x128xf32>
    %12 = arith.addf %6, %11 : vector<64x128xf32>
    %13 = vector.extract_strided_slice %1 {offsets = [0, 2, 0], sizes = [8, 8, 64], strides = [1, 1, 1]} : vector<8x10x64xbf16> to vector<8x8x64xbf16>
    %14 = vector.shape_cast %13 : vector<8x8x64xbf16> to vector<64x64xbf16>
    %c2 = arith.constant 2 : index
    %c0_10 = arith.constant 0 : index
    %c0_11 = arith.constant 0 : index
    %15 = vector.load %arg4[%c2, %c0_10, %c0_11] : memref<3x64x128xbf16, #tpu.memory_space<vmem>>, vector<1x64x128xbf16>
    %16 = vector.shape_cast %15 : vector<1x64x128xbf16> to vector<64x128xbf16>
    %cst_12 = arith.constant dense<0.000000e+00> : vector<64x128xf32>
    %17 = tpu.matmul %14, %16, %cst_12 {dimension_numbers = #tpu.dot_dimension_numbers<[1], [0], [0], [1], [0, 0, 1, 1], [], []>} : vector<64x64xbf16>, vector<64x128xbf16>, vector<64x128xf32> -> vector<64x128xf32>
    %18 = arith.addf %12, %17 : vector<64x128xf32>
    %c0_13 = arith.constant 0 : index
    %c0_14 = arith.constant 0 : index
    %19 = vector.load %arg5[%c0_13, %c0_14] : memref<1x128xf32, #tpu.memory_space<vmem>>, vector<1x128xf32>
    %20 = vector.broadcast %19 : vector<1x128xf32> to vector<64x128xf32>
    %21 = arith.addf %18, %20 : vector<64x128xf32>
    %cst_15 = arith.constant 0.000000e+00 : f32
    %22 = vector.broadcast %cst_15 : f32 to vector<64x128xf32>
    %23 = arith.maximumf %21, %22 : vector<64x128xf32>
    %24 = vector.shape_cast %23 : vector<64x128xf32> to vector<8x8x128xf32>
    %25 = vector.extract_strided_slice %24 {offsets = [0, 0, 0], sizes = [8, 2, 128], strides = [1, 1, 1]} : vector<8x8x128xf32> to vector<8x2x128xf32>
    %cst_16 = arith.constant dense<0.000000e+00> : vector<8x128xf32>
    %26 = vector.multi_reduction <add>, %25, %cst_16 [1] : vector<8x2x128xf32> to vector<8x128xf32>
    %cst_17 = arith.constant 5.000000e-01 : f32
    %27 = vector.broadcast %cst_17 : f32 to vector<8x128xf32>
    %28 = arith.mulf %26, %27 : vector<8x128xf32>
    %29 = arith.truncf %28 : vector<8x128xf32> to vector<8x128xbf16>
    %c0_18 = arith.constant 0 : index
    %c0_19 = arith.constant 0 : index
    %c0_20 = arith.constant 0 : index
    %30 = vector.load %arg6[%c0_18, %c0_19, %c0_20] : memref<4x128x256xbf16, #tpu.memory_space<vmem>>, vector<1x128x256xbf16>
    %31 = vector.shape_cast %30 : vector<1x128x256xbf16> to vector<128x256xbf16>
    %cst_21 = arith.constant dense<0.000000e+00> : vector<8x256xf32>
    %32 = tpu.matmul %29, %31, %cst_21 {dimension_numbers = #tpu.dot_dimension_numbers<[1], [0], [0], [1], [0, 0, 1, 1], [], []>} : vector<8x128xbf16>, vector<128x256xbf16>, vector<8x256xf32> -> vector<8x256xf32>
    %33 = vector.broadcast %0 : vector<1x256xf32> to vector<8x256xf32>
    %34 = arith.addf %33, %32 : vector<8x256xf32>
    %35 = vector.extract_strided_slice %24 {offsets = [0, 2, 0], sizes = [8, 2, 128], strides = [1, 1, 1]} : vector<8x8x128xf32> to vector<8x2x128xf32>
    %cst_22 = arith.constant dense<0.000000e+00> : vector<8x128xf32>
    %36 = vector.multi_reduction <add>, %35, %cst_22 [1] : vector<8x2x128xf32> to vector<8x128xf32>
    %cst_23 = arith.constant 5.000000e-01 : f32
    %37 = vector.broadcast %cst_23 : f32 to vector<8x128xf32>
    %38 = arith.mulf %36, %37 : vector<8x128xf32>
    %39 = arith.truncf %38 : vector<8x128xf32> to vector<8x128xbf16>
    %c1_24 = arith.constant 1 : index
    %c0_25 = arith.constant 0 : index
    %c0_26 = arith.constant 0 : index
    %40 = vector.load %arg6[%c1_24, %c0_25, %c0_26] : memref<4x128x256xbf16, #tpu.memory_space<vmem>>, vector<1x128x256xbf16>
    %41 = vector.shape_cast %40 : vector<1x128x256xbf16> to vector<128x256xbf16>
    %cst_27 = arith.constant dense<0.000000e+00> : vector<8x256xf32>
    %42 = tpu.matmul %39, %41, %cst_27 {dimension_numbers = #tpu.dot_dimension_numbers<[1], [0], [0], [1], [0, 0, 1, 1], [], []>} : vector<8x128xbf16>, vector<128x256xbf16>, vector<8x256xf32> -> vector<8x256xf32>
    %43 = arith.addf %34, %42 : vector<8x256xf32>
    %44 = vector.extract_strided_slice %24 {offsets = [0, 4, 0], sizes = [8, 2, 128], strides = [1, 1, 1]} : vector<8x8x128xf32> to vector<8x2x128xf32>
    %cst_28 = arith.constant dense<0.000000e+00> : vector<8x128xf32>
    %45 = vector.multi_reduction <add>, %44, %cst_28 [1] : vector<8x2x128xf32> to vector<8x128xf32>
    %cst_29 = arith.constant 5.000000e-01 : f32
    %46 = vector.broadcast %cst_29 : f32 to vector<8x128xf32>
    %47 = arith.mulf %45, %46 : vector<8x128xf32>
    %48 = arith.truncf %47 : vector<8x128xf32> to vector<8x128xbf16>
    %c2_30 = arith.constant 2 : index
    %c0_31 = arith.constant 0 : index
    %c0_32 = arith.constant 0 : index
    %49 = vector.load %arg6[%c2_30, %c0_31, %c0_32] : memref<4x128x256xbf16, #tpu.memory_space<vmem>>, vector<1x128x256xbf16>
    %50 = vector.shape_cast %49 : vector<1x128x256xbf16> to vector<128x256xbf16>
    %cst_33 = arith.constant dense<0.000000e+00> : vector<8x256xf32>
    %51 = tpu.matmul %48, %50, %cst_33 {dimension_numbers = #tpu.dot_dimension_numbers<[1], [0], [0], [1], [0, 0, 1, 1], [], []>} : vector<8x128xbf16>, vector<128x256xbf16>, vector<8x256xf32> -> vector<8x256xf32>
    %52 = arith.addf %43, %51 : vector<8x256xf32>
    %53 = vector.extract_strided_slice %24 {offsets = [0, 6, 0], sizes = [8, 2, 128], strides = [1, 1, 1]} : vector<8x8x128xf32> to vector<8x2x128xf32>
    %cst_34 = arith.constant dense<0.000000e+00> : vector<8x128xf32>
    %54 = vector.multi_reduction <add>, %53, %cst_34 [1] : vector<8x2x128xf32> to vector<8x128xf32>
    %cst_35 = arith.constant 5.000000e-01 : f32
    %55 = vector.broadcast %cst_35 : f32 to vector<8x128xf32>
    %56 = arith.mulf %54, %55 : vector<8x128xf32>
    %57 = arith.truncf %56 : vector<8x128xf32> to vector<8x128xbf16>
    %c3 = arith.constant 3 : index
    %c0_36 = arith.constant 0 : index
    %c0_37 = arith.constant 0 : index
    %58 = vector.load %arg6[%c3, %c0_36, %c0_37] : memref<4x128x256xbf16, #tpu.memory_space<vmem>>, vector<1x128x256xbf16>
    %59 = vector.shape_cast %58 : vector<1x128x256xbf16> to vector<128x256xbf16>
    %cst_38 = arith.constant dense<0.000000e+00> : vector<8x256xf32>
    %60 = tpu.matmul %57, %59, %cst_38 {dimension_numbers = #tpu.dot_dimension_numbers<[1], [0], [0], [1], [0, 0, 1, 1], [], []>} : vector<8x128xbf16>, vector<128x256xbf16>, vector<8x256xf32> -> vector<8x256xf32>
    %61 = arith.addf %52, %60 : vector<8x256xf32>
    %c0_39 = arith.constant 0 : index
    %c0_40 = arith.constant 0 : index
    %c0_41 = arith.constant 0 : index
    %62 = vector.load %arg2[%c0_39, %c0_40, %c0_41] : memref<8x18x64xbf16, #tpu.memory_space<vmem>>, vector<8x18x64xbf16>
    %63 = vector.extract_strided_slice %62 {offsets = [0, 0, 0], sizes = [8, 16, 64], strides = [1, 1, 1]} : vector<8x18x64xbf16> to vector<8x16x64xbf16>
    %64 = vector.shape_cast %63 : vector<8x16x64xbf16> to vector<128x64xbf16>
    %c0_42 = arith.constant 0 : index
    %c0_43 = arith.constant 0 : index
    %c0_44 = arith.constant 0 : index
    %65 = vector.load %arg7[%c0_42, %c0_43, %c0_44] : memref<3x64x128xbf16, #tpu.memory_space<vmem>>, vector<1x64x128xbf16>
    %66 = vector.shape_cast %65 : vector<1x64x128xbf16> to vector<64x128xbf16>
    %cst_45 = arith.constant dense<0.000000e+00> : vector<128x128xf32>
    %67 = tpu.matmul %64, %66, %cst_45 {dimension_numbers = #tpu.dot_dimension_numbers<[1], [0], [0], [1], [0, 0, 1, 1], [], []>} : vector<128x64xbf16>, vector<64x128xbf16>, vector<128x128xf32> -> vector<128x128xf32>
    %68 = vector.extract_strided_slice %62 {offsets = [0, 1, 0], sizes = [8, 16, 64], strides = [1, 1, 1]} : vector<8x18x64xbf16> to vector<8x16x64xbf16>
    %69 = vector.shape_cast %68 : vector<8x16x64xbf16> to vector<128x64xbf16>
    %c1_46 = arith.constant 1 : index
    %c0_47 = arith.constant 0 : index
    %c0_48 = arith.constant 0 : index
    %70 = vector.load %arg7[%c1_46, %c0_47, %c0_48] : memref<3x64x128xbf16, #tpu.memory_space<vmem>>, vector<1x64x128xbf16>
    %71 = vector.shape_cast %70 : vector<1x64x128xbf16> to vector<64x128xbf16>
    %cst_49 = arith.constant dense<0.000000e+00> : vector<128x128xf32>
    %72 = tpu.matmul %69, %71, %cst_49 {dimension_numbers = #tpu.dot_dimension_numbers<[1], [0], [0], [1], [0, 0, 1, 1], [], []>} : vector<128x64xbf16>, vector<64x128xbf16>, vector<128x128xf32> -> vector<128x128xf32>
    %73 = arith.addf %67, %72 : vector<128x128xf32>
    %74 = vector.extract_strided_slice %62 {offsets = [0, 2, 0], sizes = [8, 16, 64], strides = [1, 1, 1]} : vector<8x18x64xbf16> to vector<8x16x64xbf16>
    %75 = vector.shape_cast %74 : vector<8x16x64xbf16> to vector<128x64xbf16>
    %c2_50 = arith.constant 2 : index
    %c0_51 = arith.constant 0 : index
    %c0_52 = arith.constant 0 : index
    %76 = vector.load %arg7[%c2_50, %c0_51, %c0_52] : memref<3x64x128xbf16, #tpu.memory_space<vmem>>, vector<1x64x128xbf16>
    %77 = vector.shape_cast %76 : vector<1x64x128xbf16> to vector<64x128xbf16>
    %cst_53 = arith.constant dense<0.000000e+00> : vector<128x128xf32>
    %78 = tpu.matmul %75, %77, %cst_53 {dimension_numbers = #tpu.dot_dimension_numbers<[1], [0], [0], [1], [0, 0, 1, 1], [], []>} : vector<128x64xbf16>, vector<64x128xbf16>, vector<128x128xf32> -> vector<128x128xf32>
    %79 = arith.addf %73, %78 : vector<128x128xf32>
    %c0_54 = arith.constant 0 : index
    %c0_55 = arith.constant 0 : index
    %80 = vector.load %arg8[%c0_54, %c0_55] : memref<1x128xf32, #tpu.memory_space<vmem>>, vector<1x128xf32>
    %81 = vector.broadcast %80 : vector<1x128xf32> to vector<128x128xf32>
    %82 = arith.addf %79, %81 : vector<128x128xf32>
    %cst_56 = arith.constant 0.000000e+00 : f32
    %83 = vector.broadcast %cst_56 : f32 to vector<128x128xf32>
    %84 = arith.maximumf %82, %83 : vector<128x128xf32>
    %85 = vector.shape_cast %84 : vector<128x128xf32> to vector<8x16x128xf32>
    %86 = vector.extract_strided_slice %85 {offsets = [0, 0, 0], sizes = [8, 4, 128], strides = [1, 1, 1]} : vector<8x16x128xf32> to vector<8x4x128xf32>
    %cst_57 = arith.constant dense<0.000000e+00> : vector<8x128xf32>
    %87 = vector.multi_reduction <add>, %86, %cst_57 [1] : vector<8x4x128xf32> to vector<8x128xf32>
    %cst_58 = arith.constant 2.500000e-01 : f32
    %88 = vector.broadcast %cst_58 : f32 to vector<8x128xf32>
    %89 = arith.mulf %87, %88 : vector<8x128xf32>
    %90 = arith.truncf %89 : vector<8x128xf32> to vector<8x128xbf16>
    %c0_59 = arith.constant 0 : index
    %c0_60 = arith.constant 0 : index
    %c0_61 = arith.constant 0 : index
    %91 = vector.load %arg9[%c0_59, %c0_60, %c0_61] : memref<4x128x256xbf16, #tpu.memory_space<vmem>>, vector<1x128x256xbf16>
    %92 = vector.shape_cast %91 : vector<1x128x256xbf16> to vector<128x256xbf16>
    %cst_62 = arith.constant dense<0.000000e+00> : vector<8x256xf32>
    %93 = tpu.matmul %90, %92, %cst_62 {dimension_numbers = #tpu.dot_dimension_numbers<[1], [0], [0], [1], [0, 0, 1, 1], [], []>} : vector<8x128xbf16>, vector<128x256xbf16>, vector<8x256xf32> -> vector<8x256xf32>
    %94 = arith.addf %61, %93 : vector<8x256xf32>
    %95 = vector.extract_strided_slice %85 {offsets = [0, 4, 0], sizes = [8, 4, 128], strides = [1, 1, 1]} : vector<8x16x128xf32> to vector<8x4x128xf32>
    %cst_63 = arith.constant dense<0.000000e+00> : vector<8x128xf32>
    %96 = vector.multi_reduction <add>, %95, %cst_63 [1] : vector<8x4x128xf32> to vector<8x128xf32>
    %cst_64 = arith.constant 2.500000e-01 : f32
    %97 = vector.broadcast %cst_64 : f32 to vector<8x128xf32>
    %98 = arith.mulf %96, %97 : vector<8x128xf32>
    %99 = arith.truncf %98 : vector<8x128xf32> to vector<8x128xbf16>
    %c1_65 = arith.constant 1 : index
    %c0_66 = arith.constant 0 : index
    %c0_67 = arith.constant 0 : index
    %100 = vector.load %arg9[%c1_65, %c0_66, %c0_67] : memref<4x128x256xbf16, #tpu.memory_space<vmem>>, vector<1x128x256xbf16>
    %101 = vector.shape_cast %100 : vector<1x128x256xbf16> to vector<128x256xbf16>
    %cst_68 = arith.constant dense<0.000000e+00> : vector<8x256xf32>
    %102 = tpu.matmul %99, %101, %cst_68 {dimension_numbers = #tpu.dot_dimension_numbers<[1], [0], [0], [1], [0, 0, 1, 1], [], []>} : vector<8x128xbf16>, vector<128x256xbf16>, vector<8x256xf32> -> vector<8x256xf32>
    %103 = arith.addf %94, %102 : vector<8x256xf32>
    %104 = vector.extract_strided_slice %85 {offsets = [0, 8, 0], sizes = [8, 4, 128], strides = [1, 1, 1]} : vector<8x16x128xf32> to vector<8x4x128xf32>
    %cst_69 = arith.constant dense<0.000000e+00> : vector<8x128xf32>
    %105 = vector.multi_reduction <add>, %104, %cst_69 [1] : vector<8x4x128xf32> to vector<8x128xf32>
    %cst_70 = arith.constant 2.500000e-01 : f32
    %106 = vector.broadcast %cst_70 : f32 to vector<8x128xf32>
    %107 = arith.mulf %105, %106 : vector<8x128xf32>
    %108 = arith.truncf %107 : vector<8x128xf32> to vector<8x128xbf16>
    %c2_71 = arith.constant 2 : index
    %c0_72 = arith.constant 0 : index
    %c0_73 = arith.constant 0 : index
    %109 = vector.load %arg9[%c2_71, %c0_72, %c0_73] : memref<4x128x256xbf16, #tpu.memory_space<vmem>>, vector<1x128x256xbf16>
    %110 = vector.shape_cast %109 : vector<1x128x256xbf16> to vector<128x256xbf16>
    %cst_74 = arith.constant dense<0.000000e+00> : vector<8x256xf32>
    %111 = tpu.matmul %108, %110, %cst_74 {dimension_numbers = #tpu.dot_dimension_numbers<[1], [0], [0], [1], [0, 0, 1, 1], [], []>} : vector<8x128xbf16>, vector<128x256xbf16>, vector<8x256xf32> -> vector<8x256xf32>
    %112 = arith.addf %103, %111 : vector<8x256xf32>
    %113 = vector.extract_strided_slice %85 {offsets = [0, 12, 0], sizes = [8, 4, 128], strides = [1, 1, 1]} : vector<8x16x128xf32> to vector<8x4x128xf32>
    %cst_75 = arith.constant dense<0.000000e+00> : vector<8x128xf32>
    %114 = vector.multi_reduction <add>, %113, %cst_75 [1] : vector<8x4x128xf32> to vector<8x128xf32>
    %cst_76 = arith.constant 2.500000e-01 : f32
    %115 = vector.broadcast %cst_76 : f32 to vector<8x128xf32>
    %116 = arith.mulf %114, %115 : vector<8x128xf32>
    %117 = arith.truncf %116 : vector<8x128xf32> to vector<8x128xbf16>
    %c3_77 = arith.constant 3 : index
    %c0_78 = arith.constant 0 : index
    %c0_79 = arith.constant 0 : index
    %118 = vector.load %arg9[%c3_77, %c0_78, %c0_79] : memref<4x128x256xbf16, #tpu.memory_space<vmem>>, vector<1x128x256xbf16>
    %119 = vector.shape_cast %118 : vector<1x128x256xbf16> to vector<128x256xbf16>
    %cst_80 = arith.constant dense<0.000000e+00> : vector<8x256xf32>
    %120 = tpu.matmul %117, %119, %cst_80 {dimension_numbers = #tpu.dot_dimension_numbers<[1], [0], [0], [1], [0, 0, 1, 1], [], []>} : vector<8x128xbf16>, vector<128x256xbf16>, vector<8x256xf32> -> vector<8x256xf32>
    %121 = arith.addf %112, %120 : vector<8x256xf32>
    %c0_81 = arith.constant 0 : index
    %c0_82 = arith.constant 0 : index
    %122 = vector.load %arg3[%c0_81, %c0_82] : memref<8x8xbf16, #tpu.memory_space<vmem>>, vector<8x8xbf16>
    %c0_83 = arith.constant 0 : index
    %c0_84 = arith.constant 0 : index
    %123 = vector.load %arg10[%c0_83, %c0_84] : memref<8x64xbf16, #tpu.memory_space<vmem>>, vector<8x64xbf16>
    %cst_85 = arith.constant dense<0.000000e+00> : vector<8x64xf32>
    %124 = tpu.matmul %122, %123, %cst_85 {dimension_numbers = #tpu.dot_dimension_numbers<[1], [0], [0], [1], [0, 0, 1, 1], [], []>} : vector<8x8xbf16>, vector<8x64xbf16>, vector<8x64xf32> -> vector<8x64xf32>
    %c0_86 = arith.constant 0 : index
    %c0_87 = arith.constant 0 : index
    %125 = vector.load %arg11[%c0_86, %c0_87] : memref<1x64xf32, #tpu.memory_space<vmem>>, vector<1x64xf32>
    %126 = vector.broadcast %125 : vector<1x64xf32> to vector<8x64xf32>
    %127 = arith.addf %124, %126 : vector<8x64xf32>
    %cst_88 = arith.constant 0.000000e+00 : f32
    %128 = vector.broadcast %cst_88 : f32 to vector<8x64xf32>
    %129 = arith.maximumf %127, %128 : vector<8x64xf32>
    %130 = arith.truncf %129 : vector<8x64xf32> to vector<8x64xbf16>
    %c0_89 = arith.constant 0 : index
    %c0_90 = arith.constant 0 : index
    %131 = vector.load %arg12[%c0_89, %c0_90] : memref<64x128xbf16, #tpu.memory_space<vmem>>, vector<64x128xbf16>
    %cst_91 = arith.constant dense<0.000000e+00> : vector<8x128xf32>
    %132 = tpu.matmul %130, %131, %cst_91 {dimension_numbers = #tpu.dot_dimension_numbers<[1], [0], [0], [1], [0, 0, 1, 1], [], []>} : vector<8x64xbf16>, vector<64x128xbf16>, vector<8x128xf32> -> vector<8x128xf32>
    %c0_92 = arith.constant 0 : index
    %c0_93 = arith.constant 0 : index
    %133 = vector.load %arg13[%c0_92, %c0_93] : memref<1x128xf32, #tpu.memory_space<vmem>>, vector<1x128xf32>
    %134 = vector.broadcast %133 : vector<1x128xf32> to vector<8x128xf32>
    %135 = arith.addf %132, %134 : vector<8x128xf32>
    %136 = arith.truncf %135 : vector<8x128xf32> to vector<8x128xbf16>
    %c0_94 = arith.constant 0 : index
    %c0_95 = arith.constant 0 : index
    %137 = vector.load %arg14[%c0_94, %c0_95] : memref<128x256xbf16, #tpu.memory_space<vmem>>, vector<128x256xbf16>
    %cst_96 = arith.constant dense<0.000000e+00> : vector<8x256xf32>
    %138 = tpu.matmul %136, %137, %cst_96 {dimension_numbers = #tpu.dot_dimension_numbers<[1], [0], [0], [1], [0, 0, 1, 1], [], []>} : vector<8x128xbf16>, vector<128x256xbf16>, vector<8x256xf32> -> vector<8x256xf32>
    %139 = arith.addf %121, %138 : vector<8x256xf32>
    %cst_97 = arith.constant 0.000000e+00 : f32
    %140 = vector.broadcast %cst_97 : f32 to vector<8x256xf32>
    %141 = arith.maximumf %139, %140 : vector<8x256xf32>
    %c0_98 = arith.constant 0 : index
    %c0_99 = arith.constant 0 : index
    %142 = vector.load %arg16[%c0_98, %c0_99] : memref<256x128xf32, #tpu.memory_space<vmem>>, vector<256x128xf32>
    %cst_100 = arith.constant dense<0.000000e+00> : vector<8x128xf32>
    %143 = tpu.matmul %141, %142, %cst_100 {dimension_numbers = #tpu.dot_dimension_numbers<[1], [0], [0], [1], [0, 0, 1, 1], [], []>} : vector<8x256xf32>, vector<256x128xf32>, vector<8x128xf32> -> vector<8x128xf32>
    %c0_101 = arith.constant 0 : index
    %c0_102 = arith.constant 0 : index
    %144 = vector.load %arg17[%c0_101, %c0_102] : memref<1x128xf32, #tpu.memory_space<vmem>>, vector<1x128xf32>
    %145 = vector.broadcast %144 : vector<1x128xf32> to vector<8x128xf32>
    %146 = arith.addf %143, %145 : vector<8x128xf32>
    %c0_103 = arith.constant 0 : index
    %c0_104 = arith.constant 0 : index
    %147 = vector.load %arg18[%c0_103, %c0_104] : memref<8x128xf32, #tpu.memory_space<vmem>>, vector<8x128xf32>
    tpu.vector_store %arg18[%c0_103, %c0_104], %146 {strides = array<i32>} : memref<8x128xf32, #tpu.memory_space<vmem>>, vector<8x128xf32>,
    return
  }
  func.func @transform_0(%arg0: i32) -> (i32, i32, i32) {
    %c0_i32 = arith.constant 0 : i32
    %c0_i32_0 = arith.constant 0 : i32
    %c0_i32_1 = arith.constant 0 : i32
    return %arg0, %c0_i32, %c0_i32_0 : i32, i32, i32
  }
  func.func @transform_1(%arg0: i32) -> (i32, i32, i32) {
    %c0_i32 = arith.constant 0 : i32
    %c0_i32_0 = arith.constant 0 : i32
    %c0_i32_1 = arith.constant 0 : i32
    return %arg0, %c0_i32, %c0_i32_0 : i32, i32, i32
  }
  func.func @transform_2(%arg0: i32) -> (i32, i32) {
    %c0_i32 = arith.constant 0 : i32
    %c0_i32_0 = arith.constant 0 : i32
    return %arg0, %c0_i32 : i32, i32
  }
  func.func @transform_3(%arg0: i32) -> (i32, i32, i32) {
    %c0_i32 = arith.constant 0 : i32
    %c0_i32_0 = arith.constant 0 : i32
    %c0_i32_1 = arith.constant 0 : i32
    %c0_i32_2 = arith.constant 0 : i32
    return %c0_i32, %c0_i32_0, %c0_i32_1 : i32, i32, i32
  }
  func.func @transform_4(%arg0: i32) -> (i32, i32) {
    %c0_i32 = arith.constant 0 : i32
    %c0_i32_0 = arith.constant 0 : i32
    %c0_i32_1 = arith.constant 0 : i32
    return %c0_i32, %c0_i32_0 : i32, i32
  }
  func.func @transform_5(%arg0: i32) -> (i32, i32, i32) {
    %c0_i32 = arith.constant 0 : i32
    %c0_i32_0 = arith.constant 0 : i32
    %c0_i32_1 = arith.constant 0 : i32
    %c0_i32_2 = arith.constant 0 : i32
    return %c0_i32, %c0_i32_0, %c0_i32_1 : i32, i32, i32
  }
  func.func @transform_6(%arg0: i32) -> (i32, i32, i32) {
    %c0_i32 = arith.constant 0 : i32
    %c0_i32_0 = arith.constant 0 : i32
    %c0_i32_1 = arith.constant 0 : i32
    %c0_i32_2 = arith.constant 0 : i32
    return %c0_i32, %c0_i32_0, %c0_i32_1 : i32, i32, i32
  }
  func.func @transform_7(%arg0: i32) -> (i32, i32) {
    %c0_i32 = arith.constant 0 : i32
    %c0_i32_0 = arith.constant 0 : i32
    %c0_i32_1 = arith.constant 0 : i32
    return %c0_i32, %c0_i32_0 : i32, i32
  }
  func.func @transform_8(%arg0: i32) -> (i32, i32, i32) {
    %c0_i32 = arith.constant 0 : i32
    %c0_i32_0 = arith.constant 0 : i32
    %c0_i32_1 = arith.constant 0 : i32
    %c0_i32_2 = arith.constant 0 : i32
    return %c0_i32, %c0_i32_0, %c0_i32_1 : i32, i32, i32
  }
  func.func @transform_9(%arg0: i32) -> (i32, i32) {
    %c0_i32 = arith.constant 0 : i32
    %c0_i32_0 = arith.constant 0 : i32
    %c0_i32_1 = arith.constant 0 : i32
    return %c0_i32, %c0_i32_0 : i32, i32
  }
  func.func @transform_10(%arg0: i32) -> (i32, i32) {
    %c0_i32 = arith.constant 0 : i32
    %c0_i32_0 = arith.constant 0 : i32
    %c0_i32_1 = arith.constant 0 : i32
    return %c0_i32, %c0_i32_0 : i32, i32
  }
  func.func @transform_11(%arg0: i32) -> (i32, i32) {
    %c0_i32 = arith.constant 0 : i32
    %c0_i32_0 = arith.constant 0 : i32
    %c0_i32_1 = arith.constant 0 : i32
    return %c0_i32, %c0_i32_0 : i32, i32
  }
  func.func @transform_12(%arg0: i32) -> (i32, i32) {
    %c0_i32 = arith.constant 0 : i32
    %c0_i32_0 = arith.constant 0 : i32
    %c0_i32_1 = arith.constant 0 : i32
    return %c0_i32, %c0_i32_0 : i32, i32
  }
  func.func @transform_13(%arg0: i32) -> (i32, i32) {
    %c0_i32 = arith.constant 0 : i32
    %c0_i32_0 = arith.constant 0 : i32
    %c0_i32_1 = arith.constant 0 : i32
    return %c0_i32, %c0_i32_0 : i32, i32
  }
  func.func @transform_14(%arg0: i32) -> (i32, i32) {
    %c0_i32 = arith.constant 0 : i32
    %c0_i32_0 = arith.constant 0 : i32
    %c0_i32_1 = arith.constant 0 : i32
    return %c0_i32, %c0_i32_0 : i32, i32
  }
  func.func @transform_15(%arg0: i32) -> (i32, i32) {
    %c0_i32 = arith.constant 0 : i32
    %c0_i32_0 = arith.constant 0 : i32
    %c0_i32_1 = arith.constant 0 : i32
    return %c0_i32, %c0_i32_0 : i32, i32
  }
  func.func @transform_16(%arg0: i32) -> (i32, i32) {
    %c0_i32 = arith.constant 0 : i32
    %c0_i32_0 = arith.constant 0 : i32
    %c0_i32_1 = arith.constant 0 : i32
    return %c0_i32, %c0_i32_0 : i32, i32
  }
  func.func @transform_17(%arg0: i32) -> (i32, i32) {
    %c0_i32 = arith.constant 0 : i32
    %c0_i32_0 = arith.constant 0 : i32
    return %arg0, %c0_i32 : i32, i32
  }
}

</mosaic_0001>

<bundles_post_ra>
// kernel: three_inputs_net.1
= control target key start
LH: loop header
LB: loop body
LE: loop exit
PB: predicated region body
PF: predicated region fallthrough
CT: control target
= control target key end

     0   :  { %s6748_s0 = inlined_call_operand.vmem [shape: bf16[8,10,64], index: 0, kind: input, shape index: {}]   ;;  %s6749_s1 = inlined_call_operand.vmem [shape: bf16[8,18,64], index: 1, kind: input, shape index: {}]   ;;  %s6750_s2 = inlined_call_operand.vmem [shape: bf16[8,8], index: 2, kind: input, shape index: {}]   ;;  %s6751_s3 = inlined_call_operand.vmem [shape: bf16[3,64,128], index: 3, kind: input, shape index: {}]   ;;  %s6752_s4 = inlined_call_operand.vmem [shape: f32[1,128], index: 4, kind: input, shape index: {}]   ;;  %s6753_s5 = inlined_call_operand.vmem [shape: bf16[4,128,256], index: 5, kind: input, shape index: {}]   ;;  %s6754_s6 = inlined_call_operand.hbm [shape: bf16[3,64,128], index: 6, kind: input, shape index: {}]   ;;  %s6755_s7 = inlined_call_operand.vmem [shape: f32[1,128], index: 7, kind: input, shape index: {}]   ;;  %s6756_s8 = inlined_call_operand.vmem [shape: bf16[4,128,256], index: 8, kind: input, shape index: {}]   ;;  %s6757_s9 = inlined_call_operand.vmem [shape: bf16[8,64], index: 9, kind: input, shape index: {}]   ;;  %s6758_s10 = inlined_call_operand.vmem [shape: f32[1,64], index: 10, kind: input, shape index: {}]   ;;  %s6759_s11 = inlined_call_operand.vmem [shape: bf16[64,128], index: 11, kind: input, shape index: {}]   ;;  %s6760_s12 = inlined_call_operand.vmem [shape: f32[1,128], index: 12, kind: input, shape index: {}]   ;;  %s6761_s13 = inlined_call_operand.vmem [shape: bf16[128,256], index: 13, kind: input, shape index: {}]   ;;  %s6762_s14 = inlined_call_operand.vmem [shape: f32[1,256], index: 14, kind: input, shape index: {}]   ;;  %s6763_s15 = inlined_call_operand.vmem [shape: f32[256,128], index: 15, kind: input, shape index: {}]   ;;  %s6764_s16 = inlined_call_operand.vmem [shape: f32[1,128], index: 16, kind: input, shape index: {}]   ;;  %s6765_s17 = inlined_call_operand.vmem [shape: f32[8,128], index: 17, kind: output, shape index: {}]  }
   0x1   :  { %6781 = sst [smem:[#allocation17_spill]] %s6748_s0 }
   0x2   :  { %6782 = sst [smem:[#allocation18_spill]] %s6749_s1 }
   0x3   :  { %22 = vsyncpa [#allocation3], 0  ;;  %s39_s26 = sshll.u32 %s6754_s6, 4  ;;  %s4580_s27 = smov [#allocation2]   ;;  %s40_s26 = int_to_ptr.hbm [resolvable:$true] %s39_s26 }
   0x4   :  { %s41_s28 = sshll.u32 %s4580_s27, 4  ;;  %s4581_s29 = smov 64   ;;  %s42_s28 = int_to_ptr.vmem [resolvable:$true] %s41_s28 }
   0x5   :  { %s4582_s0 = smov 4  }
   0x6   :  { %47 = dma.hbm_to_vmem [thread:$0]  %s40_s26, 1536, %s42_s28, [#allocation3], %s4581_s29, %s4581_s29, %s4582_s0  }
   0x7   :  { %4578 = dma.done.wait [#allocation3], 1536  }
   0x8   :  { %4579 = vsyncadd [#allocation3], 4294965760  ;;  %v4373_v0 = vld [vmem:[%s6751_s3 + $0x38] sm:$0xff]  ;;  %v4372_v3 = vld [vmem:[%s6751_s3 + $0x30] sm:$0xff]  ;;  %vm98_vm0 = vsmask.f32 3328 }
   0x9   :  { %v4369_v1 = vld [vmem:[%s6751_s3 + $0x18] sm:$0xff]  ;;  %275 = vmatpush.bf16.msra.mxu0 %v4373_v0  ;;  %v4368_v4 = vld [vmem:[%s6751_s3 + $0x10] sm:$0xff]  ;;  %vm393_vm1 = vcmask 1042432   ;;  %vm394_vm2 = vcmask 1046532   ;;  %s6783_s29 = sld [smem:[#allocation17_spill]]  ;;  %v4371_v14 = vld [vmem:[%s6751_s3 + $0x28] sm:$0xff] }
   0xa   :  { %v4377_v2 = vld [vmem:[%s6751_s3 + $0x58] sm:$0xff]  ;;  %360 = vmatpush.bf16.msra.mxu1 %v4369_v1  ;;  %v4376_v5 = vld [vmem:[%s6751_s3 + $0x50] sm:$0xff]  ;;  %v4367_v15 = vld [vmem:[%s6751_s3 + $0x8] sm:$0xff]  ;;  %vm99_vm3 = vsmask.f32 7440  ;;  %vm258_vm4 = vcmask 523264  }
   0xb   :  { %489 = vmatpush.bf16.msra.mxu2 %v4377_v2  ;;  %v4375_v18 = vld [vmem:[%s6751_s3 + $0x48] sm:$0xff]  ;;  %vm4725_vm5 = vmor %vm393_vm1, %vm394_vm2  ;;  %v6784_v26 = vmov 0  ;;  %v4370_v28 = vld [vmem:[%s6751_s3 + $0x20] sm:$0xff]  ;;  %v6787_v35 = vmov 0  ;;  %vm542_vm7 = vcmask 1041408   ;;  %vm647_vm8 = vcmask 1041409  }
   0xc   :  { %v6785_v26 = vsel %vm4725_vm5, 4294967295, %v6784_v26  ;;  %v4366_v34 = vld [vmem:[%s6751_s3] sm:$0xff]  ;;  %vm4740_vm6 = vmor %vm98_vm0, %vm99_vm3  ;;  %vm649_vm9 = vcmask 1042434   ;;  %vm651_vm10 = vcmask 1043459   ;;  %vm653_vm11 = vcmask 1044484   ;;  %s6825_s6 = sld [smem:[#allocation18_spill]] }
   0xd   :  { %276 = vmatpush.bf16.msra.mxu0 %v4372_v3  ;;  %6786 = vst [vmem:[#allocation5_spill] sm:$0xff] %v6785_v26  ;;  %v6788_v35 = vsel %vm4740_vm6, 4294967295, %v6787_v35  ;;  %v4374_v41 = vld [vmem:[%s6751_s3 + $0x40] sm:$0xff]  ;;  %vm655_vm12 = vcmask 1045509   ;;  %vm657_vm13 = vcmask 1046534   ;;  %vm659_vm14 = vcmask 1047559  }
   0xe   :  { %361 = vmatpush.bf16.msra.mxu1 %v4368_v4  ;;  %6789 = vst [vmem:[#allocation6_spill] sm:$0xff] %v6788_v35  ;;  %v5276_v26 = vld [vmem:[%s6753_s5 + $0x120] sm:$0xf]  ;;  %vm2235_vm15 = vcmask 1043456   ;;  %vm3177_vm0 = vcmask 64512  }
   0xf   :  { %v74_v6 = vld [vmem:[%s6783_s29] sm:$0xf]  ;;  %v75_v7 = vld [vmem:[%s6783_s29 + $0x4] sm:$0x1]  ;;  %v76_v8 = vld [vmem:[%s6783_s29 + $0x8] sm:$0xf]  ;;  %490 = vmatpush.bf16.msra.mxu2 %v4376_v5 }
  0x10   :  { %v77_v9 = vld [vmem:[%s6783_s29 + $0xc] sm:$0x1]  ;;  %v102_v10 = vshrl.u32 %v74_v6, 16  ;;  %v105_v11 = vshll.u32 %v74_v6, 16  ;;  %v111_v12 = vshll.u32 %v75_v7, 16  ;;  %v116_v13 = vshrl.u32 %v76_v8, 16 }
  0x11   :  { %v119_v16 = vshll.u32 %v76_v8, 16  ;;  %v125_v17 = vshll.u32 %v77_v9, 16  ;;  %v4718_v22 = vld [vmem:[%s6783_s29 + $0x10] sm:$0xf]  ;;  %v3490_v25 = vld [vmem:[%s6783_s29] sm:$0xf]  ;;  %277 = vmatpush.bf16.msra.mxu0 %v4371_v14 }
  0x12   :  { %v104_v19 = vrot.slane %v102_v10, 4  ;;  %v107_v20 = vrot.slane %v105_v11, 5  ;;  %v118_v21 = vrot.slane %v116_v13, 4  ;;  %v113_v23 = vrot.slane %v111_v12, 5  ;;  %v80_v33 = vld [vmem:[%s6783_s29 + $0x18] sm:$0xf]  ;;  %362 = vmatpush.bf16.msra.mxu1 %v4367_v15 }
  0x13   :  { %v121_v24 = vrot.slane %v119_v16, 5  ;;  %v3524_v27 = vrot.slane %v74_v6, 9  ;;  %v398_v30 = vrot.slane %v75_v7, 5  ;;  %v3525_v31 = vrot.slane %v76_v8, 9  ;;  %v4362_v38 = vld [vmem:[%s6783_s29 + $0x4] sm:$0xf0]  ;;  %491 = vmatpush.bf16.msra.mxu2 %v4375_v18 }
  0x14   :  { %v108_v29 = vor.u32 %v107_v20, %v104_v19  ;;  %v402_v32 = vrot.slane %v77_v9, 5  ;;  %v127_v37 = vrot.slane %v125_v17, 5  ;;  %v130_v39 = vshrl.u32 %v4718_v22, 16  ;;  %v79_v52 = vld [vmem:[%s6783_s29 + $0x14] sm:$0x1] }
  0x15   :  { %v122_v36 = vor.u32 %v121_v24, %v118_v21  ;;  %v133_v40 = vshll.u32 %v4718_v22, 16  ;;  %v399_v43 = vsel %vm4725_vm5, %v3524_v27, %v398_v30  ;;  %v144_v45 = vshrl.u32 %v80_v33, 16  ;;  %v81_v53 = vld [vmem:[%s6783_s29 + $0x1c] sm:$0x1]  ;;  %278 = vmatpush.bf16.msra.mxu0 %v4370_v28  ;;  %v82_v11 = vld [vmem:[%s6783_s29 + $0x20] sm:$0xf] }
  0x16   :  { %v109_v42 = vrot.slane %v108_v29, 4  ;;  %v403_v44 = vsel %vm4725_vm5, %v3525_v31, %v402_v32  ;;  %v437_v47 = vunpack.c.l.b16 %v399_v43  ;;  %v132_v49 = vrot.slane %v130_v39, 4  ;;  %363 = vmatpush.bf16.msra.mxu1 %v4366_v34  ;;  %v84_v12 = vld [vmem:[%s6783_s29 + $0x28] sm:$0xf]  ;;  %v3494_v21 = vld [vmem:[%s6783_s29 + $0x10] sm:$0xf] }
  0x17   :  { %v123_v46 = vrot.slane %v122_v36, 4  ;;  %v438_v48 = vunpack.c.l.b16 %v403_v44  ;;  %v3491_v51 = vor.u32 %v4362_v38, %v3490_v25  ;;  %v135_v54 = vrot.slane %v133_v40, 5  ;;  %492 = vmatpush.bf16.msra.mxu2 %v4374_v41  ;;  %v85_v34 = vld [vmem:[%s6783_s29 + $0x2c] sm:$0x1]  ;;  %v5286_v35 = vld [vmem:[%s6753_s5 + $0x1e0] sm:$0xf] }
  0x18   :  { %v114_v50 = vsel %vm4740_vm6, %v109_v42, %v113_v23  ;;  %v146_v55 = vrot.slane %v144_v45, 4  ;;  %v147_v59 = vshll.u32 %v80_v33, 16  ;;  %v139_v62 = vshll.u32 %v79_v52, 16 }
  0x19   :  { %v128_v56 = vsel %vm4740_vm6, %v123_v46, %v127_v37  ;;  %v222_v57 = vunpack.c.l.b16 %v114_v50  ;;  %v445_v58 = vpack.c.b16 %v438_v48, %v437_v47  ;;  %v136_v61 = vor.u32 %v135_v54, %v132_v49  ;;  %3520 = vmatmul.msk.bf16.vlgmr.msra.gmra.mxu1 %vm258_vm4, %v3491_v51  ;;  %v86_v50 = vld [vmem:[%s6783_s29 + $0x30] sm:$0xf]  ;;  %v88_v51 = vld [vmem:[%s6783_s29 + $0x38] sm:$0xf] }
  0x1a   :  { %v223_v60 = vunpack.c.l.b16 %v128_v56  ;;  %v149_v63 = vrot.slane %v147_v59, 5  ;;  %v153_v0 = vshll.u32 %v81_v53, 16  ;;  %v3526_v3 = vrot.slane %v4718_v22, 9  ;;  %v4363_v22 = vld [vmem:[%s6783_s29 + $0x14] sm:$0xf0] }
  0x1b   :  { %3556 = vmatmul.msk.bf16.vlgmr.msra.gmra.mxu2 %vm258_vm4, %v445_v58  ;;  %v406_v4 = vrot.slane %v79_v52, 5  ;;  %v3527_v5 = vrot.slane %v80_v33, 9  ;;  %v410_v6 = vrot.slane %v81_v53, 5  ;;  %v137_v7 = vrot.slane %v136_v61, 4  ;;  %v83_v33 = vld [vmem:[%s6783_s29 + $0x24] sm:$0x1] }
  0x1c   :  { %v230_v1 = vpack.c.b16 %v223_v60, %v222_v57  ;;  %v150_v2 = vor.u32 %v149_v63, %v146_v55  ;;  %v141_v8 = vrot.slane %v139_v62, 5  ;;  %v155_v10 = vrot.slane %v153_v0, 5  ;;  %v3498_v60 = vld [vmem:[%s6783_s29 + $0x20] sm:$0xf]  ;;  %v4364_v61 = vld [vmem:[%s6783_s29 + $0x24] sm:$0xf0] }
  0x1d   :  { %v407_v13 = vsel %vm4725_vm5, %v3526_v3, %v406_v4  ;;  %v411_v14 = vsel %vm4725_vm5, %v3527_v5, %v410_v6  ;;  %v158_v15 = vshrl.u32 %v82_v11, 16  ;;  %v161_v16 = vshll.u32 %v82_v11, 16 }
  0x1e   :  { %3484 = vmatmul.msk.bf16.vlgmr.msra.gmra.mxu0 %vm258_vm4, %v230_v1  ;;  %v151_v9 = vrot.slane %v150_v2, 4  ;;  %v142_v17 = vsel %vm4740_vm6, %v137_v7, %v141_v8  ;;  %v172_v19 = vshrl.u32 %v84_v12, 16  ;;  %v175_v20 = vshll.u32 %v84_v12, 16  ;;  %v87_v7 = vld [vmem:[%s6783_s29 + $0x34] sm:$0x1] }
  0x1f   :  { %v439_v23 = vunpack.c.l.b16 %v407_v13  ;;  %v440_v24 = vunpack.c.l.b16 %v411_v14  ;;  %v224_v25 = vunpack.c.l.b16 %v142_v17  ;;  %v160_v28 = vrot.slane %v158_v15, 4  ;;  %v89_v8 = vld [vmem:[%s6783_s29 + $0x3c] sm:$0x1] }
  0x20   :  { %v156_v18 = vsel %vm4740_vm6, %v151_v9, %v155_v10  ;;  %v163_v29 = vrot.slane %v161_v16, 5  ;;  %v174_v30 = vrot.slane %v172_v19, 4  ;;  %v177_v31 = vrot.slane %v175_v20, 5 }
  0x21   :  { %v225_v27 = vunpack.c.l.b16 %v156_v18  ;;  %v3495_v32 = vor.u32 %v4363_v22, %v3494_v21  ;;  %v446_v36 = vpack.c.b16 %v440_v24, %v439_v23  ;;  %v167_v39 = vshll.u32 %v83_v33, 16 }
  0x22   :  { %v164_v38 = vor.u32 %v163_v29, %v160_v28  ;;  %v178_v40 = vor.u32 %v177_v31, %v174_v30  ;;  %v181_v41 = vshll.u32 %v85_v34, 16  ;;  %v3528_v42 = vrot.slane %v82_v11, 9  ;;  %v3502_v28 = vld [vmem:[%s6783_s29 + $0x30] sm:$0xf]  ;;  %v4365_v29 = vld [vmem:[%s6783_s29 + $0x34] sm:$0xf0] }
  0x23   :  { %v231_v37 = vpack.c.b16 %v225_v27, %v224_v25  ;;  %v414_v43 = vrot.slane %v83_v33, 5  ;;  %v3529_v44 = vrot.slane %v84_v12, 9  ;;  %v418_v45 = vrot.slane %v85_v34, 5 }
  0x24   :  { %v165_v46 = vrot.slane %v164_v38, 4  ;;  %v169_v47 = vrot.slane %v167_v39, 5  ;;  %v179_v48 = vrot.slane %v178_v40, 4  ;;  %v183_v49 = vrot.slane %v181_v41, 5  ;;  %v4848_v41 = vld [vmem:[%s6752_s4] ss:$0 sm:$0xff] }
  0x25   :  { %v415_v52 = vsel %vm4725_vm5, %v3528_v42, %v414_v43  ;;  %v419_v53 = vsel %vm4725_vm5, %v3529_v44, %v418_v45  ;;  %v186_v54 = vshrl.u32 %v86_v50, 16  ;;  %v189_v55 = vshll.u32 %v86_v50, 16 }
  0x26   :  { %v170_v56 = vsel %vm4740_vm6, %v165_v46, %v169_v47  ;;  %v184_v57 = vsel %vm4740_vm6, %v179_v48, %v183_v49  ;;  %v200_v58 = vshrl.u32 %v88_v51, 16  ;;  %v203_v59 = vshll.u32 %v88_v51, 16  ;;  %v3618_v49 = vld [vmem:[%s6753_s5 + $0x70] sm:$0xf] }
  0x27   :  { %v441_v62 = vunpack.c.l.b16 %v415_v52  ;;  %v442_v63 = vunpack.c.l.b16 %v419_v53  ;;  %v226_v0 = vunpack.c.l.b16 %v170_v56  ;;  %v227_v1 = vunpack.c.l.b16 %v184_v57 }
  0x28   :  { %v188_v2 = vrot.slane %v186_v54, 4  ;;  %v191_v3 = vrot.slane %v189_v55, 5  ;;  %v202_v4 = vrot.slane %v200_v58, 4  ;;  %v205_v5 = vrot.slane %v203_v59, 5 }
  0x29   :  { %3521 = vmatmul.msk.bf16.gmra.mxu1 %vm258_vm4, %v3495_v32  ;;  %v3499_v6 = vor.u32 %v4364_v61, %v3498_v60  ;;  %v447_v9 = vpack.c.b16 %v442_v63, %v441_v62  ;;  %v232_v10 = vpack.c.b16 %v227_v1, %v226_v0  ;;  %v195_v12 = vshll.u32 %v87_v7, 16 }
  0x2a   :  { %v192_v11 = vor.u32 %v191_v3, %v188_v2  ;;  %v206_v13 = vor.u32 %v205_v5, %v202_v4  ;;  %v209_v14 = vshll.u32 %v89_v8, 16  ;;  %v3530_v15 = vrot.slane %v86_v50, 9  ;;  %v4393_v50 = vld [vmem:[%s6753_s5 + $0x74] sm:$0xf0] }
  0x2b   :  { %3557 = vmatmul.msk.bf16.gmra.mxu2 %vm258_vm4, %v446_v36  ;;  %v422_v16 = vrot.slane %v87_v7, 5  ;;  %v3531_v17 = vrot.slane %v88_v51, 9  ;;  %v426_v18 = vrot.slane %v89_v8, 5  ;;  %v197_v20 = vrot.slane %v195_v12, 5  ;;  %v3610_v7 = vld [vmem:[%s6753_s5 + $0x60] sm:$0xf] }
  0x2c   :  { %v193_v19 = vrot.slane %v192_v11, 4  ;;  %v207_v21 = vrot.slane %v206_v13, 4  ;;  %v211_v22 = vrot.slane %v209_v14, 5  ;;  %v3503_v34 = vor.u32 %v4365_v29, %v3502_v28  ;;  %v4391_v8 = vld [vmem:[%s6753_s5 + $0x64] sm:$0xf0] }
  0x2d   :  { %v423_v23 = vsel %vm4725_vm5, %v3530_v15, %v422_v16  ;;  %v427_v24 = vsel %vm4725_vm5, %v3531_v17, %v426_v18  ;;  %v3619_v57 = vor.u32 %v4393_v50, %v3618_v49 }
  0x2e   :  { %3485 = vmatmul.msk.bf16.gmra.mxu0 %vm258_vm4, %v231_v37  ;;  %v198_v25 = vsel %vm4740_vm6, %v193_v19, %v197_v20  ;;  %v212_v27 = vsel %vm4740_vm6, %v207_v21, %v211_v22  ;;  %v443_v30 = vunpack.c.l.b16 %v423_v23  ;;  %v444_v31 = vunpack.c.l.b16 %v427_v24 }
  0x2f   :  { %v228_v32 = vunpack.c.l.b16 %v198_v25  ;;  %v229_v33 = vunpack.c.l.b16 %v212_v27  ;;  %743 = vmatpush.bf16.msra.mxu3 %v3619_v57 }
  0x30   :  { %v448_v36 = vpack.c.b16 %v444_v31, %v443_v30 }
  0x31   :  { %v233_v37 = vpack.c.b16 %v229_v33, %v228_v32 }
  0x39   :  { %3522 = vmatmul.msk.bf16.gmra.mxu1 %vm258_vm4, %v3499_v6 }
  0x3b   :  { %3558 = vmatmul.msk.bf16.gmra.mxu2 %vm258_vm4, %v447_v9 }
  0x3e   :  { %3486 = vmatmul.msk.bf16.gmra.mxu0 %vm258_vm4, %v232_v10  ;;  %v3611_v10 = vor.u32 %v4391_v8, %v3610_v7  ;;  %v3698_v7 = vld [vmem:[%s6753_s5 + $0xf0] sm:$0xf] }
  0x40   :  { %744 = vmatpush.bf16.msra.mxu3 %v3611_v10 }
  0x49   :  { %3523 = vmatmul.msk.bf16.gmra.mxu1 %vm258_vm4, %v3503_v34 }
  0x4b   :  { %3559 = vmatmul.msk.bf16.gmra.mxu2 %vm258_vm4, %v448_v36 }
  0x4e   :  { %3487 = vmatmul.msk.bf16.gmra.mxu0 %vm258_vm4, %v233_v37 }
  0x96   :  { %v365_v38 = vpop.f32.mrf.mxu1 }
  0x9b   :  { %v280_v39 = vpop.f32.mrf.mxu0 }
  0x9c   :  { %v366_v40 = vadd.f32 %v365_v38, %v280_v39 }
  0x9e   :  { %v494_v42 = vpop.f32.mrf.mxu2  ;;  %v367_v46 = vpop.f32.mrf.mxu1 }
  0x9f   :  { %v514_v43 = vadd.f32 %v494_v42, %v366_v40 }
  0xa1   :  { %v526_v44 = vadd.f32 %v4848_v41, %v514_v43 }
  0xa3   :  { %v282_v45 = vpop.f32.mrf.mxu0  ;;  %v534_v47 = vmax.f32 %v526_v44, 0.0 }
  0xa4   :  { %v368_v48 = vadd.f32 %v367_v46, %v282_v45 }
  0xa5   :  { %v543_v51 = vsel %vm542_vm7, %v534_v47, 0.0  ;;  %v784_v52 = vrot.slane %v534_v47, 2  ;;  %v1022_v53 = vrot.slane %v534_v47, 4  ;;  %v1260_v54 = vrot.slane %v534_v47, 6 }
  0xa6   :  { %v544_v55 = vrot.slane %v543_v51, 4  ;;  %v496_v56 = vpop.f32.mrf.mxu2  ;;  %v370_v16 = vpop.f32.mrf.mxu1 }
  0xa7   :  { %v800_v58 = vsel %vm542_vm7, %v784_v52, 0.0  ;;  %v1038_v59 = vsel %vm542_vm7, %v1022_v53, 0.0  ;;  %v1276_v60 = vsel %vm542_vm7, %v1260_v54, 0.0  ;;  %v515_v61 = vadd.f32 %v496_v56, %v368_v48 }
  0xa8   :  { %v545_v62 = vadd.f32 %v544_v55, %v543_v51  ;;  %v801_v63 = vrot.slane %v800_v58, 4  ;;  %v1039_v0 = vrot.slane %v1038_v59, 4  ;;  %v1277_v1 = vrot.slane %v1276_v60, 4 }
  0xa9   :  { %v527_v2 = vadd.f32 %v4848_v41, %v515_v61 }
  0xaa   :  { %v546_v3 = vrot.slane %v545_v62, 2  ;;  %v802_v4 = vadd.f32 %v801_v63, %v800_v58  ;;  %v1040_v5 = vadd.f32 %v1039_v0, %v1038_v59  ;;  %v1278_v6 = vadd.f32 %v1277_v1, %v1276_v60  ;;  %v3602_v63 = vld [vmem:[%s6753_s5 + $0x50] sm:$0xf]  ;;  %v4389_v0 = vld [vmem:[%s6753_s5 + $0x54] sm:$0xf0] }
  0xab   :  { %v535_v9 = vmax.f32 %v527_v2, 0.0  ;;  %v285_v15 = vpop.f32.mrf.mxu0 }
  0xac   :  { %v547_v11 = vadd.f32 %v546_v3, %v545_v62  ;;  %v803_v12 = vrot.slane %v802_v4, 2  ;;  %v1041_v13 = vrot.slane %v1040_v5, 2  ;;  %v1279_v14 = vrot.slane %v1278_v6, 2 }
  0xad   :  { %v550_v17 = vsel %vm542_vm7, %v535_v9, 0.0  ;;  %v785_v18 = vrot.slane %v535_v9, 2  ;;  %v1023_v19 = vrot.slane %v535_v9, 4  ;;  %v1261_v20 = vrot.slane %v535_v9, 6 }
  0xae   :  { %v548_v21 = vrot.slane %v547_v11, 1  ;;  %v804_v22 = vadd.f32 %v803_v12, %v802_v4  ;;  %v1042_v23 = vadd.f32 %v1041_v13, %v1040_v5  ;;  %v1280_v24 = vadd.f32 %v1279_v14, %v1278_v6  ;;  %v499_v25 = vpop.f32.mrf.mxu2  ;;  %v372_v58 = vpop.f32.mrf.mxu1  ;;  %v3594_v5 = vld [vmem:[%s6753_s5 + $0x40] sm:$0xf]  ;;  %v4387_v6 = vld [vmem:[%s6753_s5 + $0x44] sm:$0xf0] }
  0xaf   :  { %v551_v27 = vrot.slane %v550_v17, 4  ;;  %v807_v28 = vsel %vm542_vm7, %v785_v18, 0.0  ;;  %v1045_v29 = vsel %vm542_vm7, %v1023_v19, 0.0  ;;  %v1283_v30 = vsel %vm542_vm7, %v1261_v20, 0.0  ;;  %v4409_v12 = vld [vmem:[%s6753_s5 + $0xf4] sm:$0xf0] }
  0xb0   :  { %v549_v31 = vadd.f32 %v548_v21, %v547_v11  ;;  %v805_v32 = vrot.slane %v804_v22, 1  ;;  %v1043_v33 = vrot.slane %v1042_v23, 1  ;;  %v1281_v34 = vrot.slane %v1280_v24, 1 }
  0xb1   :  { %v552_v36 = vadd.f32 %v551_v27, %v550_v17  ;;  %v808_v37 = vrot.slane %v807_v28, 4  ;;  %v1046_v38 = vrot.slane %v1045_v29, 4  ;;  %v1284_v39 = vrot.slane %v1283_v30, 4 }
  0xb2   :  { %v806_v40 = vadd.f32 %v805_v32, %v804_v22  ;;  %v1044_v42 = vadd.f32 %v1043_v33, %v1042_v23  ;;  %v1282_v43 = vadd.f32 %v1281_v34, %v1280_v24  ;;  %v599_v48 = vmul.f32 0.5, %v549_v31 }
  0xb3   :  { %v553_v44 = vrot.slane %v552_v36, 2  ;;  %v809_v45 = vadd.f32 %v808_v37, %v807_v28  ;;  %v1047_v46 = vadd.f32 %v1046_v38, %v1045_v29  ;;  %v1285_v47 = vadd.f32 %v1284_v39, %v1283_v30  ;;  %v287_v57 = vpop.f32.mrf.mxu0  ;;  %v4408_v38 = vld [vmem:[%s6753_s5 + $0xf4] sm:$0xf] }
  0xb4   :  { %v856_v49 = vmul.f32 0.5, %v806_v40  ;;  %v371_v50 = vadd.f32 %v370_v16, %v285_v15  ;;  %v1094_v55 = vmul.f32 0.5, %v1044_v42  ;;  %v1332_v56 = vmul.f32 0.5, %v1282_v43 }
  0xb5   :  { %v554_v51 = vadd.f32 %v553_v44, %v552_v36  ;;  %v810_v52 = vrot.slane %v809_v45, 2  ;;  %v1048_v53 = vrot.slane %v1047_v46, 2  ;;  %v1286_v54 = vrot.slane %v1285_v47, 2 }
  0xb6   :  { %v607_v1 = vpack.c.bf16 %v599_v48, %v599_v48  ;;  %v864_v2 = vpack.c.bf16 %v856_v49, %v856_v49  ;;  %v516_v3 = vadd.f32 %v499_v25, %v371_v50  ;;  %v501_v4 = vpop.f32.mrf.mxu2  ;;  %v1102_v13 = vpack.c.bf16 %v1094_v55, %v1094_v55 }
  0xb7   :  { %v555_v59 = vrot.slane %v554_v51, 1  ;;  %v811_v60 = vadd.f32 %v810_v52, %v809_v45  ;;  %v1049_v61 = vadd.f32 %v1048_v53, %v1047_v46  ;;  %v1287_v62 = vadd.f32 %v1286_v54, %v1285_v47  ;;  %v375_v45 = vpop.f32.mrf.mxu1  ;;  %v3700_v46 = vld [vmem:[%s6753_s5 + $0xf8] sm:$0xf0]  ;;  %v4385_v52 = vld [vmem:[%s6753_s5 + $0x34] sm:$0xf0] }
  0xb8   :  { %v528_v14 = vadd.f32 %v4848_v41, %v516_v3  ;;  %v3603_v15 = vor.u32 %v4389_v0, %v3602_v63  ;;  %v1340_v16 = vpack.c.bf16 %v1332_v56, %v1332_v56  ;;  %v373_v19 = vadd.f32 %v372_v58, %v287_v57  ;;  %v3690_v58 = vld [vmem:[%s6753_s5 + $0xe0] sm:$0xf] }
  0xb9   :  { %v556_v8 = vadd.f32 %v555_v59, %v554_v51  ;;  %v812_v9 = vrot.slane %v811_v60, 1  ;;  %v1050_v10 = vrot.slane %v1049_v61, 1  ;;  %v1288_v11 = vrot.slane %v1287_v62, 1  ;;  %v3586_v51 = vld [vmem:[%s6753_s5 + $0x30] sm:$0xf] }
  0xba   :  { %v4891_v20 = vunpack.c.l.b16 %v607_v1  ;;  %v536_v21 = vmax.f32 %v528_v14, 0.0  ;;  %745 = vmatpush.bf16.msra.mxu3 %v3603_v15  ;;  %v3595_v22 = vor.u32 %v4387_v6, %v3594_v5  ;;  %v3699_v23 = vor.u32 %v4409_v12, %v3698_v7  ;;  %v4407_v59 = vld [vmem:[%s6753_s5 + $0xe4] sm:$0xf0] }
  0xbb   :  { %v813_v17 = vadd.f32 %v812_v9, %v811_v60  ;;  %v1051_v18 = vadd.f32 %v1050_v10, %v1049_v61  ;;  %v4893_v24 = vunpack.c.l.b16 %v864_v2  ;;  %v4895_v25 = vmul.f32 0.5, %v556_v8  ;;  %v290_v44 = vpop.f32.mrf.mxu0 }
  0xbc   :  { %v1289_v27 = vadd.f32 %v1288_v11, %v1287_v62  ;;  %v517_v28 = vadd.f32 %v501_v4, %v373_v19  ;;  %v557_v29 = vsel %vm542_vm7, %v536_v21, 0.0  ;;  %v786_v30 = vrot.slane %v536_v21, 2  ;;  %994 = vmatpush.bf16.msrb.mxu0 %v3699_v23 }
  0xbd   :  { %v1024_v31 = vrot.slane %v536_v21, 4  ;;  %v1262_v32 = vrot.slane %v536_v21, 6  ;;  %v4898_v33 = vunpack.c.l.b16 %v1102_v13  ;;  %v4900_v34 = vunpack.c.l.b16 %v1340_v16 }
  0xbe   :  { %v4902_v36 = vmul.f32 0.5, %v813_v17  ;;  %v4904_v37 = vmul.f32 0.5, %v1051_v18  ;;  %v558_v39 = vrot.slane %v557_v29, 4  ;;  %v814_v40 = vsel %vm542_vm7, %v786_v30, 0.0  ;;  %746 = vmatpush.bf16.msra.mxu3 %v3595_v22  ;;  %v504_v57 = vpop.f32.mrf.mxu2 }
  0xbf   :  { %6790 = vst [vmem:[#allocation7_spill] sm:$0xff] %v4898_v33  ;;  %v1052_v42 = vsel %vm542_vm7, %v1024_v31, 0.0  ;;  %v1290_v43 = vsel %vm542_vm7, %v1262_v32, 0.0  ;;  %v608_v47 = vpack.c.bf16 %v4895_v25, %v4895_v25  ;;  %v4917_v48 = vmul.f32 0.5, %v1289_v27  ;;  %v377_v32 = vpop.f32.mrf.mxu1  ;;  %v5349_v33 = vld [vmem:[%s6753_s5 + $0x1d4] sm:$0xf] }
  0xc0   :  { %6791 = vst [vmem:[#allocation8_spill] sm:$0xff] %v4900_v34  ;;  %v815_v49 = vrot.slane %v814_v40, 4  ;;  %v376_v50 = vadd.f32 %v375_v45, %v290_v44  ;;  %v559_v53 = vadd.f32 %v558_v39, %v557_v29  ;;  %v1053_v54 = vrot.slane %v1052_v42, 4  ;;  %v5291_v34 = vld [vmem:[%s6753_s5 + $0x1e4] sm:$0xf0] }
  0xc1   :  { %6792 = vst [vmem:[#allocation9_spill] sm:$0xff] %v4917_v48  ;;  %v1291_v55 = vrot.slane %v1290_v43, 4  ;;  %v529_v56 = vadd.f32 %v4848_v41, %v517_v28  ;;  %v865_v60 = vpack.c.bf16 %v4902_v36, %v4902_v36  ;;  %v1103_v61 = vpack.c.bf16 %v4904_v37, %v4904_v37 }
  0xc2   :  { %v816_v62 = vadd.f32 %v815_v49, %v814_v40  ;;  %v3703_v63 = vor.u32 %v4408_v38, %v3700_v46  ;;  %v560_v0 = vrot.slane %v559_v53, 2  ;;  %v1054_v1 = vadd.f32 %v1053_v54, %v1052_v42 }
  0xc3   :  { %v1292_v2 = vadd.f32 %v1291_v55, %v1290_v43  ;;  %v537_v3 = vmax.f32 %v529_v56, 0.0  ;;  %v518_v5 = vadd.f32 %v504_v57, %v376_v50  ;;  %v3587_v6 = vor.u32 %v4385_v52, %v3586_v51  ;;  %v292_v31 = vpop.f32.mrf.mxu0 }
  0xc4   :  { %v817_v4 = vrot.slane %v816_v62, 2  ;;  %1007 = vmatpush.bf16.msrb.mxu1 %v3703_v63  ;;  %v3691_v7 = vor.u32 %v4407_v59, %v3690_v58  ;;  %v561_v8 = vadd.f32 %v560_v0, %v559_v53  ;;  %v1055_v9 = vrot.slane %v1054_v1, 2 }
  0xc5   :  { %v1293_v10 = vrot.slane %v1292_v2, 2  ;;  %v564_v11 = vsel %vm542_vm7, %v537_v3, 0.0  ;;  %v787_v14 = vrot.slane %v537_v3, 2  ;;  %v1025_v15 = vrot.slane %v537_v3, 4  ;;  %747 = vmatpush.bf16.msra.mxu3 %v3587_v6  ;;  %v5098_v6 = vld [vmem:[%s6753_s5 + $0x68] sm:$0xf0] }
  0xc6   :  { %v818_v12 = vadd.f32 %v817_v4, %v816_v62  ;;  %v565_v13 = vrot.slane %v564_v11, 4  ;;  %995 = vmatpush.bf16.msrb.mxu0 %v3691_v7  ;;  %v562_v16 = vrot.slane %v561_v8, 1  ;;  %v1056_v17 = vadd.f32 %v1055_v9, %v1054_v1  ;;  %v506_v45 = vpop.f32.mrf.mxu2 }
  0xc7   :  { %v1294_v18 = vadd.f32 %v1293_v10, %v1292_v2  ;;  %v1263_v19 = vrot.slane %v537_v3, 6  ;;  %v821_v23 = vsel %vm542_vm7, %v787_v14, 0.0  ;;  %v1059_v25 = vsel %vm542_vm7, %v1025_v15, 0.0  ;;  %v5266_v2 = vld [vmem:[%s6753_s5 + $0x34] sm:$0xf] }
  0xc8   :  { %v819_v21 = vrot.slane %v818_v12, 1  ;;  %v566_v22 = vadd.f32 %v565_v13, %v564_v11  ;;  %v563_v27 = vadd.f32 %v562_v16, %v561_v8  ;;  %v1057_v28 = vrot.slane %v1056_v17, 1 }
  0xc9   :  { %v1295_v29 = vrot.slane %v1294_v18, 1  ;;  %v822_v30 = vrot.slane %v821_v23, 4  ;;  %v1060_v38 = vrot.slane %v1059_v25, 4  ;;  %v1297_v39 = vsel %vm542_vm7, %v1263_v19, 0.0 }
  0xca   :  { %v820_v36 = vadd.f32 %v819_v21, %v818_v12  ;;  %v567_v37 = vrot.slane %v566_v22, 2  ;;  %v1058_v40 = vadd.f32 %v1057_v28, %v1056_v17  ;;  %v530_v44 = vadd.f32 %v4848_v41, %v518_v5 }
  0xcb   :  { %v1296_v42 = vadd.f32 %v1295_v29, %v1294_v18  ;;  %v823_v43 = vadd.f32 %v822_v30, %v821_v23  ;;  %v4941_v46 = vmul.f32 0.5, %v563_v27  ;;  %v1298_v51 = vrot.slane %v1297_v39, 4  ;;  %v295_v17 = vpop.f32.mrf.mxu0  ;;  %v380_v18 = vpop.f32.mrf.mxu1 }
  0xcc   :  { %v858_v49 = vmul.f32 0.5, %v820_v36  ;;  %v4943_v50 = vadd.f32 %v567_v37, %v566_v22  ;;  %v4945_v52 = vunpack.c.l.b16 %v608_v47  ;;  %v1096_v53 = vmul.f32 0.5, %v1058_v40  ;;  %v5271_v47 = vld [vmem:[%s6753_s5 + $0x38] sm:$0xf0] }
  0xcd   :  { %v4947_v54 = vmul.f32 0.5, %v1296_v42  ;;  %v1061_v55 = vadd.f32 %v1060_v38, %v1059_v25  ;;  %v824_v57 = vrot.slane %v823_v43, 2  ;;  %v1299_v58 = vadd.f32 %v1298_v51, %v1297_v39 }
  0xce   :  { %v378_v59 = vadd.f32 %v377_v32, %v292_v31  ;;  %v4951_v62 = vunpack.c.l.b16 %v865_v60  ;;  %v4953_v63 = vunpack.c.l.b16 %v1103_v61  ;;  %v866_v0 = vpack.c.bf16 %v858_v49, %v858_v49  ;;  %v4406_v60 = vld [vmem:[%s6753_s5 + $0xe4] sm:$0xf]  ;;  %v3692_v61 = vld [vmem:[%s6753_s5 + $0xe8] sm:$0xf0]  ;;  %v509_v30 = vpop.f32.mrf.mxu2 }
  0xcf   :  { %6793 = vst [vmem:[#allocation10_spill] sm:$0xff] %v4947_v54  ;;  %v538_v1 = vmax.f32 %v530_v44, 0.0  ;;  %v1300_v3 = vrot.slane %v1299_v58, 2  ;;  %v1104_v5 = vpack.c.bf16 %v1096_v53, %v1096_v53  ;;  %v1062_v7 = vrot.slane %v1061_v55, 2 }
  0xd0   :  { %6794 = vst [vmem:[#allocation11_spill] sm:$0xff] %v4953_v63  ;;  %v519_v4 = vadd.f32 %v506_v45, %v378_v59  ;;  %v4967_v9 = vadd.f32 %v824_v57, %v823_v43  ;;  %v4969_v13 = vunpack.c.l.b16 %v866_v0  ;;  %v3695_v23 = vor.u32 %v4406_v60, %v3692_v61 }
  0xd1   :  { %v571_v8 = vsel %vm542_vm7, %v538_v1, 0.0  ;;  %v1301_v10 = vadd.f32 %v1300_v3, %v1299_v58  ;;  %v788_v12 = vrot.slane %v538_v1, 2  ;;  %v1026_v14 = vrot.slane %v538_v1, 4  ;;  %v3578_v3 = vld [vmem:[%s6753_s5 + $0x20] sm:$0xf] }
  0xd2   :  { %v572_v11 = vrot.slane %v571_v8, 4  ;;  %v1264_v15 = vrot.slane %v538_v1, 6  ;;  %v531_v16 = vadd.f32 %v4848_v41, %v519_v4  ;;  %v4975_v31 = vadd.f32 %v1062_v7, %v1061_v55  ;;  %1008 = vmatpush.bf16.msrb.mxu1 %v3695_v23  ;;  %v4383_v4 = vld [vmem:[%s6753_s5 + $0x24] sm:$0xf0] }
  0xd3   :  { %v1302_v19 = vrot.slane %v1301_v10, 1  ;;  %v828_v22 = vsel %vm542_vm7, %v788_v12, 0.0  ;;  %v1066_v27 = vsel %vm542_vm7, %v1026_v14, 0.0  ;;  %v4982_v58 = vunpack.c.l.b16 %v1104_v5  ;;  %v3682_v5 = vld [vmem:[%s6753_s5 + $0xd0] sm:$0xf] }
  0xd4   :  { %v573_v21 = vadd.f32 %v572_v11, %v571_v8  ;;  %v829_v25 = vrot.slane %v828_v22, 4  ;;  %v1304_v28 = vsel %vm542_vm7, %v1264_v15, 0.0  ;;  %v539_v29 = vmax.f32 %v531_v16, 0.0  ;;  %v4404_v16 = vld [vmem:[%s6753_s5 + $0xd4] sm:$0xf] }
  0xd5   :  { %v1067_v36 = vrot.slane %v1066_v27, 4  ;;  %v1305_v37 = vrot.slane %v1304_v28, 4  ;;  %v1303_v43 = vadd.f32 %v1302_v19, %v1301_v10  ;;  %6795 = vst [vmem:[#allocation12_spill] sm:$0xff] %v4982_v58  ;;  %v381_v1 = vadd.f32 %v380_v18, %v295_v17  ;;  %v4405_v10 = vld [vmem:[%s6753_s5 + $0xd4] sm:$0xf0] }
  0xd6   :  { %v574_v32 = vrot.slane %v573_v21, 2  ;;  %v830_v38 = vadd.f32 %v829_v25, %v828_v22  ;;  %v578_v39 = vsel %vm542_vm7, %v539_v29, 0.0  ;;  %v789_v40 = vrot.slane %v539_v29, 2  ;;  %v3684_v17 = vld [vmem:[%s6753_s5 + $0xd8] sm:$0xf0]  ;;  %v297_v25 = vpop.f32.mrf.mxu0 }
  0xd7   :  { %v1027_v42 = vrot.slane %v539_v29, 4  ;;  %v1068_v45 = vadd.f32 %v1067_v36, %v1066_v27  ;;  %v1306_v49 = vadd.f32 %v1305_v37, %v1304_v28  ;;  %v579_v53 = vrot.slane %v578_v39, 4  ;;  %v3570_v18 = vld [vmem:[%s6753_s5 + $0x10] sm:$0xf]  ;;  %v382_v27 = vpop.f32.mrf.mxu1  ;;  %v4381_v28 = vld [vmem:[%s6753_s5 + $0x14] sm:$0xf0] }
  0xd8   :  { %v4978_v44 = vadd.f32 %v574_v32, %v573_v21  ;;  %v831_v51 = vrot.slane %v830_v38, 2  ;;  %v835_v57 = vsel %vm542_vm7, %v789_v40, 0.0  ;;  %v1265_v15 = vrot.slane %v539_v29, 6  ;;  %v5240_v22 = vld [vmem:[%s6753_s5 + $0x134] sm:$0xf0] }
  0xd9   :  { %v1073_v55 = vsel %vm542_vm7, %v1027_v42, 0.0  ;;  %v1069_v59 = vrot.slane %v1068_v45, 2  ;;  %v1307_v0 = vrot.slane %v1306_v49, 2  ;;  %v4992_v8 = vadd.f32 %v579_v53, %v578_v39  ;;  %v4403_v39 = vld [vmem:[%s6753_s5 + $0xc4] sm:$0xf0] }
  0xda   :  { %v4990_v7 = vadd.f32 %v831_v51, %v830_v38  ;;  %v836_v60 = vrot.slane %v835_v57, 4  ;;  %v1074_v61 = vrot.slane %v1073_v55, 4  ;;  %v5011_v19 = vmul.f32 0.5, %v1303_v43  ;;  %v3674_v38 = vld [vmem:[%s6753_s5 + $0xc0] sm:$0xf]  ;;  %v511_v51 = vpop.f32.mrf.mxu2 }
  0xdb   :  { %v1308_v14 = vadd.f32 %v1307_v0, %v1306_v49  ;;  %v5015_v23 = vadd.f32 %v1069_v59, %v1068_v45  ;;  %v1311_v36 = vsel %vm542_vm7, %v1265_v15, 0.0  ;;  %v520_v37 = vadd.f32 %v509_v30, %v381_v1  ;;  %v4402_v49 = vld [vmem:[%s6753_s5 + $0xc4] sm:$0xf]  ;;  %v3676_v30 = vld [vmem:[%s6753_s5 + $0xc8] sm:$0xf0] }
  0xdc   :  { %6796 = vst [vmem:[#allocation13_spill] sm:$0xff] %v5011_v19  ;;  %v5020_v32 = vadd.f32 %v836_v60, %v835_v57  ;;  %v5030_v42 = vadd.f32 %v1074_v61, %v1073_v55  ;;  %v1312_v43 = vrot.slane %v1311_v36, 4  ;;  %v3579_v45 = vor.u32 %v4383_v4, %v3578_v3  ;;  %v3562_v55 = vld [vmem:[%s6753_s5] sm:$0xf]  ;;  %v4379_v1 = vld [vmem:[%s6753_s5 + $0x4] sm:$0xf0] }
  0xdd   :  { %v1309_v29 = vrot.slane %v1308_v14, 1  ;;  %v532_v57 = vadd.f32 %v4848_v41, %v520_v37  ;;  %v383_v59 = vadd.f32 %v382_v27, %v297_v25  ;;  %v3683_v0 = vor.u32 %v4405_v10, %v3682_v5  ;;  %v3778_v3 = vld [vmem:[%s6753_s5 + $0x170] sm:$0xf]  ;;  %v4425_v4 = vld [vmem:[%s6753_s5 + $0x174] sm:$0xf0] }
  0xde   :  { %v1313_v61 = vadd.f32 %v1312_v43, %v1311_v36  ;;  %748 = vmatpush.bf16.msra.mxu3 %v3579_v45  ;;  %v3687_v5 = vor.u32 %v4404_v16, %v3684_v17  ;;  %v3571_v10 = vor.u32 %v4381_v28, %v3570_v18  ;;  %v5060_v15 = vld [vmem:[%s6753_s5 + $0x78] sm:$0xf0]  ;;  %v5065_v25 = vld [vmem:[%s6753_s5 + $0xb0] sm:$0xf]  ;;  %v3675_v16 = vor.u32 %v4403_v39, %v3674_v38  ;;  %v4401_v18 = vld [vmem:[%s6753_s5 + $0xb4] sm:$0xf0] }
  0xdf   :  { %v1310_v53 = vadd.f32 %v1309_v29, %v1308_v14  ;;  %v5055_v14 = vld [vmem:[%s6753_s5 + $0x74] sm:$0xf]  ;;  %v540_v29 = vmax.f32 %v532_v57, 0.0  ;;  %996 = vmatpush.bf16.msrb.mxu0 %v3683_v0  ;;  %v521_v17 = vadd.f32 %v511_v51, %v383_v59  ;;  %v3679_v43 = vor.u32 %v4402_v49, %v3676_v30  ;;  %v3668_v38 = vld [vmem:[%s6753_s5 + $0xb8] sm:$0xf0] }
  0xe0   :  { %v5074_v28 = vld [vmem:[%s6753_s5 + $0xb4] sm:$0xf]  ;;  %v1314_v37 = vrot.slane %v1313_v61, 2  ;;  %1009 = vmatpush.bf16.msrb.mxu1 %v3687_v5  ;;  %v3779_v45 = vor.u32 %v4425_v4, %v3778_v3  ;;  %v3770_v39 = vld [vmem:[%s6753_s5 + $0x160] sm:$0xf]  ;;  %v3563_v4 = vor.u32 %v4379_v1, %v3562_v55  ;;  %v3667_v55 = vor.u32 %v4401_v18, %v5065_v25 }
  0xe1   :  { %v5083_v51 = vmul.f32 0.5, %v1310_v53  ;;  %v585_v57 = vsel %vm542_vm7, %v540_v29, 0.0  ;;  %v790_v59 = vrot.slane %v540_v29, 2  ;;  %v1028_v0 = vrot.slane %v540_v29, 4  ;;  %v4423_v5 = vld [vmem:[%s6753_s5 + $0x164] sm:$0xf0] }
  0xe2   :  { %v586_v49 = vrot.slane %v585_v57, 4  ;;  %v1266_v30 = vrot.slane %v540_v29, 6  ;;  %749 = vmatpush.bf16.msra.mxu3 %v3571_v10  ;;  %v533_v3 = vadd.f32 %v4848_v41, %v521_v17  ;;  %1232 = vmatpush.bf16.msrb.mxu2 %v3779_v45  ;;  %v5093_v53 = vld [vmem:[%s6753_s5 + $0x64] sm:$0xf]  ;;  %v3623_v41 = vor.u32 %v5055_v14, %v5060_v15  ;;  %v5108_v1 = vld [vmem:[%s6753_s5 + $0xa0] sm:$0xf] }
  0xe3   :  { %6797 = vst [vmem:[#allocation14_spill] sm:$0xff] %v5083_v51  ;;  %v842_v56 = vsel %vm542_vm7, %v790_v59, 0.0  ;;  %v1080_v36 = vsel %vm542_vm7, %v1028_v0, 0.0  ;;  %997 = vmatpush.bf16.msrb.mxu0 %v3675_v16  ;;  %v5113_v10 = vld [vmem:[%s6753_s5 + $0xa4] sm:$0xf0]  ;;  %v5115_v29 = vadd.f32 %v1314_v37, %v1313_v61  ;;  %v3671_v16 = vor.u32 %v5074_v28, %v3668_v38 }
  0xe4   :  { %v843_v17 = vrot.slane %v842_v56, 4  ;;  %v1081_v45 = vrot.slane %v1080_v36, 4  ;;  %1010 = vmatpush.bf16.msrb.mxu1 %v3679_v43  ;;  %v5121_v14 = vld [vmem:[%s6753_s5 + $0xa4] sm:$0xf]  ;;  %v5126_v15 = vld [vmem:[%s6753_s5 + $0xa8] sm:$0xf0]  ;;  %v5128_v25 = vadd.f32 %v586_v49, %v585_v57  ;;  %v3771_v37 = vor.u32 %v4423_v5, %v3770_v39 }
  0xe5   :  { %6798 = vst [vmem:[#allocation15_spill] sm:$0xff] %v5115_v29  ;;  %v1318_v61 = vsel %vm542_vm7, %v1266_v30, 0.0  ;;  %v541_v18 = vmax.f32 %v533_v3, 0.0  ;;  %v5134_v28 = vld [vmem:[%s6753_s5 + $0x150] sm:$0xf]  ;;  %v3615_v57 = vor.u32 %v5093_v53, %v5098_v6  ;;  %v3659_v39 = vor.u32 %v5113_v10, %v5108_v1 }
  0xe6   :  { %v5139_v43 = vld [vmem:[%s6753_s5 + $0x154] sm:$0xf0]  ;;  %v5141_v38 = vadd.f32 %v843_v17, %v842_v56  ;;  %v1319_v59 = vrot.slane %v1318_v61, 4  ;;  %750 = vmatpush.bf16.msra.mxu3 %v3563_v4  ;;  %v5150_v0 = vld [vmem:[%s6753_s5 + $0x54] sm:$0xf]  ;;  %v5191_v12 = vadd.f32 %v1081_v45, %v1080_v36  ;;  %1233 = vmatpush.bf16.msrb.mxu2 %v3771_v37 }
  0xe7   :  { %v5155_v5 = vld [vmem:[%s6753_s5 + $0x58] sm:$0xf0]  ;;  %v5160_v56 = vld [vmem:[%s6753_s5 + $0x90] sm:$0xf]  ;;  %v5165_v6 = vld [vmem:[%s6753_s5 + $0x94] sm:$0xf0]  ;;  %998 = vmatpush.bf16.msrb.mxu0 %v3667_v55 }
  0xe8   :  { %v5170_v49 = vld [vmem:[%s6753_s5 + $0x94] sm:$0xf]  ;;  %v5175_v30 = vld [vmem:[%s6753_s5 + $0x98] sm:$0xf0]  ;;  %v5178_v3 = vsel %vm542_vm7, %v541_v18, 0.0  ;;  %v791_v4 = vrot.slane %v541_v18, 2  ;;  %v5193_v27 = vadd.f32 %v1319_v59, %v1318_v61  ;;  %1011 = vmatpush.bf16.msrb.mxu1 %v3671_v16  ;;  %v3763_v59 = vor.u32 %v5139_v43, %v5134_v28 }
  0xe9   :  { %v1029_v53 = vrot.slane %v541_v18, 4  ;;  %v1267_v1 = vrot.slane %v541_v18, 6  ;;  %v5183_v10 = vld [vmem:[%s6753_s5 + $0x140] sm:$0xf]  ;;  %v5188_v17 = vld [vmem:[%s6753_s5 + $0x144] sm:$0xf0]  ;;  %v3607_v51 = vor.u32 %v5150_v0, %v5155_v5  ;;  %v3651_v54 = vor.u32 %v5165_v6, %v5160_v56 }
  0xea   :  { %756 = vmatpush.bf16.msrb.mxu3 %v3623_v41  ;;  %6799 = vst [vmem:[#allocation16_spill] sm:$0xff] %v5193_v27  ;;  %v3663_v41 = vor.u32 %v5121_v14, %v5126_v15  ;;  %v5200_v55 = vld [vmem:[%s6753_s5 + $0x44] sm:$0xf]  ;;  %v5205_v18 = vld [vmem:[%s6753_s5 + $0x48] sm:$0xf0]  ;;  %v849_v15 = vsel %vm542_vm7, %v791_v4, 0.0  ;;  %v3655_v48 = vor.u32 %v5170_v49, %v5175_v30  ;;  %v3755_v63 = vor.u32 %v5188_v17, %v5183_v10 }
  0xeb   :  { %v5210_v36 = vld [vmem:[%s6753_s5 + $0x80] sm:$0xf]  ;;  %v5215_v45 = vld [vmem:[%s6753_s5 + $0x84] sm:$0xf0]  ;;  %v5220_v16 = vld [vmem:[%s6753_s5 + $0x84] sm:$0xf]  ;;  %999 = vmatpush.bf16.msrb.mxu0 %v3659_v39  ;;  %1234 = vmatpush.bf16.msrb.mxu2 %v3763_v59  ;;  %v3599_v17 = vor.u32 %v5200_v55, %v5205_v18 }
  0xec   :  { %v5225_v14 = vld [vmem:[%s6753_s5 + $0x88] sm:$0xf0]  ;;  %v1087_v61 = vsel %vm542_vm7, %v1029_v53, 0.0  ;;  %v1325_v37 = vsel %vm542_vm7, %v1267_v1, 0.0  ;;  %v5235_v60 = vld [vmem:[%s6753_s5 + $0x130] sm:$0xf]  ;;  %1012 = vmatpush.bf16.msrb.mxu1 %v3663_v41 }
  0xed   :  { %v5245_v4 = vld [vmem:[%s6753_s5 + $0x1f0] sm:$0xf]  ;;  %v5250_v53 = vld [vmem:[%s6753_s5 + $0x1f4] sm:$0xf0]  ;;  %v5255_v28 = vld [vmem:[%s6753_s5 + $0x1f4] sm:$0xf]  ;;  %v3747_v18 = vor.u32 %v5240_v22, %v5235_v60  ;;  %v3591_v22 = vor.u32 %v5266_v2, %v5271_v47 }
  0xee   :  { %v5260_v43 = vld [vmem:[%s6753_s5 + $0x1f8] sm:$0xf0]  ;;  %v850_v11 = vrot.slane %v849_v15, 4  ;;  %v1088_v40 = vrot.slane %v1087_v61, 4  ;;  %v1326_v21 = vrot.slane %v1325_v37, 4  ;;  %757 = vmatpush.bf16.msrb.mxu3 %v3615_v57  ;;  %v588_v59 = vrot.slane %v5128_v25, 2 }
  0xef   :  { %v5281_v1 = vld [vmem:[%s6753_s5 + $0x124] sm:$0xf0]  ;;  %v5303_v58 = vld [vmem:[%s6753_s5 + $0x1e4] sm:$0xf]  ;;  %v5308_v29 = vld [vmem:[%s6753_s5 + $0x1e8] sm:$0xf0]  ;;  %1000 = vmatpush.bf16.msrb.mxu0 %v3651_v54  ;;  %1235 = vmatpush.bf16.msrb.mxu2 %v3755_v63 }
  0xf0   :  { %v5313_v57 = vld [vmem:[%s6753_s5 + $0x24] sm:$0xf]  ;;  %v5318_v39 = vld [vmem:[%s6753_s5 + $0x28] sm:$0xf0]  ;;  %v5323_v0 = vld [vmem:[%s6753_s5 + $0x110] sm:$0xf]  ;;  %v5340_v49 = vadd.f32 %v850_v11, %v849_v15  ;;  %v5342_v30 = vadd.f32 %v1326_v21, %v1325_v37  ;;  %v6800_v21 = vpack.c.bf16 %v4941_v46, %v4941_v46  ;;  %v5366_v10 = vadd.f32 %v1088_v40, %v1087_v61  ;;  %1013 = vmatpush.bf16.msrb.mxu1 %v3655_v48 }
  0xf1   :  { %v5328_v5 = vld [vmem:[%s6753_s5 + $0x114] sm:$0xf0]  ;;  %v5333_v56 = vld [vmem:[%s6753_s5 + $0x1d0] sm:$0xf]  ;;  %v5354_v27 = vld [vmem:[%s6753_s5 + $0x1d8] sm:$0xf0]  ;;  %v3643_v15 = vor.u32 %v5215_v45, %v5210_v36  ;;  %v3647_v37 = vor.u32 %v5220_v16, %v5225_v14  ;;  %v3859_v36 = vor.u32 %v5250_v53, %v5245_v4  ;;  %v3863_v45 = vor.u32 %v5255_v28, %v5260_v43 }
  0xf2   :  { %v5338_v6 = vld [vmem:[%s6753_s5 + $0x1d4] sm:$0xf0]  ;;  %v5359_v11 = vld [vmem:[%s6753_s5 + $0x14] sm:$0xf]  ;;  %v5364_v41 = vunpack.c.l.b16 %v6800_v21  ;;  %v5377_v19 = vld [vmem:[%s6753_s5 + $0x18] sm:$0xf0]  ;;  %758 = vmatpush.bf16.msrb.mxu3 %v3607_v51  ;;  %v3739_v60 = vor.u32 %v5281_v1, %v5276_v26  ;;  %v3851_v61 = vor.u32 %v5291_v34, %v5286_v35  ;;  %v3855_v4 = vor.u32 %v5303_v58, %v5308_v29 }
  0xf3   :  { %v5382_v46 = vld [vmem:[%s6753_s5 + $0x100] sm:$0xf]  ;;  %v5387_v40 = vld [vmem:[%s6753_s5 + $0x104] sm:$0xf0]  ;;  %v3583_v53 = vor.u32 %v5313_v57, %v5318_v39  ;;  %v3731_v54 = vor.u32 %v5328_v5, %v5323_v0  ;;  %v3843_v47 = vor.u32 %v5338_v6, %v5333_v56  ;;  %v5424_v26 = vld [vmem:[%s6753_s5 + $0x1c4] sm:$0xf]  ;;  %v3847_v34 = vor.u32 %v5349_v33, %v5354_v27  ;;  %1001 = vmatpush.bf16.msrb.mxu0 %v3643_v15 }
  0xf4   :  { %v5399_v16 = vld [vmem:[%s6753_s5 + $0x1c0] sm:$0xf]  ;;  %v5404_v14 = vld [vmem:[%s6753_s5 + $0x1c4] sm:$0xf0]  ;;  %v5429_v35 = vld [vmem:[%s6753_s5 + $0x1c8] sm:$0xf0]  ;;  %v3575_v48 = vor.u32 %v5359_v11, %v5377_v19  ;;  %v3723_v2 = vor.u32 %v5387_v40, %v5382_v46  ;;  %v589_v57 = vadd.f32 %v588_v59, %v5128_v25  ;;  %1014 = vmatpush.bf16.msrb.mxu1 %v3647_v37  ;;  %1236 = vmatpush.bf16.msrb.mxu2 %v3747_v18 }
  0xf5   :  { %v3835_v58 = vor.u32 %v5404_v14, %v5399_v16  ;;  %v6801_v51 = vrot.slane %v4943_v50, 1  ;;  %v6802_v28 = vrot.slane %v4978_v44, 1  ;;  %v6803_v43 = vrot.slane %v4992_v8, 2  ;;  %v5465_v18 = vld [vmem:[%s6753_s5 + $0x8] sm:$0xf0] }
  0xf6   :  { %759 = vmatpush.bf16.msrb.mxu3 %v3599_v17  ;;  %v3839_v39 = vor.u32 %v5424_v26, %v5429_v35  ;;  %v6804_v21 = vrot.slane %v5178_v3, 4  ;;  %v648_v25 = vsel %vm647_vm8, %v4945_v52, %v4891_v20  ;;  %v5470_v20 = vld [vmem:[%s6753_s5 + $0x174] sm:$0xf]  ;;  %v5475_v52 = vld [vmem:[%s6753_s5 + $0x178] sm:$0xf0]  ;;  %v6808_v11 = vrot.slane %v4975_v31, 1 }
  0xf7   :  { %v570_v29 = vadd.f32 %v6801_v51, %v4943_v50  ;;  %v577_v63 = vadd.f32 %v6802_v28, %v4978_v44  ;;  %v582_v1 = vadd.f32 %v6803_v43, %v4992_v8  ;;  %1470 = vmatpush.bf16.msra.mxu0 %v3859_v36  ;;  %v590_v44 = vrot.slane %v589_v57, 1 }
  0xf8   :  { %v594_v55 = vadd.f32 %v6804_v21, %v5178_v3  ;;  %1483 = vmatpush.bf16.msra.mxu1 %v3863_v45  ;;  %v5460_v3 = vld [vmem:[%s6753_s5 + $0x4] sm:$0xf]  ;;  %v650_v59 = vsel %vm649_vm9, %v5364_v41, %v648_v25  ;;  %1237 = vmatpush.bf16.msrb.mxu2 %v3739_v60  ;;  %v6805_v41 = vrot.slane %v4967_v9, 1  ;;  %v1065_v16 = vadd.f32 %v6808_v11, %v4975_v31 }
  0xf9   :  { %v583_v50 = vrot.slane %v582_v1, 1  ;;  %v602_v51 = vmul.f32 0.5, %v570_v29  ;;  %v603_v28 = vmul.f32 0.5, %v577_v63  ;;  %v591_v15 = vadd.f32 %v590_v44, %v589_v57 }
  0xfa   :  { %v595_v8 = vrot.slane %v594_v55, 2  ;;  %760 = vmatpush.bf16.msrb.mxu3 %v3591_v22  ;;  %v3567_v21 = vor.u32 %v5460_v3, %v5465_v18  ;;  %v827_v22 = vadd.f32 %v6805_v41, %v4967_v9  ;;  %v845_v3 = vrot.slane %v5141_v38, 2 }
  0xfb   :  { %v584_v17 = vadd.f32 %v583_v50, %v582_v1  ;;  %v610_v37 = vpack.c.bf16 %v602_v51, %v602_v51  ;;  %v611_v36 = vpack.c.bf16 %v603_v28, %v603_v28  ;;  %1471 = vmatpush.bf16.msra.mxu0 %v3851_v61  ;;  %v605_v63 = vmul.f32 0.5, %v591_v15 }
  0xfc   :  { %v596_v45 = vadd.f32 %v595_v8, %v594_v55  ;;  %1484 = vmatpush.bf16.msra.mxu1 %v3855_v4  ;;  %v3783_v55 = vor.u32 %v5470_v20, %v5475_v52  ;;  %v6806_v51 = vrot.slane %v4990_v7, 1  ;;  %v6807_v8 = vrot.slane %v5020_v32, 2  ;;  %1238 = vmatpush.bf16.msrb.mxu2 %v3731_v54  ;;  %v4433_v20 = vld [vmem:[%s6753_s5 + $0x1b4] sm:$0xf0]  ;;  %v6811_v52 = vld [vmem:[#allocation13_spill] sm:$0xff] }
  0xfd   :  { %v604_v29 = vmul.f32 0.5, %v584_v17  ;;  %v642_v43 = vunpack.c.l.b16 %v610_v37  ;;  %v643_v1 = vunpack.c.l.b16 %v611_v36  ;;  %v613_v61 = vpack.c.bf16 %v605_v63, %v605_v63 }
  0xfe   :  { %v597_v57 = vrot.slane %v596_v45, 1  ;;  %v834_v60 = vadd.f32 %v6806_v51, %v4990_v7  ;;  %761 = vmatpush.bf16.msrb.mxu3 %v3583_v53  ;;  %v839_v25 = vadd.f32 %v6807_v8, %v5020_v32  ;;  %v852_v15 = vrot.slane %v5340_v49, 2 }
  0xff   :  { %v612_v50 = vpack.c.bf16 %v604_v29, %v604_v29  ;;  %v652_v44 = vsel %vm651_vm10, %v642_v43, %v650_v59  ;;  %1472 = vmatpush.bf16.msra.mxu0 %v3843_v47  ;;  %v645_v17 = vunpack.c.l.b16 %v613_v61  ;;  %v859_v37 = vmul.f32 0.5, %v827_v22 }
 0x100   :  { %v598_v4 = vadd.f32 %v597_v57, %v596_v45  ;;  %v654_v28 = vsel %vm653_vm11, %v643_v1, %v652_v44  ;;  %1485 = vmatpush.bf16.msra.mxu1 %v3847_v34  ;;  %v840_v32 = vrot.slane %v839_v25, 1  ;;  %v846_v53 = vadd.f32 %v845_v3, %v5141_v38  ;;  %1239 = vmatpush.bf16.msrb.mxu2 %v3723_v2  ;;  %v4457_v45 = vld [vmem:[#allocation2 + $0x38] sm:$0xff] }
 0x101   :  { %v644_v9 = vunpack.c.l.b16 %v612_v50  ;;  %v860_v36 = vmul.f32 0.5, %v834_v60  ;;  %v853_v6 = vadd.f32 %v852_v15, %v5340_v49  ;;  %v867_v47 = vpack.c.bf16 %v859_v37, %v859_v37  ;;  %v4456_v60 = vld [vmem:[#allocation2 + $0x30] sm:$0xff]  ;;  %v3828_v15 = vld [vmem:[%s6753_s5 + $0x1b8] sm:$0xf0] }
 0x102   :  { %v606_v7 = vmul.f32 0.5, %v598_v4  ;;  %v905_v18 = vsel %vm647_vm8, %v4951_v62, %v4893_v24  ;;  %762 = vmatpush.bf16.msrb.mxu3 %v3575_v48  ;;  %v841_v0 = vadd.f32 %v840_v32, %v839_v25  ;;  %v847_v5 = vrot.slane %v846_v53, 1  ;;  %v6812_v37 = vld [vmem:[#allocation16_spill] sm:$0xff] }
 0x103   :  { %v656_v56 = vsel %vm655_vm12, %v644_v9, %v654_v28  ;;  %1473 = vmatpush.bf16.msra.mxu0 %v3835_v58  ;;  %v854_v38 = vrot.slane %v853_v6, 1  ;;  %v868_v49 = vpack.c.bf16 %v860_v36, %v860_v36  ;;  %v900_v54 = vunpack.c.l.b16 %v867_v47 }
 0x104   :  { %v614_v33 = vpack.c.bf16 %v606_v7, %v606_v7  ;;  %v658_v27 = vsel %vm657_vm13, %v645_v17, %v656_v56  ;;  %v906_v34 = vsel %vm649_vm9, %v4969_v13, %v905_v18  ;;  %1486 = vmatpush.bf16.msra.mxu1 %v3839_v39  ;;  %v848_v62 = vadd.f32 %v847_v5, %v846_v53  ;;  %v4432_v17 = vld [vmem:[%s6753_s5 + $0x1b4] sm:$0xf]  ;;  %v4422_v18 = vld [vmem:[%s6753_s5 + $0x164] sm:$0xf] }
 0x105   :  { %v861_v19 = vmul.f32 0.5, %v841_v0  ;;  %v855_v14 = vadd.f32 %v854_v38, %v853_v6  ;;  %v901_v48 = vunpack.c.l.b16 %v868_v49  ;;  %v907_v58 = vsel %vm651_vm10, %v900_v54, %v906_v34  ;;  %1807 = vmatpush.bf16.msra.mxu2 %v4457_v45  ;;  %v6814_v56 = vld [vmem:[#allocation7_spill] sm:$0xff]  ;;  %v4431_v54 = vld [vmem:[%s6753_s5 + $0x1a4] sm:$0xf0]  ;;  %v4430_v34 = vld [vmem:[%s6753_s5 + $0x1a4] sm:$0xf] }
 0x106   :  { %v646_v24 = vunpack.c.l.b16 %v614_v33  ;;  %v6809_v13 = vrot.slane %v5015_v23, 1  ;;  %763 = vmatpush.bf16.msrb.mxu3 %v3567_v21  ;;  %v862_v26 = vmul.f32 0.5, %v848_v62  ;;  %v6810_v2 = vrot.slane %v5030_v42, 2  ;;  %v6815_v6 = vld [vmem:[#allocation11_spill] sm:$0xff]  ;;  %v3772_v33 = vld [vmem:[%s6753_s5 + $0x168] sm:$0xf0] }
 0x107   :  { %v869_v35 = vpack.c.bf16 %v861_v19, %v861_v19  ;;  %v863_v31 = vmul.f32 0.5, %v855_v14  ;;  %v908_v29 = vsel %vm653_vm11, %v901_v48, %v907_v58  ;;  %v1083_v63 = vrot.slane %v5191_v12, 2  ;;  %v4420_v14 = vld [vmem:[%s6753_s5 + $0x154] sm:$0xf]  ;;  %v3764_v48 = vld [vmem:[%s6753_s5 + $0x158] sm:$0xf0] }
 0x108   :  { %v1072_v46 = vadd.f32 %v6809_v13, %v5015_v23  ;;  %v660_v40 = vsel %vm659_vm14, %v646_v24, %v658_v27  ;;  %v1077_v39 = vadd.f32 %v6810_v2, %v5030_v42  ;;  %v870_v43 = vpack.c.bf16 %v862_v26, %v862_v26  ;;  %v3818_v27 = vld [vmem:[%s6753_s5 + $0x1a0] sm:$0xf]  ;;  %v3820_v24 = vld [vmem:[%s6753_s5 + $0x1a8] sm:$0xf0] }
 0x109   :  { %v5537_v59 = vpack.c.b16 %v660_v40, %v660_v40  ;;  %v902_v1 = vunpack.c.l.b16 %v869_v35  ;;  %v1090_v57 = vrot.slane %v5366_v10, 2  ;;  %v871_v21 = vpack.c.bf16 %v863_v31, %v863_v31  ;;  %1808 = vmatpush.bf16.msra.mxu2 %v4456_v60  ;;  %v4455_v58 = vld [vmem:[#allocation2 + $0x28] sm:$0xff]  ;;  %v6816_v40 = vld [vmem:[#allocation12_spill] sm:$0xff]  ;;  %v3810_v31 = vld [vmem:[%s6753_s5 + $0x190] sm:$0xf] }
 0x10a   :  { %v1078_v23 = vrot.slane %v1077_v39, 1  ;;  %v1084_v41 = vadd.f32 %v1083_v63, %v5191_v12  ;;  %v1097_v42 = vmul.f32 0.5, %v1065_v16  ;;  %v1098_v22 = vmul.f32 0.5, %v1072_v46  ;;  %v3826_v12 = vld [vmem:[%s6753_s5 + $0x1b0] sm:$0xf] }
 0x10b   :  { %751 = vmatmul.bf16.vlgmr.msra.gmra.mxu3 %v5537_v59  ;;  %v903_v50 = vunpack.c.l.b16 %v870_v43  ;;  %v909_v61 = vsel %vm655_vm12, %v902_v1, %v908_v29  ;;  %v1091_v51 = vadd.f32 %v1090_v57, %v5366_v10  ;;  %v904_v4 = vunpack.c.l.b16 %v871_v21  ;;  %v4429_v29 = vld [vmem:[%s6753_s5 + $0x194] sm:$0xf0]  ;;  %v6817_v43 = vld [vmem:[#allocation9_spill] sm:$0xff] }
 0x10c   :  { %1245 = vmatpush.bf16.msra.mxu3 %v3783_v55  ;;  %v1079_v44 = vadd.f32 %v1078_v23, %v1077_v39  ;;  %v1085_v28 = vrot.slane %v1084_v41, 1  ;;  %v1105_v8 = vpack.c.bf16 %v1097_v42, %v1097_v42  ;;  %v1106_v25 = vpack.c.bf16 %v1098_v22, %v1098_v22  ;;  %v4428_v42 = vld [vmem:[%s6753_s5 + $0x194] sm:$0xf]  ;;  %v3812_v22 = vld [vmem:[%s6753_s5 + $0x198] sm:$0xf0] }
 0x10d   :  { %v1343_v55 = vpack.c.bf16 %v6811_v52, %v6811_v52  ;;  %v910_v3 = vsel %vm657_vm13, %v903_v50, %v909_v61  ;;  %v1092_v9 = vrot.slane %v1091_v51, 1  ;;  %v6813_v7 = vrot.slane %v6812_v37, 2  ;;  %v6819_v50 = vld [vmem:[#allocation10_spill] sm:$0xff]  ;;  %1809 = vmatpush.bf16.msra.mxu2 %v4455_v58 }
 0x10e   :  { %v1099_v10 = vmul.f32 0.5, %v1079_v44  ;;  %v911_v53 = vsel %vm659_vm14, %v904_v4, %v910_v3  ;;  %v1086_v36 = vadd.f32 %v1085_v28, %v1084_v41  ;;  %v1143_v47 = vsel %vm647_vm8, %v6815_v6, %v6814_v56  ;;  %v3804_v6 = vld [vmem:[%s6753_s5 + $0x188] sm:$0xf0] }
 0x10f   :  { %v5567_v32 = vadd.f32 %v6813_v7, %v6812_v37  ;;  %v912_v0 = vpack.c.b16 %v911_v53, %v911_v53  ;;  %v1093_v5 = vadd.f32 %v1092_v9, %v1091_v51  ;;  %v1138_v49 = vunpack.c.l.b16 %v1105_v8  ;;  %v6821_v51 = vld [vmem:[#allocation14_spill] sm:$0xff]  ;;  %v4418_v8 = vld [vmem:[%s6753_s5 + $0x144] sm:$0xf]  ;;  %v6822_v37 = vld [vmem:[#allocation15_spill] sm:$0xff] }
 0x110   :  { %v1107_v38 = vpack.c.bf16 %v1099_v10, %v1099_v10  ;;  %v1100_v62 = vmul.f32 0.5, %v1086_v36  ;;  %v1139_v19 = vunpack.c.l.b16 %v1106_v25  ;;  %v3827_v11 = vor.u32 %v4433_v20, %v3826_v12  ;;  %v3756_v25 = vld [vmem:[%s6753_s5 + $0x148] sm:$0xf0]  ;;  %v4454_v12 = vld [vmem:[#allocation2 + $0x20] sm:$0xff] }
 0x111   :  { %v3831_v16 = vor.u32 %v4432_v17, %v3828_v15  ;;  %1002 = vmatmul.bf16.vlgmr.msrb.gmra.mxu0 %v912_v0  ;;  %1015 = vmatmul.bf16.vlgmr.msrb.gmra.mxu1 %v912_v0  ;;  %v1101_v13 = vmul.f32 0.5, %v1093_v5  ;;  %v1144_v26 = vsel %vm649_vm9, %v6816_v40, %v1143_v47  ;;  %v3775_v35 = vor.u32 %v4422_v18, %v3772_v33  ;;  %v3802_v10 = vld [vmem:[%s6753_s5 + $0x180] sm:$0xf]  ;;  %v4427_v17 = vld [vmem:[%s6753_s5 + $0x184] sm:$0xf0] }
 0x112   :  { %v1140_v46 = vunpack.c.l.b16 %v1107_v38  ;;  %v1108_v2 = vpack.c.bf16 %v1100_v62, %v1100_v62  ;;  %1474 = vmatpush.bf16.msra.mxu0 %v3827_v11  ;;  %v3819_v39 = vor.u32 %v4431_v54, %v3818_v27  ;;  %v3823_v45 = vor.u32 %v4430_v34, %v3820_v24  ;;  %v4426_v15 = vld [vmem:[%s6753_s5 + $0x184] sm:$0xf]  ;;  %v4416_v47 = vld [vmem:[%s6753_s5 + $0x134] sm:$0xf]  ;;  %v3748_v18 = vld [vmem:[%s6753_s5 + $0x138] sm:$0xf0]  ;;  %1810 = vmatpush.bf16.msra.mxu2 %v4454_v12 }
 0x113   :  { %1487 = vmatpush.bf16.msra.mxu1 %v3831_v16  ;;  %v1323_v63 = vrot.slane %v5567_v32, 1  ;;  %v6818_v1 = vpack.c.bf16 %v6817_v43, %v6817_v43  ;;  %v1109_v57 = vpack.c.bf16 %v1101_v13, %v1101_v13  ;;  %v1145_v21 = vsel %vm651_vm10, %v1138_v49, %v1144_v26  ;;  %1246 = vmatpush.bf16.msra.mxu3 %v3775_v35  ;;  %v5662_v49 = vld [vmem:[%s6825_s6] sm:$0xf]  ;;  %v6826_v13 = vld [vmem:[#allocation8_spill] sm:$0xff]  ;;  %v4414_v40 = vld [vmem:[%s6753_s5 + $0x124] sm:$0xf] }
 0x114   :  { %v3767_v41 = vor.u32 %v4420_v14, %v3764_v48  ;;  %v6820_v61 = vpack.c.bf16 %v6819_v50, %v6819_v50  ;;  %v1344_v60 = vpack.c.bf16 %v6821_v51, %v6821_v51  ;;  %v1141_v4 = vunpack.c.l.b16 %v1108_v2  ;;  %v5674_v14 = vld [vmem:[%s6825_s6 + $0x8] sm:$0x1]  ;;  %v3740_v2 = vld [vmem:[%s6753_s5 + $0x128] sm:$0xf0]  ;;  %v4461_v43 = vld [vmem:[#allocation2 + $0x58] sm:$0xff] }
 0x115   :  { %v1374_v23 = vunpack.c.l.b16 %v6818_v1  ;;  %v1146_v28 = vsel %vm653_vm11, %v1139_v19, %v1145_v21  ;;  %v1142_v20 = vunpack.c.l.b16 %v1109_v57  ;;  %v3811_v9 = vor.u32 %v4429_v29, %v3810_v31 }
 0x116   :  { %v1375_v44 = vunpack.c.l.b16 %v6820_v61  ;;  %v1147_v3 = vsel %vm655_vm12, %v1140_v46, %v1146_v28  ;;  %v6823_v7 = vrot.slane %v6822_v37, 1  ;;  %v1376_v36 = vunpack.c.l.b16 %v1343_v55  ;;  %1475 = vmatpush.bf16.msra.mxu0 %v3819_v39 }
 0x117   :  { %v1148_v56 = vsel %vm657_vm13, %v1141_v4, %v1147_v3  ;;  %1488 = vmatpush.bf16.msra.mxu1 %v3823_v45  ;;  %v1324_v33 = vadd.f32 %v1323_v63, %v5567_v32  ;;  %v6824_v52 = vrot.slane %v5342_v30, 2  ;;  %1247 = vmatpush.bf16.msra.mxu3 %v3767_v41  ;;  %v3815_v0 = vor.u32 %v4428_v42, %v3812_v22  ;;  %v3732_v4 = vld [vmem:[%s6753_s5 + $0x118] sm:$0xf0]  ;;  %v4460_v3 = vld [vmem:[#allocation2 + $0x50] sm:$0xff] }
 0x118   :  { %v1317_v53 = vadd.f32 %v6823_v7, %v6822_v37  ;;  %v1149_v27 = vsel %vm659_vm14, %v1142_v20, %v1148_v56  ;;  %v3759_v5 = vor.u32 %v4418_v8, %v3756_v25  ;;  %v3803_v34 = vor.u32 %v4427_v17, %v3802_v10 }
 0x119   :  { %v1329_v55 = vadd.f32 %v6824_v52, %v5342_v30  ;;  %v5664_v54 = vpack.c.b16 %v1149_v27, %v1149_v27  ;;  %v1338_v32 = vmul.f32 0.5, %v1324_v33  ;;  %v5669_v30 = vld [vmem:[%s6825_s6 + $0x4] sm:$0xf]  ;;  %v3807_v62 = vor.u32 %v4426_v15, %v3804_v6 }
 0x11a   :  { %v1337_v38 = vmul.f32 0.5, %v1317_v53  ;;  %v3751_v19 = vor.u32 %v4416_v47, %v3748_v18  ;;  %v1377_v16 = vunpack.c.l.b16 %v1344_v60  ;;  %1476 = vmatpush.bf16.msra.mxu0 %v3811_v9  ;;  %v1381_v46 = vsel %vm647_vm8, %v1374_v23, %v6826_v13  ;;  %v4412_v60 = vld [vmem:[%s6753_s5 + $0x114] sm:$0xf]  ;;  %v4410_v18 = vld [vmem:[%s6753_s5 + $0x104] sm:$0xf] }
 0x11b   :  { %v1330_v24 = vrot.slane %v1329_v55, 1  ;;  %1240 = vmatmul.bf16.vlgmr.msrb.gmra.mxu2 %v5664_v54  ;;  %v1346_v58 = vpack.c.bf16 %v1338_v32, %v1338_v32  ;;  %v1531_v26 = vshrl.u32 %v5662_v49, 16  ;;  %1489 = vmatpush.bf16.msra.mxu1 %v3815_v0  ;;  %v1382_v35 = vsel %vm649_vm9, %v1375_v44, %v1381_v46  ;;  %v5696_v44 = vld [vmem:[%s6825_s6 + $0xc] sm:$0xf] }
 0x11c   :  { %v1345_v11 = vpack.c.bf16 %v1337_v38, %v1337_v38  ;;  %1248 = vmatpush.bf16.msra.mxu3 %v3759_v5  ;;  %v1534_v39 = vshll.u32 %v5662_v49, 16  ;;  %v1540_v45 = vshll.u32 %v5669_v30, 16  ;;  %v1544_v31 = vshrl.u32 %v5669_v30, 16  ;;  %v3724_v0 = vld [vmem:[%s6753_s5 + $0x108] sm:$0xf0] }
 0x11d   :  { %v1331_v48 = vadd.f32 %v1330_v24, %v1329_v55  ;;  %764 = vmatmul.bf16.vlgmr.msrb.gmra.mxu3 %v5537_v59  ;;  %v1533_v1 = vrot.slane %v1531_v26, 4  ;;  %v1550_v23 = vshll.u32 %v5674_v14, 16  ;;  %v1379_v57 = vunpack.c.l.b16 %v1346_v58  ;;  %v5701_v59 = vld [vmem:[%s6825_s6 + $0x10] sm:$0xf]  ;;  %v5730_v24 = vld [vmem:[%s6825_s6 + $0x14] sm:$0x1] }
 0x11e   :  { %v1378_v63 = vunpack.c.l.b16 %v1345_v11  ;;  %v1536_v21 = vrot.slane %v1534_v39, 5  ;;  %v1542_v41 = vrot.slane %v1540_v45, 5  ;;  %v1546_v42 = vrot.slane %v1544_v31, 4  ;;  %1477 = vmatpush.bf16.msra.mxu0 %v3803_v34  ;;  %v4459_v34 = vld [vmem:[#allocation2 + $0x48] sm:$0xff]  ;;  %v4458_v26 = vld [vmem:[#allocation2 + $0x40] sm:$0xff] }
 0x11f   :  { %v1339_v29 = vmul.f32 0.5, %v1331_v48  ;;  %v1383_v50 = vsel %vm651_vm10, %v1376_v36, %v1382_v35  ;;  %v3743_v61 = vor.u32 %v4414_v40, %v3740_v2  ;;  %1490 = vmatpush.bf16.msra.mxu1 %v3807_v62  ;;  %v1552_v25 = vrot.slane %v1550_v23, 5  ;;  %v4453_v40 = vld [vmem:[#allocation2 + $0x18] sm:$0xff] }
 0x120   :  { %1249 = vmatpush.bf16.msra.mxu3 %v3751_v19  ;;  %v1384_v51 = vsel %vm653_vm11, %v1377_v16, %v1383_v50  ;;  %v1537_v28 = vor.u32 %v1536_v21, %v1533_v1  ;;  %v1547_v8 = vor.u32 %v1546_v42, %v1542_v41  ;;  %v1555_v9 = vshrl.u32 %v5696_v44, 16  ;;  %v5745_v1 = vld [vmem:[%s6825_s6 + $0x18] sm:$0xf]  ;;  %v5754_v21 = vld [vmem:[%s6825_s6 + $0x1c] sm:$0xf]  ;;  %v4451_v42 = vld [vmem:[#allocation2 + $0x8] sm:$0xff] }
 0x121   :  { %v1347_v22 = vpack.c.bf16 %v1339_v29, %v1339_v29  ;;  %v1385_v20 = vsel %vm655_vm12, %v1378_v63, %v1384_v51  ;;  %v1558_v10 = vshll.u32 %v5696_v44, 16  ;;  %v1564_v7 = vshll.u32 %v5701_v59, 16  ;;  %v4452_v29 = vld [vmem:[#allocation2 + $0x10] sm:$0xff] }
 0x122   :  { %2138 = vmatpush.bf16.msrb.mxu0 %v4461_v43  ;;  %v1386_v17 = vsel %vm657_vm13, %v1379_v57, %v1385_v20  ;;  %v1538_v15 = vrot.slane %v1537_v28, 4  ;;  %v1548_v37 = vrot.slane %v1547_v8, 4  ;;  %v3735_v36 = vor.u32 %v4412_v60, %v3732_v4  ;;  %v4450_v20 = vld [vmem:[#allocation2] sm:$0xff] }
 0x123   :  { %v1380_v12 = vunpack.c.l.b16 %v1347_v22  ;;  %v1999_v56 = vrot.slane %v5669_v30, 5  ;;  %v1557_v6 = vrot.slane %v1555_v9, 4  ;;  %v1560_v27 = vrot.slane %v1558_v10, 5 }
 0x124   :  { %1250 = vmatpush.bf16.msra.mxu3 %v3743_v61  ;;  %v1543_v52 = vsel %vm4740_vm6, %v1538_v15, %v1542_v41  ;;  %v1553_v55 = vsel %vm4740_vm6, %v1548_v37, %v1552_v25  ;;  %v1566_v32 = vrot.slane %v1564_v7, 5  ;;  %v1568_v30 = vshrl.u32 %v5701_v59, 16 }
 0x125   :  { %v1387_v53 = vsel %vm659_vm14, %v1380_v12, %v1386_v17  ;;  %v1731_v5 = vunpack.c.l.b16 %v1543_v52  ;;  %v1732_v38 = vunpack.c.l.b16 %v1553_v55  ;;  %v3944_v19 = vrot.slane %v5662_v49, 9  ;;  %v5779_v55 = vld [vmem:[%s6825_s6 + $0x24] sm:$0xf] }
 0x126   :  { %v1388_v47 = vpack.c.b16 %v1387_v53, %v1387_v53  ;;  %2139 = vmatpush.bf16.msrb.mxu0 %v4460_v3  ;;  %v2001_v11 = vrot.slane %v1999_v56, 4  ;;  %v2002_v16 = vrot.slane %v5674_v14, 5  ;;  %v3727_v48 = vor.u32 %v4410_v18, %v3724_v0  ;;  %v1506_v3 = vld [vmem:[%s6825_s6 + $0x20] sm:$0x1] }
 0x127   :  { %v1747_v62 = vpack.c.b16 %v1732_v38, %v1731_v5  ;;  %v1561_v58 = vor.u32 %v1560_v27, %v1557_v6  ;;  %v1570_v13 = vrot.slane %v1568_v30, 4  ;;  %v1574_v46 = vshll.u32 %v5730_v24, 16  ;;  %v4442_v53 = vld [vmem:[%s6825_s6] sm:$0xff]  ;;  %v1508_v5 = vld [vmem:[%s6825_s6 + $0x28] sm:$0xf] }
 0x128   :  { %1478 = vmatmul.bf16.vlgmr.msra.gmra.mxu0 %v1388_v47  ;;  %1491 = vmatmul.bf16.vlgmr.msra.gmra.mxu1 %v1388_v47  ;;  %v2000_v39 = vsel %vm4725_vm5, %v3944_v19, %v1999_v56  ;;  %v2003_v49 = vsel %vm4725_vm5, %v2001_v11, %v2002_v16  ;;  %v1579_v41 = vshrl.u32 %v5745_v1, 16  ;;  %v1588_v22 = vshll.u32 %v5754_v21, 16 }
 0x129   :  { %1251 = vmatpush.bf16.msra.mxu3 %v3735_v36  ;;  %v1571_v35 = vor.u32 %v1570_v13, %v1566_v32  ;;  %v1562_v14 = vrot.slane %v1561_v58, 4  ;;  %v1576_v31 = vrot.slane %v1574_v46, 5  ;;  %v2062_v63 = vunpack.c.l.b16 %v2000_v39  ;;  %v1509_v46 = vld [vmem:[%s6825_s6 + $0x2c] sm:$0x1] }
 0x12a   :  { %2140 = vmatpush.bf16.msrb.mxu0 %v4459_v34  ;;  %v2063_v43 = vunpack.c.l.b16 %v2003_v49  ;;  %v1592_v61 = vshrl.u32 %v5754_v21, 16  ;;  %v2006_v4 = vrot.slane %v5701_v59, 5  ;;  %v1581_v28 = vrot.slane %v1579_v41, 4  ;;  %v5808_v41 = vld [vmem:[%s6825_s6 + $0x30] sm:$0xf] }
 0x12b   :  { %3880 = vmatmul.msk.bf16.vlgmr.msra.gmra.mxu2 %vm258_vm4, %v1747_v62  ;;  %v1572_v45 = vrot.slane %v1571_v35, 4  ;;  %v1567_v23 = vsel %vm4740_vm6, %v1562_v14, %v1566_v32  ;;  %v1590_v25 = vrot.slane %v1588_v22, 5  ;;  %v3945_v10 = vrot.slane %v5696_v44, 9  ;;  %v1511_v22 = vld [vmem:[%s6825_s6 + $0x34] sm:$0xf] }
 0x12c   :  { %v2078_v50 = vpack.c.b16 %v2063_v43, %v2062_v63  ;;  %v1733_v51 = vunpack.c.l.b16 %v1567_v23  ;;  %v1594_v12 = vrot.slane %v1592_v61, 4  ;;  %v2008_v17 = vrot.slane %v2006_v4, 4 }
 0x12d   :  { %1252 = vmatpush.bf16.msra.mxu3 %v3727_v48  ;;  %v1577_v57 = vsel %vm4740_vm6, %v1572_v45, %v1576_v31  ;;  %v2009_v15 = vrot.slane %v5730_v24, 5  ;;  %v1598_v7 = vshll.u32 %v1506_v3, 16  ;;  %v2007_v36 = vsel %vm4725_vm5, %v3945_v10, %v2006_v4  ;;  %v4443_v31 = vld [vmem:[%s6825_s6 + $0xc] sm:$0xff]  ;;  %v1512_v10 = vld [vmem:[%s6825_s6 + $0x38] sm:$0x1] }
 0x12e   :  { %2141 = vmatpush.bf16.msrb.mxu0 %v4458_v26  ;;  %v1734_v60 = vunpack.c.l.b16 %v1577_v57  ;;  %v1595_v59 = vor.u32 %v1594_v12, %v1590_v25  ;;  %v2064_v18 = vunpack.c.l.b16 %v2007_v36  ;;  %v1603_v38 = vshrl.u32 %v5779_v55, 16 }
 0x12f   :  { %v2010_v56 = vsel %vm4725_vm5, %v2008_v17, %v2009_v15  ;;  %v1600_v47 = vrot.slane %v1598_v7, 5  ;;  %v1606_v34 = vshll.u32 %v5779_v55, 16  ;;  %v1612_v24 = vshll.u32 %v1508_v5, 16 }
 0x130   :  { %1253 = vmatmul.bf16.vlgmr.msra.gmra.mxu3 %v5664_v54  ;;  %v1582_v54 = vshll.u32 %v5745_v1, 16  ;;  %v1748_v9 = vpack.c.b16 %v1734_v60, %v1733_v51  ;;  %v1596_v6 = vrot.slane %v1595_v59, 4  ;;  %v2065_v52 = vunpack.c.l.b16 %v2010_v56  ;;  %v4444_v56 = vld [vmem:[%s6825_s6 + $0x18] sm:$0xff] }
 0x131   :  { %1944 = vmatpush.bf16.msrb.mxu3 %v4453_v40  ;;  %v1616_v32 = vshrl.u32 %v1508_v5, 16  ;;  %v2013_v11 = vrot.slane %v5754_v21, 5  ;;  %v1605_v16 = vrot.slane %v1603_v38, 4  ;;  %v1608_v48 = vrot.slane %v1606_v34, 5  ;;  %v1514_v34 = vld [vmem:[%s6825_s6 + $0x40] sm:$0xf] }
 0x132   :  { %v1584_v8 = vrot.slane %v1582_v54, 5  ;;  %v1601_v0 = vsel %vm4740_vm6, %v1596_v6, %v1600_v47  ;;  %v2079_v30 = vpack.c.b16 %v2065_v52, %v2064_v18  ;;  %v1614_v58 = vrot.slane %v1612_v24, 5 }
 0x133   :  { %v1736_v19 = vunpack.c.l.b16 %v1601_v0  ;;  %v1618_v13 = vrot.slane %v1616_v32, 4  ;;  %v3946_v26 = vrot.slane %v5745_v1, 9  ;;  %v2015_v35 = vrot.slane %v2013_v11, 4  ;;  %v1513_v0 = vld [vmem:[%s6825_s6 + $0x3c] sm:$0xf] }
 0x134   :  { %v1585_v37 = vor.u32 %v1584_v8, %v1581_v28  ;;  %v2016_v39 = vrot.slane %v1506_v3, 5  ;;  %v1609_v49 = vor.u32 %v1608_v48, %v1605_v16  ;;  %v1622_v45 = vshll.u32 %v1509_v46, 16 }
 0x135   :  { %1945 = vmatpush.bf16.msrb.mxu3 %v4452_v29  ;;  %v1619_v14 = vor.u32 %v1618_v13, %v1614_v58  ;;  %v2014_v29 = vsel %vm4725_vm5, %v3946_v26, %v2013_v11  ;;  %v1630_v61 = vshll.u32 %v5808_v41, 16  ;;  %v1636_v51 = vshll.u32 %v1511_v22, 16  ;;  %v1515_v26 = vld [vmem:[%s6825_s6 + $0x44] sm:$0x1] }
 0x136   :  { %v1586_v44 = vrot.slane %v1585_v37, 4  ;;  %v2017_v63 = vsel %vm4725_vm5, %v2015_v35, %v2016_v39  ;;  %v1610_v43 = vrot.slane %v1609_v49, 4  ;;  %v1624_v1 = vrot.slane %v1622_v45, 5 }
 0x137   :  { %v1620_v23 = vrot.slane %v1619_v14, 4  ;;  %v2066_v57 = vunpack.c.l.b16 %v2014_v29  ;;  %v2067_v21 = vunpack.c.l.b16 %v2017_v63  ;;  %v1640_v60 = vshrl.u32 %v1511_v22, 16  ;;  %v4445_v63 = vld [vmem:[%s6825_s6 + $0x24] sm:$0xff] }
 0x138   :  { %3968 = vmatmul.msk.bf16.vlgmr.msrb.gmra.mxu0 %vm258_vm4, %v2078_v50  ;;  %v1591_v27 = vsel %vm4740_vm6, %v1586_v44, %v1590_v25  ;;  %v1615_v54 = vsel %vm4740_vm6, %v1610_v43, %v1614_v58  ;;  %v1627_v50 = vshrl.u32 %v5808_v41, 16  ;;  %v2020_v25 = vrot.slane %v1508_v5, 5 }
 0x139   :  { %1946 = vmatpush.bf16.msrb.mxu3 %v4451_v42  ;;  %v1735_v62 = vunpack.c.l.b16 %v1591_v27  ;;  %v1625_v42 = vsel %vm4740_vm6, %v1620_v23, %v1624_v1  ;;  %v2080_v4 = vpack.c.b16 %v2067_v21, %v2066_v57  ;;  %v1737_v28 = vunpack.c.l.b16 %v1615_v54 }
 0x13a   :  { %v1738_v8 = vunpack.c.l.b16 %v1625_v42  ;;  %v1629_v12 = vrot.slane %v1627_v50, 4  ;;  %v1638_v3 = vrot.slane %v1636_v51, 5  ;;  %v3947_v15 = vrot.slane %v5779_v55, 9 }
 0x13b   :  { %3881 = vmatmul.msk.bf16.gmra.mxu2 %vm258_vm4, %v1748_v9  ;;  %v1749_v40 = vpack.c.b16 %v1736_v19, %v1735_v62  ;;  %v1642_v9 = vrot.slane %v1640_v60, 4  ;;  %v2022_v37 = vrot.slane %v2020_v25, 4  ;;  %v2023_v59 = vrot.slane %v1509_v46, 5 }
 0x13c   :  { %v1750_v17 = vpack.c.b16 %v1738_v8, %v1737_v28  ;;  %v1646_v36 = vshll.u32 %v1512_v10, 16  ;;  %v2021_v44 = vsel %vm4725_vm5, %v3947_v15, %v2020_v25  ;;  %v1651_v24 = vshrl.u32 %v1513_v0, 16  ;;  %v1517_v15 = vld [vmem:[%s6825_s6 + $0x4c] sm:$0xf] }
 0x13d   :  { %1947 = vmatpush.bf16.msrb.mxu3 %v4450_v20  ;;  %v1632_v20 = vrot.slane %v1630_v61, 5  ;;  %v2024_v6 = vsel %vm4725_vm5, %v2022_v37, %v2023_v59  ;;  %v2068_v55 = vunpack.c.l.b16 %v2021_v44  ;;  %v1654_v32 = vshll.u32 %v1513_v0, 16  ;;  %v1518_v37 = vld [vmem:[%s6825_s6 + $0x50] sm:$0x1] }
 0x13e   :  { %v1648_v52 = vrot.slane %v1646_v36, 5  ;;  %v2069_v27 = vunpack.c.l.b16 %v2024_v6  ;;  %v1664_v62 = vshrl.u32 %v1514_v34, 16  ;;  %v2027_v48 = vrot.slane %v1511_v22, 5 }
 0x13f   :  { %v1633_v7 = vor.u32 %v1632_v20, %v1629_v12  ;;  %v1653_v58 = vrot.slane %v1651_v24, 4  ;;  %v1656_v13 = vrot.slane %v1654_v32, 5  ;;  %v3948_v39 = vrot.slane %v5808_v41, 9 }
 0x140   :  { %3936 = vmatmul.msk.bf16.vlgmr.msrb.gmra.mxu3 %vm258_vm4, %v4442_v53  ;;  %v1643_v53 = vor.u32 %v1642_v9, %v1638_v3  ;;  %v2081_v19 = vpack.c.b16 %v2069_v27, %v2068_v55  ;;  %v2029_v49 = vrot.slane %v2027_v48, 4  ;;  %v2030_v14 = vrot.slane %v1512_v10, 5 }
 0x141   :  { %v1634_v47 = vrot.slane %v1633_v7, 4  ;;  %v1657_v45 = vor.u32 %v1656_v13, %v1653_v58  ;;  %v1670_v29 = vshll.u32 %v1515_v26, 16  ;;  %v2028_v43 = vsel %vm4725_vm5, %v3948_v39, %v2027_v48  ;;  %v4447_v58 = vld [vmem:[%s6825_s6 + $0x3c] sm:$0xff]  ;;  %v1520_v39 = vld [vmem:[%s6825_s6 + $0x58] sm:$0xf] }
 0x142   :  { %v1644_v18 = vrot.slane %v1643_v53, 4  ;;  %v2031_v23 = vsel %vm4725_vm5, %v2029_v49, %v2030_v14  ;;  %v2070_v41 = vunpack.c.l.b16 %v2028_v43  ;;  %v2034_v61 = vrot.slane %v1514_v34, 5  ;;  %v1521_v49 = vld [vmem:[%s6825_s6 + $0x5c] sm:$0x1] }
 0x143   :  { %v1639_v5 = vsel %vm4740_vm6, %v1634_v47, %v1638_v3  ;;  %v1658_v1 = vrot.slane %v1657_v45, 4  ;;  %v1672_v21 = vrot.slane %v1670_v29, 5  ;;  %v2071_v54 = vunpack.c.l.b16 %v2031_v23  ;;  %v4446_v3 = vld [vmem:[%s6825_s6 + $0x30] sm:$0xff] }
 0x144   :  { %v1649_v38 = vsel %vm4740_vm6, %v1644_v18, %v1648_v52  ;;  %v1739_v11 = vunpack.c.l.b16 %v1639_v5  ;;  %v2036_v28 = vrot.slane %v2034_v61, 4  ;;  %v2037_v8 = vrot.slane %v1515_v26, 5 }
 0x145   :  { %v1740_v16 = vunpack.c.l.b16 %v1649_v38  ;;  %v2082_v50 = vpack.c.b16 %v2071_v54, %v2070_v41  ;;  %v1684_v53 = vshll.u32 %v1517_v15, 16  ;;  %v1688_v36 = vshrl.u32 %v1517_v15, 16 }
 0x146   :  { %v2038_v20 = vsel %vm4725_vm5, %v2036_v28, %v2037_v8  ;;  %v1694_v44 = vshll.u32 %v1518_v37, 16  ;;  %v2044_v5 = vrot.slane %v1518_v37, 5  ;;  %v2041_v32 = vrot.slane %v1517_v15, 5 }
 0x147   :  { %v1751_v35 = vpack.c.b16 %v1740_v16, %v1739_v11  ;;  %v2073_v10 = vunpack.c.l.b16 %v2038_v20  ;;  %v1686_v18 = vrot.slane %v1684_v53, 5  ;;  %v1690_v52 = vrot.slane %v1688_v36, 4 }
 0x148   :  { %3969 = vmatmul.msk.bf16.gmra.mxu0 %vm258_vm4, %v2079_v30  ;;  %v1660_v30 = vshll.u32 %v1514_v34, 16  ;;  %v2043_v11 = vrot.slane %v2041_v32, 4  ;;  %v1712_v29 = vshrl.u32 %v1520_v39, 16  ;;  %v1718_v23 = vshll.u32 %v1521_v49, 16 }
 0x149   :  { %v1691_v27 = vor.u32 %v1690_v52, %v1686_v18  ;;  %v2051_v53 = vrot.slane %v1521_v49, 5 }
 0x14a   :  { %v1662_v46 = vrot.slane %v1660_v30, 5  ;;  %v5884_v30 = vld [vmem:[%s6762_s14] sm:$0x3]  ;;  %v1714_v54 = vrot.slane %v1712_v29, 4 }
 0x14b   :  { %3882 = vmatmul.msk.bf16.gmra.mxu2 %vm258_vm4, %v1749_v40  ;;  %v1666_v40 = vrot.slane %v1664_v62, 4  ;;  %v1692_v34 = vrot.slane %v1691_v27, 4  ;;  %v770_v13 = vperm.slane %v5884_v30, 0  ;;  %v771_v2 = vperm.slane %v5884_v30, 1 }
 0x14c   :  { %v1663_v42 = vsel %vm4740_vm6, %v1658_v1, %v1662_v46 }
 0x14d   :  { %v1741_v51 = vunpack.c.l.b16 %v1663_v42 }
 0x150   :  { %3937 = vmatmul.msk.bf16.gmra.mxu3 %vm258_vm4, %v4443_v31  ;;  %v1667_v31 = vor.u32 %v1666_v40, %v1662_v46  ;;  %v2045_v40 = vsel %vm4725_vm5, %v2043_v11, %v2044_v5 }
 0x151   :  { %v2075_v43 = vunpack.c.l.b16 %v2045_v40 }
 0x152   :  { %v1668_v57 = vrot.slane %v1667_v31, 4  ;;  %v1708_v31 = vshll.u32 %v1520_v39, 16 }
 0x154   :  { %v1673_v22 = vsel %vm4740_vm6, %v1668_v57, %v1672_v21  ;;  %v1710_v41 = vrot.slane %v1708_v31, 5 }
 0x155   :  { %v1742_v60 = vunpack.c.l.b16 %v1673_v22 }
 0x157   :  { %v1752_v25 = vpack.c.b16 %v1742_v60, %v1741_v51  ;;  %v1715_v51 = vor.u32 %v1714_v54, %v1710_v41  ;;  %v1720_v60 = vrot.slane %v1718_v23, 5 }
 0x158   :  { %3970 = vmatmul.msk.bf16.gmra.mxu0 %vm258_vm4, %v2080_v4  ;;  %v3949_v4 = vrot.slane %v1513_v0, 9  ;;  %v1696_v0 = vrot.slane %v1694_v44, 5 }
 0x15a   :  { %v2035_v12 = vsel %vm4725_vm5, %v3949_v4, %v2034_v61 }
 0x15b   :  { %3883 = vmatmul.msk.bf16.gmra.mxu2 %vm258_vm4, %v1750_v17  ;;  %v2072_v9 = vunpack.c.l.b16 %v2035_v12  ;;  %v1516_v17 = vld [vmem:[%s6825_s6 + $0x48] sm:$0xf]  ;;  %v2048_v12 = vrot.slane %v1520_v39, 5 }
 0x15c   :  { %v1675_v59 = vshrl.u32 %v1516_v17, 16  ;;  %v1678_v7 = vshll.u32 %v1516_v17, 16  ;;  %v3950_v24 = vrot.slane %v1516_v17, 9 }
 0x15e   :  { %v1677_v6 = vrot.slane %v1675_v59, 4  ;;  %v1680_v47 = vrot.slane %v1678_v7, 5  ;;  %v2042_v46 = vsel %vm4725_vm5, %v3950_v24, %v2041_v32  ;;  %v2050_v7 = vrot.slane %v2048_v12, 4 }
 0x160   :  { %3938 = vmatmul.msk.bf16.gmra.mxu3 %vm258_vm4, %v4444_v56  ;;  %v2083_v56 = vpack.c.b16 %v2073_v10, %v2072_v9  ;;  %v1681_v55 = vor.u32 %v1680_v47, %v1677_v6  ;;  %v2052_v33 = vsel %vm4725_vm5, %v2050_v7, %v2051_v53 }
 0x162   :  { %v1682_v38 = vrot.slane %v1681_v55, 4 }
 0x164   :  { %v1687_v62 = vsel %vm4740_vm6, %v1682_v38, %v1686_v18  ;;  %v2077_v18 = vunpack.c.l.b16 %v2052_v33 }
 0x165   :  { %v1743_v16 = vunpack.c.l.b16 %v1687_v62 }
 0x168   :  { %3971 = vmatmul.msk.bf16.gmra.mxu0 %vm258_vm4, %v2081_v19  ;;  %v1697_v19 = vsel %vm4740_vm6, %v1692_v34, %v1696_v0 }
 0x169   :  { %v1744_v48 = vunpack.c.l.b16 %v1697_v19  ;;  %v4449_v19 = vld [vmem:[%s6825_s6 + $0x54] sm:$0xff] }
 0x16b   :  { %3884 = vmatmul.msk.bf16.gmra.mxu2 %vm258_vm4, %v1751_v35  ;;  %v1753_v26 = vpack.c.b16 %v1744_v48, %v1743_v16  ;;  %v1519_v35 = vld [vmem:[%s6825_s6 + $0x54] sm:$0xf] }
 0x16c   :  { %v1699_v14 = vshrl.u32 %v1519_v35, 16  ;;  %v1702_v45 = vshll.u32 %v1519_v35, 16  ;;  %v3951_v59 = vrot.slane %v1519_v35, 9 }
 0x16e   :  { %v1701_v57 = vrot.slane %v1699_v14, 4  ;;  %v1704_v21 = vrot.slane %v1702_v45, 5  ;;  %v2049_v44 = vsel %vm4725_vm5, %v3951_v59, %v2048_v12  ;;  %v5934_v14 = vld [vmem:[%s6755_s7] ss:$0 sm:$0xff] }
 0x16f   :  { %v2076_v47 = vunpack.c.l.b16 %v2049_v44 }
 0x170   :  { %3939 = vmatmul.msk.bf16.gmra.mxu3 %vm258_vm4, %v4445_v63  ;;  %v2074_v63 = vunpack.c.l.b16 %v2042_v46  ;;  %v1705_v61 = vor.u32 %v1704_v21, %v1701_v57 }
 0x171   :  { %v2085_v27 = vpack.c.b16 %v2077_v18, %v2076_v47 }
 0x172   :  { %v2084_v28 = vpack.c.b16 %v2075_v43, %v2074_v63  ;;  %v1706_v8 = vrot.slane %v1705_v61, 4 }
 0x174   :  { %v1711_v20 = vsel %vm4740_vm6, %v1706_v8, %v1710_v41 }
 0x175   :  { %v1745_v9 = vunpack.c.l.b16 %v1711_v20 }
 0x178   :  { %3972 = vmatmul.msk.bf16.gmra.mxu0 %vm258_vm4, %v2082_v50 }
 0x17b   :  { %3885 = vmatmul.msk.bf16.gmra.mxu2 %vm258_vm4, %v1752_v25  ;;  %v1716_v25 = vrot.slane %v1715_v51, 4 }
 0x180   :  { %3940 = vmatmul.msk.bf16.gmra.mxu3 %vm258_vm4, %v4446_v3  ;;  %v1721_v3 = vsel %vm4740_vm6, %v1716_v25, %v1720_v60 }
 0x181   :  { %v1746_v10 = vunpack.c.l.b16 %v1721_v3 }
 0x183   :  { %v1754_v36 = vpack.c.b16 %v1746_v10, %v1745_v9 }
 0x188   :  { %3973 = vmatmul.msk.bf16.gmra.mxu0 %vm258_vm4, %v2083_v56  ;;  %v4448_v56 = vld [vmem:[%s6825_s6 + $0x48] sm:$0xff] }
 0x18b   :  { %3886 = vmatmul.msk.bf16.gmra.mxu2 %vm258_vm4, %v1753_v26 }
 0x18e   :  { %v752_v1 = vpop.f32.mrf.mxu3  ;;  %v1003_v42 = vpop.f32.mrf.mxu0 }
 0x18f   :  { %v1016_v22 = vpop.f32.mrf.mxu1  ;;  %v774_v50 = vadd.f32 %v770_v13, %v752_v1 }
 0x190   :  { %3941 = vmatmul.msk.bf16.gmra.mxu3 %vm258_vm4, %v4447_v58 }
 0x191   :  { %v1020_v4 = vadd.f32 %v1003_v42, %v774_v50 }
 0x196   :  { %v754_v17 = vpop.f32.mrf.mxu3  ;;  %v1005_v15 = vpop.f32.mrf.mxu0 }
 0x197   :  { %v1018_v37 = vpop.f32.mrf.mxu1 }
 0x198   :  { %3974 = vmatmul.msk.bf16.gmra.mxu0 %vm258_vm4, %v2084_v28 }
 0x19b   :  { %3887 = vmatmul.msk.bf16.gmra.mxu2 %vm258_vm4, %v1754_v36 }
 0x19e   :  { %v1241_v6 = vpop.f32.mrf.mxu2 }
 0x19f   :  { %v1258_v52 = vadd.f32 %v1241_v6, %v1020_v4 }
 0x1a0   :  { %3942 = vmatmul.msk.bf16.gmra.mxu3 %vm258_vm4, %v4448_v56  ;;  %v765_v55 = vpop.f32.mrf.mxu3 }
 0x1a1   :  { %v775_v11 = vadd.f32 %v771_v2, %v765_v55 }
 0x1a3   :  { %v1021_v48 = vadd.f32 %v1016_v22, %v775_v11 }
 0x1a5   :  { %v1479_v0 = vpop.f32.mrf.mxu0  ;;  %v1492_v5 = vpop.f32.mrf.mxu1 }
 0x1a6   :  { %v5923_v38 = vadd.f32 %v1479_v0, %v1258_v52  ;;  %v1243_v34 = vpop.f32.mrf.mxu2 }
 0x1a8   :  { %3975 = vmatmul.msk.bf16.gmra.mxu0 %vm258_vm4, %v2085_v27  ;;  %v767_v24 = vpop.f32.mrf.mxu3 }
 0x1ad   :  { %v1481_v32 = vpop.f32.mrf.mxu0  ;;  %v1494_v62 = vpop.f32.mrf.mxu1 }
 0x1ae   :  { %v1812_v16 = vpop.f32.mrf.mxu2 }
 0x1b0   :  { %3943 = vmatmul.msk.bf16.gmra.mxu3 %vm258_vm4, %v4449_v19 }
 0x1b3   :  { %v1254_v58 = vpop.f32.mrf.mxu3 }
 0x1b4   :  { %v1259_v13 = vadd.f32 %v1254_v58, %v1021_v48 }
 0x1b5   :  { %v2143_v46 = vpop.f32.mrf.mxu0 }
 0x1b6   :  { %v1814_v40 = vpop.f32.mrf.mxu2  ;;  %v5940_v51 = vadd.f32 %v1492_v5, %v1259_v13 }
 0x1bb   :  { %v1256_v26 = vpop.f32.mrf.mxu3 }
 0x1bd   :  { %v2145_v35 = vpop.f32.mrf.mxu0 }
 0x1be   :  { %v1817_v39 = vpop.f32.mrf.mxu2 }
 0x1c3   :  { %v1949_v49 = vpop.f32.mrf.mxu3 }
 0x1c4   :  { %v1950_v30 = vadd.f32 %v1949_v49, %v1812_v16 }
 0x1c5   :  { %v2148_v31 = vpop.f32.mrf.mxu0 }
 0x1c6   :  { %v2183_v45 = vadd.f32 %v2143_v46, %v1950_v30  ;;  %v1819_v29 = vpop.f32.mrf.mxu2 }
 0x1c8   :  { %v2203_v63 = vadd.f32 %v5934_v14, %v2183_v45 }
 0x1ca   :  { %v2219_v43 = vmax.f32 %v2203_v63, 0.0 }
 0x1cb   :  { %v1951_v23 = vpop.f32.mrf.mxu3 }
 0x1cc   :  { %v2236_v1 = vsel %vm2235_vm15, %v2219_v43, 0.0  ;;  %v2465_v57 = vrot.slane %v2219_v43, 4  ;;  %v1952_v21 = vadd.f32 %v1951_v23, %v1814_v40 }
 0x1cd   :  { %v2237_v41 = vrot.slane %v2236_v1, 4  ;;  %v2150_v28 = vpop.f32.mrf.mxu0 }
 0x1ce   :  { %v2481_v54 = vsel %vm2235_vm15, %v2465_v57, 0.0  ;;  %v2184_v42 = vadd.f32 %v2145_v35, %v1952_v21  ;;  %v1822_v8 = vpop.f32.mrf.mxu2 }
 0x1cf   :  { %v2238_v22 = vadd.f32 %v2237_v41, %v2236_v1  ;;  %v2482_v50 = vrot.slane %v2481_v54, 4 }
 0x1d0   :  { %v2204_v61 = vadd.f32 %v5934_v14, %v2184_v42 }
 0x1d1   :  { %v2239_v60 = vrot.slane %v2238_v22, 2  ;;  %v2483_v4 = vadd.f32 %v2482_v50, %v2481_v54 }
 0x1d2   :  { %v2220_v25 = vmax.f32 %v2204_v61, 0.0 }
 0x1d3   :  { %v2484_v12 = vrot.slane %v2483_v4, 2  ;;  %v1954_v20 = vpop.f32.mrf.mxu3  ;;  %v2240_v17 = vadd.f32 %v2239_v60, %v2238_v22 }
 0x1d4   :  { %v2703_v3 = vsel %vm2235_vm15, %v2220_v25, 0.0  ;;  %v2933_v9 = vrot.slane %v2220_v25, 4  ;;  %v1955_v10 = vadd.f32 %v1954_v20, %v1817_v39 }
 0x1d5   :  { %v2485_v15 = vadd.f32 %v2484_v12, %v2483_v4  ;;  %v2704_v37 = vrot.slane %v2703_v3, 4  ;;  %v2241_v44 = vrot.slane %v2240_v17, 1  ;;  %v2153_v47 = vpop.f32.mrf.mxu0 }
 0x1d6   :  { %v2949_v59 = vsel %vm2235_vm15, %v2933_v9, 0.0  ;;  %v2185_v7 = vadd.f32 %v2148_v31, %v1955_v10  ;;  %v5945_v18 = vpop.f32.mrf.mxu2 }
 0x1d7   :  { %v2705_v53 = vadd.f32 %v2704_v37, %v2703_v3  ;;  %v2950_v36 = vrot.slane %v2949_v59, 4  ;;  %v2486_v33 = vrot.slane %v2485_v15, 1  ;;  %v2242_v2 = vadd.f32 %v2241_v44, %v2240_v17 }
 0x1d8   :  { %v2205_v56 = vadd.f32 %v5934_v14, %v2185_v7 }
 0x1d9   :  { %v2706_v6 = vrot.slane %v2705_v53, 2  ;;  %v2951_v52 = vadd.f32 %v2950_v36, %v2949_v59  ;;  %v2487_v32 = vadd.f32 %v2486_v33, %v2485_v15  ;;  %v2292_v40 = vmul.f32 0.25, %v2242_v2 }
 0x1da   :  { %v2221_v55 = vmax.f32 %v2205_v56, 0.0 }
 0x1db   :  { %v2707_v27 = vadd.f32 %v2706_v6, %v2705_v53  ;;  %v1956_v0 = vpop.f32.mrf.mxu3  ;;  %v2952_v62 = vrot.slane %v2951_v52, 2  ;;  %v2537_v26 = vmul.f32 0.25, %v2487_v32  ;;  %v2300_v41 = vpack.c.bf16 %v2292_v40, %v2292_v40 }
 0x1dc   :  { %v2243_v5 = vsel %vm2235_vm15, %v2221_v55, 0.0  ;;  %v2466_v34 = vrot.slane %v2221_v55, 4  ;;  %v1957_v24 = vadd.f32 %v1956_v0, %v1819_v29 }
 0x1dd   :  { %v2244_v19 = vrot.slane %v2243_v5, 4  ;;  %v2708_v48 = vrot.slane %v2707_v27, 1  ;;  %v2953_v39 = vadd.f32 %v2952_v62, %v2951_v52  ;;  %v2155_v45 = vpop.f32.mrf.mxu0  ;;  %v2545_v54 = vpack.c.bf16 %v2537_v26, %v2537_v26 }
 0x1de   :  { %v2488_v11 = vsel %vm2235_vm15, %v2466_v34, 0.0  ;;  %v2186_v16 = vadd.f32 %v2150_v28, %v1957_v24  ;;  %v5950_v31 = vpop.f32.mrf.mxu2  ;;  %v2332_v10 = vunpack.c.l.b16 %v2300_v41 }
 0x1df   :  { %v2489_v58 = vrot.slane %v2488_v11, 4  ;;  %v2245_v13 = vadd.f32 %v2244_v19, %v2243_v5  ;;  %v2709_v29 = vadd.f32 %v2708_v48, %v2707_v27  ;;  %v2954_v50 = vrot.slane %v2953_v39, 1 }
 0x1e0   :  { %v2206_v46 = vadd.f32 %v5934_v14, %v2186_v16  ;;  %v2578_v37 = vunpack.c.l.b16 %v2545_v54 }
 0x1e1   :  { %v2490_v35 = vadd.f32 %v2489_v58, %v2488_v11  ;;  %v2246_v49 = vrot.slane %v2245_v13, 2  ;;  %v2759_v28 = vmul.f32 0.25, %v2709_v29  ;;  %v2955_v59 = vadd.f32 %v2954_v50, %v2953_v39 }
 0x1e2   :  { %v2222_v30 = vmax.f32 %v2206_v46, 0.0 }
 0x1e3   :  { %v2491_v63 = vrot.slane %v2490_v35, 2  ;;  %v1959_v43 = vpop.f32.mrf.mxu3  ;;  %v2247_v23 = vadd.f32 %v2246_v49, %v2245_v13  ;;  %v2767_v56 = vpack.c.bf16 %v2759_v28, %v2759_v28  ;;  %v3005_v62 = vmul.f32 0.25, %v2955_v59 }
 0x1e4   :  { %v2710_v1 = vsel %vm2235_vm15, %v2222_v30, 0.0  ;;  %v2934_v57 = vrot.slane %v2222_v30, 4  ;;  %v1960_v21 = vadd.f32 %v1959_v43, %v1822_v8 }
 0x1e5   :  { %v2492_v42 = vadd.f32 %v2491_v63, %v2490_v35  ;;  %v2711_v22 = vrot.slane %v2710_v1, 4  ;;  %v2248_v61 = vrot.slane %v2247_v23, 1  ;;  %v2158_v36 = vpop.f32.mrf.mxu0  ;;  %v3013_v29 = vpack.c.bf16 %v3005_v62, %v3005_v62 }
 0x1e6   :  { %v2956_v60 = vsel %vm2235_vm15, %v2934_v57, 0.0  ;;  %v2187_v4 = vadd.f32 %v2153_v47, %v1960_v21  ;;  %v5957_v5 = vpop.f32.mrf.mxu2 }
 0x1e7   :  { %v2493_v25 = vrot.slane %v2492_v42, 1  ;;  %v2712_v12 = vadd.f32 %v2711_v22, %v2710_v1  ;;  %v2957_v20 = vrot.slane %v2956_v60, 4  ;;  %v2249_v3 = vadd.f32 %v2248_v61, %v2247_v23 }
 0x1e8   :  { %v2207_v9 = vadd.f32 %v5934_v14, %v2187_v4  ;;  %v2800_v1 = vunpack.c.l.b16 %v2767_v56 }
 0x1e9   :  { %v2494_v17 = vadd.f32 %v2493_v25, %v2492_v42  ;;  %v2713_v15 = vrot.slane %v2712_v12, 2  ;;  %v2958_v8 = vadd.f32 %v2957_v20, %v2956_v60  ;;  %v2293_v7 = vmul.f32 0.25, %v2249_v3 }
 0x1ea   :  { %v2223_v53 = vmax.f32 %v2207_v9, 0.0  ;;  %v3046_v25 = vunpack.c.l.b16 %v3013_v29 }
 0x1eb   :  { %v2538_v44 = vmul.f32 0.25, %v2494_v17  ;;  %v2714_v33 = vadd.f32 %v2713_v15, %v2712_v12  ;;  %v2959_v6 = vrot.slane %v2958_v8, 2  ;;  %v1961_v47 = vpop.f32.mrf.mxu3  ;;  %v2301_v52 = vpack.c.bf16 %v2293_v7, %v2293_v7 }
 0x1ec   :  { %v2250_v55 = vsel %vm2235_vm15, %v2223_v53, 0.0  ;;  %v2467_v27 = vrot.slane %v2223_v53, 4  ;;  %v1962_v0 = vadd.f32 %v1961_v47, %v5945_v18 }
 0x1ed   :  { %v2546_v34 = vpack.c.bf16 %v2538_v44, %v2538_v44  ;;  %v2715_v24 = vrot.slane %v2714_v33, 1  ;;  %v2960_v2 = vadd.f32 %v2959_v6, %v2958_v8  ;;  %v2251_v32 = vrot.slane %v2250_v55, 4  ;;  %v2160_v23 = vpop.f32.mrf.mxu0 }
 0x1ee   :  { %v2333_v19 = vunpack.c.l.b16 %v2301_v52  ;;  %v2495_v11 = vsel %vm2235_vm15, %v2467_v27, 0.0  ;;  %v2188_v16 = vadd.f32 %v2155_v45, %v1962_v0  ;;  %v1832_v9 = vpop.f32.mrf.mxu2 }
 0x1ef   :  { %v2579_v48 = vunpack.c.l.b16 %v2546_v34  ;;  %v2716_v58 = vadd.f32 %v2715_v24, %v2714_v33  ;;  %v2961_v13 = vrot.slane %v2960_v2, 1  ;;  %v2252_v46 = vadd.f32 %v2251_v32, %v2250_v55 }
 0x1f0   :  { %v2340_v40 = vsel %vm647_vm8, %v2333_v19, %v2332_v10  ;;  %v2496_v26 = vrot.slane %v2495_v11, 4  ;;  %v2208_v18 = vadd.f32 %v5934_v14, %v2188_v16 }
 0x1f1   :  { %v2586_v35 = vsel %vm647_vm8, %v2579_v48, %v2578_v37  ;;  %v2760_v39 = vmul.f32 0.25, %v2716_v58  ;;  %v2962_v49 = vadd.f32 %v2961_v13, %v2960_v2  ;;  %v2253_v30 = vrot.slane %v2252_v46, 2 }
 0x1f2   :  { %v2497_v63 = vadd.f32 %v2496_v26, %v2495_v11  ;;  %v2224_v43 = vmax.f32 %v2208_v18, 0.0 }
 0x1f3   :  { %v2768_v45 = vpack.c.bf16 %v2760_v39, %v2760_v39  ;;  %v3006_v57 = vmul.f32 0.25, %v2962_v49  ;;  %v2254_v21 = vadd.f32 %v2253_v30, %v2252_v46  ;;  %v1964_v41 = vpop.f32.mrf.mxu3 }
 0x1f4   :  { %v2498_v54 = vrot.slane %v2497_v63, 2  ;;  %v2717_v42 = vsel %vm2235_vm15, %v2224_v43, 0.0  ;;  %v2935_v22 = vrot.slane %v2224_v43, 4  ;;  %v1965_v50 = vadd.f32 %v1964_v41, %v5950_v31 }
 0x1f5   :  { %v2801_v61 = vunpack.c.l.b16 %v2768_v45  ;;  %v3014_v60 = vpack.c.bf16 %v3006_v57, %v3006_v57  ;;  %v2255_v4 = vrot.slane %v2254_v21, 1  ;;  %v2718_v28 = vrot.slane %v2717_v42, 4  ;;  %v2163_v55 = vpop.f32.mrf.mxu0 }
 0x1f6   :  { %v2499_v12 = vadd.f32 %v2498_v54, %v2497_v63  ;;  %v2963_v20 = vsel %vm2235_vm15, %v2935_v22, 0.0  ;;  %v2189_v3 = vadd.f32 %v2158_v36, %v1965_v50  ;;  %v1834_v26 = vpop.f32.mrf.mxu2 }
 0x1f7   :  { %v2808_v10 = vsel %vm647_vm8, %v2801_v61, %v2800_v1  ;;  %v3047_v17 = vunpack.c.l.b16 %v3014_v60  ;;  %v2256_v15 = vadd.f32 %v2255_v4, %v2254_v21  ;;  %v2719_v8 = vadd.f32 %v2718_v28, %v2717_v42 }
 0x1f8   :  { %v2500_v37 = vrot.slane %v2499_v12, 1  ;;  %v2964_v59 = vrot.slane %v2963_v20, 4  ;;  %v2209_v7 = vadd.f32 %v5934_v14, %v2189_v3 }
 0x1f9   :  { %v3054_v31 = vsel %vm647_vm8, %v3047_v17, %v3046_v25  ;;  %v2294_v53 = vmul.f32 0.25, %v2256_v15  ;;  %v2720_v56 = vrot.slane %v2719_v8, 2 }
 0x1fa   :  { %v2501_v44 = vadd.f32 %v2500_v37, %v2499_v12  ;;  %v2965_v33 = vadd.f32 %v2964_v59, %v2963_v20  ;;  %v2225_v6 = vmax.f32 %v2209_v7, 0.0 }
 0x1fb   :  { %v2302_v47 = vpack.c.bf16 %v2294_v53, %v2294_v53  ;;  %v2721_v52 = vadd.f32 %v2720_v56, %v2719_v8  ;;  %v1966_v36 = vpop.f32.mrf.mxu3 }
 0x1fc   :  { %v2539_v27 = vmul.f32 0.25, %v2501_v44  ;;  %v2966_v0 = vrot.slane %v2965_v33, 2  ;;  %v2468_v34 = vrot.slane %v2225_v6, 4  ;;  %v1967_v32 = vadd.f32 %v1966_v36, %v5957_v5 }
 0x1fd   :  { %v2334_v24 = vunpack.c.l.b16 %v2302_v47  ;;  %v2722_v2 = vrot.slane %v2721_v52, 1  ;;  %v2257_v5 = vsel %vm2235_vm15, %v2225_v6, 0.0  ;;  %v2165_v1 = vpop.f32.mrf.mxu0 }
 0x1fe   :  { %v2547_v62 = vpack.c.bf16 %v2539_v27, %v2539_v27  ;;  %v2967_v19 = vadd.f32 %v2966_v0, %v2965_v33  ;;  %v2502_v11 = vsel %vm2235_vm15, %v2468_v34, 0.0  ;;  %v2190_v46 = vadd.f32 %v2160_v23, %v1967_v32  ;;  %v1837_v15 = vpop.f32.mrf.mxu2  ;;  %v4477_v27 = vld [vmem:[%s6756_s8 + $0x74] sm:$0xf0] }
 0x1ff   :  { %v5972_v16 = vsel %vm649_vm9, %v2334_v24, %v2340_v40  ;;  %v2723_v48 = vadd.f32 %v2722_v2, %v2721_v52  ;;  %v2503_v39 = vrot.slane %v2502_v11, 4  ;;  %v2258_v41 = vrot.slane %v2257_v5, 4 }
 0x200   :  { %v2580_v58 = vunpack.c.l.b16 %v2547_v62  ;;  %v2968_v13 = vrot.slane %v2967_v19, 1  ;;  %v2210_v29 = vadd.f32 %v5934_v14, %v2190_v46 }
 0x201   :  { %v2761_v18 = vmul.f32 0.25, %v2723_v48  ;;  %v2504_v23 = vadd.f32 %v2503_v39, %v2502_v11  ;;  %v2259_v25 = vadd.f32 %v2258_v41, %v2257_v5 }
 0x202   :  { %v5975_v49 = vsel %vm649_vm9, %v2580_v58, %v2586_v35  ;;  %v2969_v30 = vadd.f32 %v2968_v13, %v2967_v19  ;;  %v2226_v45 = vmax.f32 %v2210_v29, 0.0 }
 0x203   :  { %v2769_v63 = vpack.c.bf16 %v2761_v18, %v2761_v18  ;;  %v1969_v43 = vpop.f32.mrf.mxu3  ;;  %v2505_v12 = vrot.slane %v2504_v23, 2  ;;  %v2260_v53 = vrot.slane %v2259_v25, 2 }
 0x204   :  { %v3007_v40 = vmul.f32 0.25, %v2969_v30  ;;  %v1970_v57 = vadd.f32 %v1969_v43, %v1832_v9  ;;  %v2724_v42 = vsel %vm2235_vm15, %v2226_v45, 0.0  ;;  %v2936_v22 = vrot.slane %v2226_v45, 4 }
 0x205   :  { %v2802_v21 = vunpack.c.l.b16 %v2769_v63  ;;  %v2725_v61 = vrot.slane %v2724_v42, 4  ;;  %v2506_v56 = vadd.f32 %v2505_v12, %v2504_v23  ;;  %v2168_v33 = vpop.f32.mrf.mxu0  ;;  %v2261_v2 = vadd.f32 %v2260_v53, %v2259_v25 }
 0x206   :  { %v3015_v54 = vpack.c.bf16 %v3007_v40, %v3007_v40  ;;  %v2191_v35 = vadd.f32 %v2163_v55, %v1970_v57  ;;  %v2970_v4 = vsel %vm2235_vm15, %v2936_v22, 0.0  ;;  %v1839_v39 = vpop.f32.mrf.mxu2 }
 0x207   :  { %v5981_v50 = vsel %vm649_vm9, %v2802_v21, %v2808_v10  ;;  %v2726_v20 = vadd.f32 %v2725_v61, %v2724_v42  ;;  %v2971_v3 = vrot.slane %v2970_v4, 4  ;;  %v2507_v32 = vrot.slane %v2506_v56, 1 }
 0x208   :  { %v3048_v60 = vunpack.c.l.b16 %v3015_v54  ;;  %v2211_v28 = vadd.f32 %v5934_v14, %v2191_v35  ;;  %v2262_v5 = vrot.slane %v2261_v2, 1 }
 0x209   :  { %v2972_v8 = vadd.f32 %v2971_v3, %v2970_v4  ;;  %v2727_v44 = vrot.slane %v2726_v20, 2  ;;  %v2508_v29 = vadd.f32 %v2507_v32, %v2506_v56  ;;  %v4475_v4 = vld [vmem:[%s6756_s8 + $0x64] sm:$0xf0]  ;;  %v4018_v3 = vld [vmem:[%s6756_s8 + $0x50] sm:$0xf] }
 0x20a   :  { %v5986_v9 = vsel %vm649_vm9, %v3048_v60, %v3054_v31  ;;  %v2227_v17 = vmax.f32 %v2211_v28, 0.0  ;;  %v4034_v31 = vld [vmem:[%s6756_s8 + $0x70] sm:$0xf]  ;;  %v2263_v22 = vadd.f32 %v2262_v5, %v2261_v2  ;;  %v4026_v60 = vld [vmem:[%s6756_s8 + $0x60] sm:$0xf] }
 0x20b   :  { %v1971_v37 = vpop.f32.mrf.mxu3  ;;  %v2973_v6 = vrot.slane %v2972_v8, 2  ;;  %v4035_v24 = vor.u32 %v4477_v27, %v4034_v31  ;;  %v2728_v62 = vadd.f32 %v2727_v44, %v2726_v20  ;;  %v2540_v35 = vmul.f32 0.25, %v2508_v29  ;;  %v4010_v2 = vld [vmem:[%s6756_s8 + $0x40] sm:$0xf]  ;;  %v4471_v32 = vld [vmem:[%s6756_s8 + $0x44] sm:$0xf0] }
 0x20c   :  { %v2264_v10 = vsel %vm2235_vm15, %v2227_v17, 0.0  ;;  %v2469_v59 = vrot.slane %v2227_v17, 4  ;;  %v1972_v7 = vadd.f32 %v1971_v37, %v1834_v26  ;;  %v4027_v20 = vor.u32 %v4475_v4, %v4026_v60  ;;  %v4473_v17 = vld [vmem:[%s6756_s8 + $0x54] sm:$0xf0]  ;;  %v4116_v5 = vld [vmem:[%s6756_s8 + $0xf8] sm:$0xf0] }
 0x20d   :  { %v2265_v47 = vrot.slane %v2264_v10, 4  ;;  %v2974_v11 = vadd.f32 %v2973_v6, %v2972_v8  ;;  %2429 = vmatpush.bf16.msrb.mxu1 %v4035_v24  ;;  %v2729_v63 = vrot.slane %v2728_v62, 1  ;;  %v2170_v41 = vpop.f32.mrf.mxu0  ;;  %v4019_v53 = vor.u32 %v4473_v17, %v4018_v3 }
 0x20e   :  { %v2509_v52 = vsel %vm2235_vm15, %v2469_v59, 0.0  ;;  %v2192_v36 = vadd.f32 %v2165_v1, %v1972_v7  ;;  %v2295_v56 = vmul.f32 0.25, %v2263_v22  ;;  %v2548_v44 = vpack.c.bf16 %v2540_v35, %v2540_v35  ;;  %v1842_v31 = vpop.f32.mrf.mxu2 }
 0x20f   :  { %v2510_v55 = vrot.slane %v2509_v52, 4  ;;  %v2266_v0 = vadd.f32 %v2265_v47, %v2264_v10  ;;  %v2975_v1 = vrot.slane %v2974_v11, 1  ;;  %v2730_v61 = vadd.f32 %v2729_v63, %v2728_v62 }
 0x210   :  { %v2212_v34 = vadd.f32 %v5934_v14, %v2192_v36 }
 0x211   :  { %v2511_v19 = vadd.f32 %v2510_v55, %v2509_v52  ;;  %v2267_v48 = vrot.slane %v2266_v0, 2  ;;  %v2976_v28 = vadd.f32 %v2975_v1, %v2974_v11  ;;  %2430 = vmatpush.bf16.msrb.mxu1 %v4027_v20  ;;  %v2762_v47 = vmul.f32 0.25, %v2730_v61 }
 0x212   :  { %v2228_v58 = vmax.f32 %v2212_v34, 0.0  ;;  %v4011_v11 = vor.u32 %v4471_v32, %v4010_v2 }
 0x213   :  { %v1974_v13 = vpop.f32.mrf.mxu3  ;;  %v2512_v46 = vrot.slane %v2511_v19, 2  ;;  %v2268_v40 = vadd.f32 %v2267_v48, %v2266_v0  ;;  %v3008_v52 = vmul.f32 0.25, %v2976_v28  ;;  %v4002_v48 = vld [vmem:[%s6756_s8 + $0x30] sm:$0xf]  ;;  %v2770_v29 = vpack.c.bf16 %v2762_v47, %v2762_v47 }
 0x214   :  { %v2731_v26 = vsel %vm2235_vm15, %v2228_v58, 0.0  ;;  %v2937_v18 = vrot.slane %v2228_v58, 4  ;;  %v1975_v30 = vadd.f32 %v1974_v13, %v1837_v15  ;;  %v4469_v58 = vld [vmem:[%s6756_s8 + $0x34] sm:$0xf0]  ;;  %v2303_v13 = vpack.c.bf16 %v2295_v56, %v2295_v56  ;;  %v4467_v56 = vld [vmem:[%s6756_s8 + $0x24] sm:$0xf0] }
 0x215   :  { %v2732_v43 = vrot.slane %v2731_v26, 4  ;;  %v2513_v23 = vadd.f32 %v2512_v46, %v2511_v19  ;;  %v2269_v25 = vrot.slane %v2268_v40, 1  ;;  %2431 = vmatpush.bf16.msrb.mxu1 %v4019_v53  ;;  %v2581_v46 = vunpack.c.l.b16 %v2548_v44  ;;  %v3994_v53 = vld [vmem:[%s6756_s8 + $0x20] sm:$0xf] }
 0x216   :  { %v2977_v45 = vsel %vm2235_vm15, %v2937_v18, 0.0  ;;  %v2193_v57 = vadd.f32 %v2168_v33, %v1975_v30  ;;  %v4492_v30 = vld [vmem:[%s6756_s8 + $0xf4] sm:$0xf]  ;;  %v4003_v22 = vor.u32 %v4469_v58, %v4002_v48  ;;  %v6035_v35 = vunpack.c.l.b16 %v2303_v13  ;;  %v4100_v13 = vld [vmem:[%s6756_s8 + $0xd8] sm:$0xf0] }
 0x217   :  { %v2733_v21 = vadd.f32 %v2732_v43, %v2731_v26  ;;  %v2978_v54 = vrot.slane %v2977_v45, 4  ;;  %v2514_v10 = vrot.slane %v2513_v23, 1  ;;  %v2270_v36 = vadd.f32 %v2269_v25, %v2268_v40  ;;  %v4488_v58 = vld [vmem:[%s6756_s8 + $0xd4] sm:$0xf] }
 0x218   :  { %v2213_v42 = vadd.f32 %v5934_v14, %v2193_v57  ;;  %v4119_v1 = vor.u32 %v4492_v30, %v4116_v5  ;;  %v3016_v40 = vpack.c.bf16 %v3008_v52, %v3008_v52  ;;  %v6039_v61 = vsel %vm651_vm10, %v2581_v46, %v5975_v49  ;;  %v4490_v52 = vld [vmem:[%s6756_s8 + $0xe4] sm:$0xf] }
 0x219   :  { %v2734_v15 = vrot.slane %v2733_v21, 2  ;;  %v2979_v8 = vadd.f32 %v2978_v54, %v2977_v45  ;;  %v2515_v62 = vadd.f32 %v2514_v10, %v2513_v23  ;;  %v2296_v63 = vmul.f32 0.25, %v2270_v36  ;;  %2432 = vmatpush.bf16.msrb.mxu1 %v4011_v11  ;;  %v4108_v36 = vld [vmem:[%s6756_s8 + $0xe8] sm:$0xf0] }
 0x21a   :  { %v2229_v12 = vmax.f32 %v2213_v42, 0.0  ;;  %2688 = vmatpush.bf16.msrb.mxu2 %v4119_v1  ;;  %v6042_v3 = vunpack.c.l.b16 %v2770_v29 }
 0x21b   :  { %v1976_v37 = vpop.f32.mrf.mxu3  ;;  %v2735_v27 = vadd.f32 %v2734_v15, %v2733_v21  ;;  %v2980_v0 = vrot.slane %v2979_v8, 2  ;;  %v6033_v23 = vmul.f32 0.25, %v2515_v62  ;;  %v2304_v28 = vpack.c.bf16 %v2296_v63, %v2296_v63 }
 0x21c   :  { %v2271_v59 = vsel %vm2235_vm15, %v2229_v12, 0.0  ;;  %v2470_v7 = vrot.slane %v2229_v12, 4  ;;  %v1977_v6 = vadd.f32 %v1976_v37, %v1839_v39  ;;  %v2173_v39 = vpop.f32.mrf.mxu0  ;;  %v6044_v37 = vunpack.c.l.b16 %v3016_v40 }
 0x21d   :  { %v2272_v33 = vrot.slane %v2271_v59, 4  ;;  %v2736_v45 = vrot.slane %v2735_v27, 1  ;;  %v2981_v57 = vadd.f32 %v2980_v0, %v2979_v8  ;;  %v2549_v10 = vpack.c.bf16 %v6033_v23, %v6033_v23  ;;  %2433 = vmatpush.bf16.msrb.mxu1 %v4003_v22 }
 0x21e   :  { %v2516_v55 = vsel %vm2235_vm15, %v2470_v7, 0.0  ;;  %v2194_v19 = vadd.f32 %v2170_v41, %v1977_v6  ;;  %v4111_v0 = vor.u32 %v4490_v52, %v4108_v36 }
 0x21f   :  { %v2273_v34 = vadd.f32 %v2272_v33, %v2271_v59  ;;  %v2517_v24 = vrot.slane %v2516_v55, 4  ;;  %v2737_v17 = vadd.f32 %v2736_v45, %v2735_v27  ;;  %v2982_v15 = vrot.slane %v2981_v57, 1  ;;  %v1844_v59 = vpop.f32.mrf.mxu2 }
 0x220   :  { %v2214_v43 = vadd.f32 %v5934_v14, %v2194_v19  ;;  %v3995_v27 = vor.u32 %v4467_v56, %v3994_v53  ;;  %2689 = vmatpush.bf16.msrb.mxu2 %v4111_v0  ;;  %v4103_v45 = vor.u32 %v4488_v58, %v4100_v13  ;;  %v6090_v22 = vunpack.c.l.b16 %v2549_v10  ;;  %v4474_v0 = vld [vmem:[%s6756_s8 + $0x64] sm:$0xf] }
 0x221   :  { %v2274_v26 = vrot.slane %v2273_v34, 2  ;;  %v2518_v18 = vadd.f32 %v2517_v24, %v2516_v55  ;;  %v6062_v55 = vunpack.c.l.b16 %v2304_v28  ;;  %v4465_v24 = vld [vmem:[%s6756_s8 + $0x14] sm:$0xf0]  ;;  %v6070_v2 = vmul.f32 0.25, %v2737_v17 }
 0x222   :  { %v2230_v54 = vmax.f32 %v2214_v43, 0.0  ;;  %v2983_v32 = vadd.f32 %v2982_v15, %v2981_v57  ;;  %2434 = vmatpush.bf16.msrb.mxu1 %v3995_v27 }
 0x223   :  { %v2275_v21 = vadd.f32 %v2274_v26, %v2273_v34  ;;  %v1979_v41 = vpop.f32.mrf.mxu3  ;;  %v2519_v4 = vrot.slane %v2518_v18, 2  ;;  %v3986_v34 = vld [vmem:[%s6756_s8 + $0x10] sm:$0xf]  ;;  %v2771_v57 = vpack.c.bf16 %v6070_v2, %v6070_v2 }
 0x224   :  { %v1980_v42 = vadd.f32 %v1979_v41, %v1842_v31  ;;  %v2738_v25 = vsel %vm2235_vm15, %v2230_v54, 0.0  ;;  %v2938_v12 = vrot.slane %v2230_v54, 4  ;;  %v2175_v11 = vpop.f32.mrf.mxu0  ;;  %v3978_v54 = vld [vmem:[%s6756_s8] sm:$0xf]  ;;  %2690 = vmatpush.bf16.msrb.mxu2 %v4103_v45 }
 0x225   :  { %v2276_v60 = vrot.slane %v2275_v21, 1  ;;  %v2739_v8 = vrot.slane %v2738_v25, 4  ;;  %v2520_v33 = vadd.f32 %v2519_v4, %v2518_v18 }
 0x226   :  { %v2195_v20 = vadd.f32 %v2173_v39, %v1980_v42  ;;  %v2984_v49 = vsel %vm2235_vm15, %v2938_v12, 0.0  ;;  %v3987_v39 = vor.u32 %v4465_v24, %v3986_v34  ;;  %v4463_v42 = vld [vmem:[%s6756_s8 + $0x4] sm:$0xf0]  ;;  %v4092_v12 = vld [vmem:[%s6756_s8 + $0xc8] sm:$0xf0] }
 0x227   :  { %v2277_v44 = vadd.f32 %v2276_v60, %v2275_v21  ;;  %v2740_v6 = vadd.f32 %v2739_v8, %v2738_v25  ;;  %v2985_v47 = vrot.slane %v2984_v49, 4  ;;  %v2521_v5 = vrot.slane %v2520_v33, 1  ;;  %v4486_v25 = vld [vmem:[%s6756_s8 + $0xc4] sm:$0xf]  ;;  %v1847_v56 = vpop.f32.mrf.mxu2  ;;  %v4028_v34 = vld [vmem:[%s6756_s8 + $0x68] sm:$0xf0] }
 0x228   :  { %v2215_v7 = vadd.f32 %v5934_v14, %v2195_v20  ;;  %2435 = vmatpush.bf16.msrb.mxu1 %v3987_v39  ;;  %v3979_v28 = vor.u32 %v4463_v42, %v3978_v54  ;;  %v4476_v20 = vld [vmem:[%s6756_s8 + $0x74] sm:$0xf]  ;;  %v4095_v10 = vor.u32 %v4486_v25, %v4092_v12  ;;  %v4031_v39 = vor.u32 %v4474_v0, %v4028_v34  ;;  %v4196_v54 = vld [vmem:[%s6756_s8 + $0x178] sm:$0xf0]  ;;  %v4482_v12 = vld [vmem:[%s6756_s8 + $0xa4] sm:$0xf] }
 0x229   :  { %v2741_v62 = vrot.slane %v2740_v6, 2  ;;  %v2986_v19 = vadd.f32 %v2985_v47, %v2984_v49  ;;  %v6079_v30 = vmul.f32 0.25, %v2277_v44  ;;  %v2522_v17 = vadd.f32 %v2521_v5, %v2520_v33  ;;  %v4036_v49 = vld [vmem:[%s6756_s8 + $0x78] sm:$0xf0] }
 0x22a   :  { %v2231_v31 = vmax.f32 %v2215_v7, 0.0  ;;  %v6108_v7 = vmul.f32 0.25, %v2983_v32  ;;  %v4084_v33 = vld [vmem:[%s6756_s8 + $0xb8] sm:$0xf0]  ;;  %2691 = vmatpush.bf16.msrb.mxu2 %v4095_v10  ;;  %v6125_v5 = vunpack.c.l.b16 %v2771_v57  ;;  %v4508_v57 = vld [vmem:[%s6756_s8 + $0x174] sm:$0xf]  ;;  %v2342_v42 = vsel %vm651_vm10, %v6035_v35, %v5972_v16 }
 0x22b   :  { %v1981_v48 = vpop.f32.mrf.mxu3  ;;  %v2742_v29 = vadd.f32 %v2741_v62, %v2740_v6  ;;  %v2987_v63 = vrot.slane %v2986_v19, 2  ;;  %v4039_v6 = vor.u32 %v4476_v20, %v4036_v49  ;;  %v4199_v25 = vor.u32 %v4508_v57, %v4196_v54  ;;  %v4076_v20 = vld [vmem:[%s6756_s8 + $0xa8] sm:$0xf0]  ;;  %v4472_v16 = vld [vmem:[%s6756_s8 + $0x54] sm:$0xf] }
 0x22c   :  { %v2278_v46 = vsel %vm2235_vm15, %v2231_v31, 0.0  ;;  %v2471_v26 = vrot.slane %v2231_v31, 4  ;;  %v1982_v18 = vadd.f32 %v1981_v48, %v1844_v59  ;;  %v4484_v59 = vld [vmem:[%s6756_s8 + $0xb4] sm:$0xf]  ;;  %2436 = vmatpush.bf16.msrb.mxu1 %v3979_v28  ;;  %v2178_v13 = vpop.f32.mrf.mxu0  ;;  %v4079_v49 = vor.u32 %v4482_v12, %v4076_v20  ;;  %v4020_v35 = vld [vmem:[%s6756_s8 + $0x58] sm:$0xf0] }
 0x22d   :  { %v2279_v43 = vrot.slane %v2278_v46, 4  ;;  %v2743_v21 = vrot.slane %v2742_v29, 1  ;;  %v2988_v41 = vadd.f32 %v2987_v63, %v2986_v19  ;;  %v4087_v27 = vor.u32 %v4484_v59, %v4084_v33  ;;  %2910 = vmatpush.bf16.msra.mxu3 %v4199_v25  ;;  %v4274_v33 = vld [vmem:[%s6756_s8 + $0x1f0] sm:$0xf]  ;;  %v4180_v20 = vld [vmem:[%s6756_s8 + $0x158] sm:$0xf0] }
 0x22e   :  { %v2523_v1 = vsel %vm2235_vm15, %v2471_v26, 0.0  ;;  %v2196_v40 = vadd.f32 %v2175_v11, %v1982_v18  ;;  %v2305_v19 = vpack.c.bf16 %v6079_v30, %v6079_v30  ;;  %v6122_v11 = vmul.f32 0.25, %v2522_v17 }
 0x22f   :  { %v2524_v23 = vrot.slane %v2523_v1, 4  ;;  %v2280_v60 = vadd.f32 %v2279_v43, %v2278_v46  ;;  %v2989_v15 = vrot.slane %v2988_v41, 1  ;;  %v2744_v47 = vadd.f32 %v2743_v21, %v2742_v29  ;;  %2692 = vmatpush.bf16.msrb.mxu2 %v4087_v27  ;;  %v4506_v27 = vld [vmem:[%s6756_s8 + $0x164] sm:$0xf] }
 0x230   :  { %v2216_v4 = vadd.f32 %v5934_v14, %v2196_v40  ;;  %2442 = vmatpush.bf16.msra.mxu1 %v4039_v6  ;;  %v3017_v30 = vpack.c.bf16 %v6108_v7, %v6108_v7  ;;  %v2337_v21 = vunpack.c.l.b16 %v2305_v19  ;;  %v2343_v0 = vsel %vm653_vm11, %v6062_v55, %v2342_v42  ;;  %v4480_v19 = vld [vmem:[%s6756_s8 + $0x94] sm:$0xf]  ;;  %v4068_v55 = vld [vmem:[%s6756_s8 + $0x98] sm:$0xf0] }
 0x231   :  { %v2525_v8 = vadd.f32 %v2524_v23, %v2523_v1  ;;  %v2281_v53 = vrot.slane %v2280_v60, 2  ;;  %v2990_v52 = vadd.f32 %v2989_v15, %v2988_v41  ;;  %v6127_v29 = vmul.f32 0.25, %v2744_v47 }
 0x232   :  { %v2232_v44 = vmax.f32 %v2216_v4, 0.0  ;;  %v2550_v41 = vpack.c.bf16 %v6122_v11, %v6122_v11  ;;  %v4071_v42 = vor.u32 %v4480_v19, %v4068_v55  ;;  %v4502_v19 = vld [vmem:[%s6756_s8 + $0x144] sm:$0xf] }
 0x233   :  { %v2526_v36 = vrot.slane %v2525_v8, 2  ;;  %v1984_v31 = vpop.f32.mrf.mxu3  ;;  %v2282_v24 = vadd.f32 %v2281_v53, %v2280_v60  ;;  %v6131_v1 = vmul.f32 0.25, %v2990_v52  ;;  %v2772_v17 = vpack.c.bf16 %v6127_v29, %v6127_v29  ;;  %2693 = vmatpush.bf16.msrb.mxu2 %v4079_v49 }
 0x234   :  { %v2745_v2 = vsel %vm2235_vm15, %v2232_v44, 0.0  ;;  %v2939_v32 = vrot.slane %v2232_v44, 4  ;;  %v1985_v62 = vadd.f32 %v1984_v31, %v1847_v56  ;;  %2443 = vmatpush.bf16.msra.mxu1 %v4031_v39  ;;  %v1849_v56 = vpop.f32.mrf.mxu2  ;;  %v4525_v31 = vld [vmem:[%s6756_s8 + $0x1f4] sm:$0xf0] }
 0x235   :  { %v2527_v48 = vadd.f32 %v2526_v36, %v2525_v8  ;;  %v2746_v58 = vrot.slane %v2745_v2, 4  ;;  %v2283_v46 = vrot.slane %v2282_v24, 1  ;;  %v3018_v59 = vpack.c.bf16 %v6131_v1, %v6131_v1 }
 0x236   :  { %v2991_v26 = vsel %vm2235_vm15, %v2939_v32, 0.0  ;;  %v2197_v18 = vadd.f32 %v2178_v13, %v1985_v62  ;;  %v4023_v32 = vor.u32 %v4472_v16, %v4020_v35  ;;  %v4188_v62 = vld [vmem:[%s6756_s8 + $0x168] sm:$0xf0]  ;;  %v2180_v13 = vpop.f32.mrf.mxu0  ;;  %v4468_v16 = vld [vmem:[%s6756_s8 + $0x34] sm:$0xf]  ;;  %v2805_v7 = vunpack.c.l.b16 %v2772_v17 }
 0x237   :  { %v2528_v63 = vrot.slane %v2527_v48, 1  ;;  %v2747_v43 = vadd.f32 %v2746_v58, %v2745_v2  ;;  %v2992_v40 = vrot.slane %v2991_v26, 4  ;;  %v2284_v60 = vadd.f32 %v2283_v46, %v2282_v24  ;;  %v4470_v46 = vld [vmem:[%s6756_s8 + $0x44] sm:$0xf]  ;;  %2694 = vmatpush.bf16.msrb.mxu2 %v4071_v42  ;;  %v4004_v35 = vld [vmem:[%s6756_s8 + $0x38] sm:$0xf0] }
 0x238   :  { %v2217_v45 = vadd.f32 %v5934_v14, %v2197_v18  ;;  %2444 = vmatpush.bf16.msra.mxu1 %v4023_v32  ;;  %v3051_v29 = vunpack.c.l.b16 %v3018_v59 }
 0x239   :  { %v2748_v23 = vrot.slane %v2747_v43, 2  ;;  %v2993_v4 = vadd.f32 %v2992_v40, %v2991_v26  ;;  %v2529_v15 = vadd.f32 %v2528_v63, %v2527_v48  ;;  %v2298_v34 = vmul.f32 0.25, %v2284_v60  ;;  %v4012_v40 = vld [vmem:[%s6756_s8 + $0x48] sm:$0xf0]  ;;  %v4504_v60 = vld [vmem:[%s6756_s8 + $0x154] sm:$0xf] }
 0x23a   :  { %v2233_v28 = vmax.f32 %v2217_v45, 0.0  ;;  %v6189_v26 = vsel %vm655_vm12, %v2337_v21, %v2343_v0  ;;  %v4275_v63 = vor.u32 %v4525_v31, %v4274_v33  ;;  %v4266_v45 = vld [vmem:[%s6756_s8 + $0x1e0] sm:$0xf]  ;;  %v4523_v21 = vld [vmem:[%s6756_s8 + $0x1e4] sm:$0xf0]  ;;  %v4015_v12 = vor.u32 %v4470_v46, %v4012_v40 }
 0x23b   :  { %v2749_v8 = vadd.f32 %v2748_v23, %v2747_v43  ;;  %v1986_v10 = vpop.f32.mrf.mxu3  ;;  %v2994_v53 = vrot.slane %v2993_v4, 2  ;;  %v6180_v11 = vmul.f32 0.25, %v2529_v15  ;;  %v4191_v43 = vor.u32 %v4506_v27, %v4188_v62  ;;  %v4478_v15 = vld [vmem:[%s6756_s8 + $0x84] sm:$0xf]  ;;  %v4258_v33 = vld [vmem:[%s6756_s8 + $0x1d0] sm:$0xf] }
 0x23c   :  { %v2285_v44 = vsel %vm2235_vm15, %v2233_v28, 0.0  ;;  %v2472_v6 = vrot.slane %v2233_v28, 4  ;;  %v1987_v36 = vadd.f32 %v1986_v10, %v1849_v56  ;;  %v2306_v28 = vpack.c.bf16 %v2298_v34, %v2298_v34  ;;  %3143 = vmatpush.bf16.msra.mxu0 %v4275_v63  ;;  %2445 = vmatpush.bf16.msra.mxu1 %v4015_v12  ;;  %v4524_v0 = vld [vmem:[%s6756_s8 + $0x1f4] sm:$0xf]  ;;  %v4276_v34 = vld [vmem:[%s6756_s8 + $0x1f8] sm:$0xf0] }
 0x23d   :  { %v2750_v47 = vrot.slane %v2749_v8, 1  ;;  %v2286_v52 = vrot.slane %v2285_v44, 4  ;;  %v2995_v24 = vadd.f32 %v2994_v53, %v2993_v4  ;;  %v6203_v4 = vunpack.c.l.b16 %v2550_v41  ;;  %2911 = vmatpush.bf16.msra.mxu3 %v4191_v43  ;;  %v4466_v46 = vld [vmem:[%s6756_s8 + $0x24] sm:$0xf] }
 0x23e   :  { %v2530_v2 = vsel %vm2235_vm15, %v2472_v6, 0.0  ;;  %v2198_v39 = vadd.f32 %v2180_v13, %v1987_v36  ;;  %v2551_v41 = vpack.c.bf16 %v6180_v11, %v6180_v11  ;;  %v4267_v49 = vor.u32 %v4523_v21, %v4266_v45  ;;  %v4172_v11 = vld [vmem:[%s6756_s8 + $0x148] sm:$0xf0]  ;;  %v4250_v45 = vld [vmem:[%s6756_s8 + $0x1c0] sm:$0xf] }
 0x23f   :  { %v2287_v48 = vadd.f32 %v2286_v52, %v2285_v44  ;;  %v2531_v58 = vrot.slane %v2530_v2, 4  ;;  %v2996_v18 = vrot.slane %v2995_v24, 1  ;;  %v2751_v23 = vadd.f32 %v2750_v47, %v2749_v8  ;;  %v4060_v8 = vld [vmem:[%s6756_s8 + $0x88] sm:$0xf0]  ;;  %v4521_v47 = vld [vmem:[%s6756_s8 + $0x1d4] sm:$0xf0] }
 0x240   :  { %v2218_v25 = vadd.f32 %v5934_v14, %v2198_v39  ;;  %v4183_v44 = vor.u32 %v4504_v60, %v4180_v20  ;;  %v4063_v6 = vor.u32 %v4478_v15, %v4060_v8  ;;  %v4007_v27 = vor.u32 %v4468_v16, %v4004_v35  ;;  %3144 = vmatpush.bf16.msra.mxu0 %v4267_v49  ;;  %v4522_v60 = vld [vmem:[%s6756_s8 + $0x1e4] sm:$0xf]  ;;  %v4500_v8 = vld [vmem:[%s6756_s8 + $0x134] sm:$0xf] }
 0x241   :  { %v2288_v57 = vrot.slane %v2287_v48, 2  ;;  %v2532_v54 = vadd.f32 %v2531_v58, %v2530_v2  ;;  %v2997_v53 = vadd.f32 %v2996_v18, %v2995_v24  ;;  %v6229_v52 = vmul.f32 0.25, %v2751_v23  ;;  %v3996_v18 = vld [vmem:[%s6756_s8 + $0x28] sm:$0xf0]  ;;  %v4519_v23 = vld [vmem:[%s6756_s8 + $0x1c4] sm:$0xf0] }
 0x242   :  { %v2234_v56 = vmax.f32 %v2218_v25, 0.0  ;;  %v2338_v24 = vunpack.c.l.b16 %v2306_v28  ;;  %2912 = vmatpush.bf16.msra.mxu3 %v4183_v44  ;;  %v4259_v62 = vor.u32 %v4521_v47, %v4258_v33  ;;  %2695 = vmatpush.bf16.msrb.mxu2 %v4063_v6  ;;  %v4279_v55 = vor.u32 %v4524_v0, %v4276_v34  ;;  %v4268_v28 = vld [vmem:[%s6756_s8 + $0x1e8] sm:$0xf0]  ;;  %v4517_v33 = vld [vmem:[%s6756_s8 + $0x1b4] sm:$0xf0] }
 0x243   :  { %v2289_v10 = vadd.f32 %v2288_v57, %v2287_v48  ;;  %v2533_v14 = vrot.slane %v2532_v54, 2  ;;  %v6250_v39 = vmul.f32 0.25, %v2997_v53  ;;  %2446 = vmatpush.bf16.msra.mxu1 %v4007_v27  ;;  %v4175_v43 = vor.u32 %v4502_v19, %v4172_v11  ;;  %v3988_v53 = vld [vmem:[%s6756_s8 + $0x18] sm:$0xf0]  ;;  %v4520_v47 = vld [vmem:[%s6756_s8 + $0x1d4] sm:$0xf] }
 0x244   :  { %v2752_v2 = vsel %vm2235_vm15, %v2234_v56, 0.0  ;;  %v2940_v32 = vrot.slane %v2234_v56, 4  ;;  %v3999_v40 = vor.u32 %v4466_v46, %v3996_v18  ;;  %v2584_v25 = vunpack.c.l.b16 %v2551_v41  ;;  %3145 = vmatpush.bf16.msra.mxu0 %v4259_v62  ;;  %v4242_v56 = vld [vmem:[%s6756_s8 + $0x1b0] sm:$0xf]  ;;  %v4156_v62 = vld [vmem:[%s6756_s8 + $0x128] sm:$0xf0] }
 0x245   :  { %v2290_v36 = vrot.slane %v2289_v10, 1  ;;  %v2534_v31 = vadd.f32 %v2533_v14, %v2532_v54  ;;  %v2753_v13 = vrot.slane %v2752_v2, 4  ;;  %v2773_v12 = vpack.c.bf16 %v6229_v52, %v6229_v52  ;;  %v4464_v14 = vld [vmem:[%s6756_s8 + $0x14] sm:$0xf]  ;;  %v4515_v18 = vld [vmem:[%s6756_s8 + $0x1a4] sm:$0xf0] }
 0x246   :  { %v2998_v63 = vsel %vm2235_vm15, %v2940_v32, 0.0  ;;  %3156 = vmatpush.bf16.msra.mxu2 %v4279_v55  ;;  %2913 = vmatpush.bf16.msra.mxu3 %v4175_v43  ;;  %v4251_v20 = vor.u32 %v4519_v23, %v4250_v45  ;;  %v4271_v15 = vor.u32 %v4522_v60, %v4268_v28  ;;  %v3019_v44 = vpack.c.bf16 %v6250_v39, %v6250_v39  ;;  %v4498_v32 = vld [vmem:[%s6756_s8 + $0x124] sm:$0xf]  ;;  %v4252_v23 = vld [vmem:[%s6756_s8 + $0x1c8] sm:$0xf0] }
 0x247   :  { %v2291_v48 = vadd.f32 %v2290_v36, %v2289_v10  ;;  %v2535_v58 = vrot.slane %v2534_v31, 1  ;;  %v2754_v42 = vadd.f32 %v2753_v13, %v2752_v2  ;;  %v2999_v21 = vrot.slane %v2998_v63, 4  ;;  %v4164_v10 = vld [vmem:[%s6756_s8 + $0x138] sm:$0xf0]  ;;  %2447 = vmatpush.bf16.msra.mxu1 %v3999_v40  ;;  %v4234_v13 = vld [vmem:[%s6756_s8 + $0x1a0] sm:$0xf] }
 0x248   :  { %v4167_v35 = vor.u32 %v4500_v8, %v4164_v10  ;;  %v3991_v6 = vor.u32 %v4464_v14, %v3988_v53  ;;  %v4260_v36 = vld [vmem:[%s6756_s8 + $0x1d8] sm:$0xf0]  ;;  %v2345_v27 = vsel %vm657_vm13, %v2338_v24, %v6189_v26  ;;  %v2589_v19 = vsel %vm653_vm11, %v6090_v22, %v6039_v61  ;;  %3146 = vmatpush.bf16.msra.mxu0 %v4251_v20 }
 0x249   :  { %v2299_v57 = vmul.f32 0.25, %v2291_v48  ;;  %v2536_v54 = vadd.f32 %v2535_v58, %v2534_v31  ;;  %v2755_v49 = vrot.slane %v2754_v42, 2  ;;  %v3000_v16 = vadd.f32 %v2999_v21, %v2998_v63  ;;  %v4462_v48 = vld [vmem:[%s6756_s8 + $0x4] sm:$0xf]  ;;  %v3980_v58 = vld [vmem:[%s6756_s8 + $0x8] sm:$0xf0] }
 0x24a   :  { %3157 = vmatpush.bf16.msra.mxu2 %v4271_v15  ;;  %2914 = vmatpush.bf16.msra.mxu3 %v4167_v35  ;;  %v4243_v11 = vor.u32 %v4517_v33, %v4242_v56  ;;  %v4263_v26 = vor.u32 %v4520_v47, %v4260_v36  ;;  %v4159_v24 = vor.u32 %v4498_v32, %v4156_v62  ;;  %v4518_v63 = vld [vmem:[%s6756_s8 + $0x1c4] sm:$0xf]  ;;  %v4496_v15 = vld [vmem:[%s6756_s8 + $0x114] sm:$0xf]  ;;  %v4148_v8 = vld [vmem:[%s6756_s8 + $0x118] sm:$0xf0]  ;;  %v3050_v10 = vunpack.c.l.b16 %v3017_v30 }
 0x24b   :  { %v2544_v41 = vmul.f32 0.25, %v2536_v54  ;;  %v2307_v31 = vpack.c.bf16 %v2299_v57, %v2299_v57  ;;  %v2756_v34 = vadd.f32 %v2755_v49, %v2754_v42  ;;  %v3001_v2 = vrot.slane %v3000_v16, 2  ;;  %2448 = vmatpush.bf16.msra.mxu1 %v3991_v6  ;;  %v4114_v54 = vld [vmem:[%s6756_s8 + $0xf0] sm:$0xf]  ;;  %v4493_v42 = vld [vmem:[%s6756_s8 + $0xf4] sm:$0xf0] }
 0x24c   :  { %v2590_v43 = vsel %vm655_vm12, %v6203_v4, %v2589_v19  ;;  %v3983_v40 = vor.u32 %v4462_v48, %v3980_v58  ;;  %v4235_v45 = vor.u32 %v4515_v18, %v4234_v13  ;;  %v4255_v28 = vor.u32 %v4518_v63, %v4252_v23  ;;  %3147 = vmatpush.bf16.msra.mxu0 %v4243_v11  ;;  %v4226_v49 = vld [vmem:[%s6756_s8 + $0x190] sm:$0xf]  ;;  %v4516_v35 = vld [vmem:[%s6756_s8 + $0x1b4] sm:$0xf]  ;;  %v4244_v6 = vld [vmem:[%s6756_s8 + $0x1b8] sm:$0xf0] }
 0x24d   :  { %v2552_v0 = vpack.c.bf16 %v2544_v41, %v2544_v41  ;;  %v2339_v55 = vunpack.c.l.b16 %v2307_v31  ;;  %v2757_v61 = vrot.slane %v2756_v34, 1  ;;  %v3002_v22 = vadd.f32 %v3001_v2, %v3000_v16  ;;  %v4513_v16 = vld [vmem:[%s6756_s8 + $0x194] sm:$0xf0]  ;;  %v4106_v33 = vld [vmem:[%s6756_s8 + $0xe0] sm:$0xf] }
 0x24e   :  { %v2591_v21 = vsel %vm657_vm13, %v2584_v25, %v2590_v43  ;;  %3158 = vmatpush.bf16.msra.mxu2 %v4263_v26  ;;  %2915 = vmatpush.bf16.msra.mxu3 %v4159_v24  ;;  %v4115_v25 = vor.u32 %v4493_v42, %v4114_v54  ;;  %v4151_v14 = vor.u32 %v4496_v15, %v4148_v8  ;;  %v2806_v17 = vunpack.c.l.b16 %v2773_v12  ;;  %v4491_v36 = vld [vmem:[%s6756_s8 + $0xe4] sm:$0xf0]  ;;  %v4494_v31 = vld [vmem:[%s6756_s8 + $0x104] sm:$0xf]  ;;  %v4218_v32 = vld [vmem:[%s6756_s8 + $0x180] sm:$0xf] }
 0x24f   :  { %v2585_v46 = vunpack.c.l.b16 %v2552_v0  ;;  %v2346_v57 = vsel %vm659_vm14, %v2339_v55, %v2345_v27  ;;  %v2758_v4 = vadd.f32 %v2757_v61, %v2756_v34  ;;  %v3003_v60 = vrot.slane %v3002_v22, 1  ;;  %2449 = vmatpush.bf16.msra.mxu1 %v3983_v40  ;;  %v4514_v2 = vld [vmem:[%s6756_s8 + $0x1a4] sm:$0xf]  ;;  %v4511_v62 = vld [vmem:[%s6756_s8 + $0x184] sm:$0xf0] }
 0x250   :  { %v6332_v20 = vpack.c.b16 %v2346_v57, %v2346_v57  ;;  %v3056_v47 = vsel %vm651_vm10, %v6044_v37, %v5986_v9  ;;  %v4140_v9 = vld [vmem:[%s6756_s8 + $0x108] sm:$0xf0]  ;;  %v2810_v37 = vsel %vm651_vm10, %v6042_v3, %v5981_v50  ;;  %v4247_v59 = vor.u32 %v4516_v35, %v4244_v6  ;;  %3148 = vmatpush.bf16.msra.mxu0 %v4235_v45  ;;  %v4098_v3 = vld [vmem:[%s6756_s8 + $0xd0] sm:$0xf]  ;;  %v4489_v19 = vld [vmem:[%s6756_s8 + $0xd4] sm:$0xf0] }
 0x251   :  { %v2592_v41 = vsel %vm659_vm14, %v2585_v46, %v2591_v21  ;;  %v2766_v30 = vmul.f32 0.25, %v2758_v4  ;;  %v3004_v53 = vadd.f32 %v3003_v60, %v3002_v22  ;;  %v4107_v52 = vor.u32 %v4491_v36, %v4106_v33  ;;  %v4236_v50 = vld [vmem:[%s6756_s8 + $0x1a8] sm:$0xf0]  ;;  %v4512_v63 = vld [vmem:[%s6756_s8 + $0x194] sm:$0xf] }
 0x252   :  { %2437 = vmatmul.bf16.vlgmr.msrb.gmra.mxu1 %v6332_v20  ;;  %v6357_v56 = vpack.c.b16 %v2592_v41, %v2592_v41  ;;  %3159 = vmatpush.bf16.msra.mxu2 %v4255_v28  ;;  %v3052_v27 = vunpack.c.l.b16 %v3019_v44  ;;  %v4227_v0 = vor.u32 %v4513_v16, %v4226_v49  ;;  %v4143_v34 = vor.u32 %v4494_v31, %v4140_v9  ;;  %v4228_v43 = vld [vmem:[%s6756_s8 + $0x198] sm:$0xf0]  ;;  %v4090_v45 = vld [vmem:[%s6756_s8 + $0xc0] sm:$0xf]  ;;  %v4487_v23 = vld [vmem:[%s6756_s8 + $0xc4] sm:$0xf0] }
 0x253   :  { %v3012_v1 = vmul.f32 0.25, %v3004_v53  ;;  %2675 = vmatpush.bf16.msrb.mxu1 %v4115_v25  ;;  %v2774_v12 = vpack.c.bf16 %v2766_v30, %v2766_v30  ;;  %2916 = vmatpush.bf16.msra.mxu3 %v4151_v14  ;;  %v2811_v39 = vsel %vm653_vm11, %v6125_v5, %v2810_v37  ;;  %v3057_v5 = vsel %vm653_vm11, %v3050_v10, %v3056_v47  ;;  %v4510_v21 = vld [vmem:[%s6756_s8 + $0x184] sm:$0xf]  ;;  %v4220_v4 = vld [vmem:[%s6756_s8 + $0x188] sm:$0xf0] }
 0x254   :  { %2696 = vmatmul.bf16.vlgmr.msrb.gmra.mxu2 %v6357_v56  ;;  %v2812_v26 = vsel %vm655_vm12, %v2805_v7, %v2811_v39  ;;  %v3058_v48 = vsel %vm655_vm12, %v3051_v29, %v3057_v5  ;;  %v4239_v13 = vor.u32 %v4514_v2, %v4236_v50  ;;  %v4099_v55 = vor.u32 %v4489_v19, %v4098_v3  ;;  %v4082_v60 = vld [vmem:[%s6756_s8 + $0xb0] sm:$0xf]  ;;  %v4485_v28 = vld [vmem:[%s6756_s8 + $0xb4] sm:$0xf0]  ;;  %v4074_v10 = vld [vmem:[%s6756_s8 + $0xa0] sm:$0xf] }
 0x255   :  { %v3020_v44 = vpack.c.bf16 %v3012_v1, %v3012_v1  ;;  %v2807_v11 = vunpack.c.l.b16 %v2774_v12  ;;  %v2813_v24 = vsel %vm657_vm13, %v2806_v17, %v2812_v26  ;;  %3149 = vmatpush.bf16.msra.mxu0 %v4227_v0  ;;  %v4219_v61 = vor.u32 %v4511_v62, %v4218_v32  ;;  %v4483_v25 = vld [vmem:[%s6756_s8 + $0xa4] sm:$0xf0]  ;;  %v4066_v41 = vld [vmem:[%s6756_s8 + $0x90] sm:$0xf]  ;;  %v4481_v49 = vld [vmem:[%s6756_s8 + $0x94] sm:$0xf0] }
 0x256   :  { %3160 = vmatpush.bf16.msra.mxu2 %v4247_v59  ;;  %v3059_v18 = vsel %vm657_vm13, %v3052_v27, %v3058_v48  ;;  %v4231_v54 = vor.u32 %v4512_v63, %v4228_v43  ;;  %v4091_v42 = vor.u32 %v4487_v23, %v4090_v45  ;;  %v4223_v15 = vor.u32 %v4510_v21, %v4220_v4  ;;  %v4058_v16 = vld [vmem:[%s6756_s8 + $0x80] sm:$0xf]  ;;  %v4479_v35 = vld [vmem:[%s6756_s8 + $0x84] sm:$0xf0]  ;;  %v4194_v7 = vld [vmem:[%s6756_s8 + $0x170] sm:$0xf] }
 0x257   :  { %v3053_v58 = vunpack.c.l.b16 %v3020_v44  ;;  %2676 = vmatpush.bf16.msrb.mxu1 %v4107_v52  ;;  %v2814_v46 = vsel %vm659_vm14, %v2807_v11, %v2813_v24  ;;  %2917 = vmatpush.bf16.msra.mxu3 %v4143_v34  ;;  %v4083_v8 = vor.u32 %v4485_v28, %v4082_v60  ;;  %v4075_v14 = vor.u32 %v4483_v25, %v4074_v10  ;;  %v4509_v30 = vld [vmem:[%s6756_s8 + $0x174] sm:$0xf0]  ;;  %v4186_v33 = vld [vmem:[%s6756_s8 + $0x160] sm:$0xf]  ;;  %v4507_v47 = vld [vmem:[%s6756_s8 + $0x164] sm:$0xf0] }
 0x258   :  { %v6415_v22 = vpack.c.b16 %v2814_v46, %v2814_v46  ;;  %v4059_v53 = vor.u32 %v4479_v35, %v4058_v16  ;;  %v4195_v6 = vor.u32 %v4509_v30, %v4194_v7  ;;  %v4187_v29 = vor.u32 %v4507_v47, %v4186_v33  ;;  %v4178_v17 = vld [vmem:[%s6756_s8 + $0x150] sm:$0xf]  ;;  %v4505_v36 = vld [vmem:[%s6756_s8 + $0x154] sm:$0xf0]  ;;  %v4170_v9 = vld [vmem:[%s6756_s8 + $0x140] sm:$0xf] }
 0x259   :  { %v3060_v40 = vsel %vm659_vm14, %v3053_v58, %v3059_v18  ;;  %3150 = vmatpush.bf16.msra.mxu0 %v4219_v61  ;;  %v4179_v31 = vor.u32 %v4505_v36, %v4178_v17  ;;  %v4503_v37 = vld [vmem:[%s6756_s8 + $0x144] sm:$0xf0]  ;;  %v4162_v59 = vld [vmem:[%s6756_s8 + $0x130] sm:$0xf]  ;;  %v4154_v12 = vld [vmem:[%s6756_s8 + $0x120] sm:$0xf] }
 0x25a   :  { %3161 = vmatpush.bf16.msra.mxu2 %v4239_v13  ;;  %v3061_v57 = vpack.c.b16 %v3060_v40, %v3060_v40  ;;  %2918 = vmatmul.bf16.vlgmr.msra.gmra.mxu3 %v6415_v22  ;;  %v4171_v1 = vor.u32 %v4503_v37, %v4170_v9  ;;  %v4499_v27 = vld [vmem:[%s6756_s8 + $0x124] sm:$0xf0]  ;;  %v4146_v34 = vld [vmem:[%s6756_s8 + $0x110] sm:$0xf]  ;;  %v4497_v2 = vld [vmem:[%s6756_s8 + $0x114] sm:$0xf0] }
 0x25b   :  { %2677 = vmatpush.bf16.msrb.mxu1 %v4099_v55  ;;  %v4155_v0 = vor.u32 %v4499_v27, %v4154_v12  ;;  %v4147_v50 = vor.u32 %v4497_v2, %v4146_v34  ;;  %v4138_v3 = vld [vmem:[%s6756_s8 + $0x100] sm:$0xf]  ;;  %v4495_v39 = vld [vmem:[%s6756_s8 + $0x104] sm:$0xf0]  ;;  %v4356_v60 = vld [vmem:[%s6761_s13 + $0x70] sm:$0xf] }
 0x25c   :  { %3151 = vmatmul.bf16.vlgmr.msra.gmra.mxu0 %v3061_v57  ;;  %v3172_v44 = vld [vmem:[%s6757_s9] sm:$0xf]  ;;  %v4139_v32 = vor.u32 %v4495_v39, %v4138_v3  ;;  %v4545_v28 = vld [vmem:[%s6761_s13 + $0x74] sm:$0xf0]  ;;  %v4358_v10 = vld [vmem:[%s6761_s13 + $0x78] sm:$0xf0] }
 0x25d   :  { %v3182_v62 = vsel %vm2235_vm15, %v3172_v44, 0  ;;  %v3171_v19 = vld [vmem:[%s6750_s2] sm:$0xf]  ;;  %v4340_v7 = vld [vmem:[%s6761_s13 + $0x50] sm:$0xf] }
 0x25e   :  { %3162 = vmatpush.bf16.msra.mxu2 %v4231_v54  ;;  %v4526_v4 = vld [vmem:[%s6759_s11] sm:$0xff]  ;;  %v4541_v30 = vld [vmem:[%s6761_s13 + $0x54] sm:$0xf0]  ;;  %v4539_v36 = vld [vmem:[%s6761_s13 + $0x44] sm:$0xf0] }
 0x25f   :  { %2678 = vmatpush.bf16.msrb.mxu1 %v4091_v42  ;;  %v4527_v42 = vld [vmem:[%s6759_s11 + $0x8] sm:$0xff]  ;;  %v4348_v25 = vld [vmem:[%s6761_s13 + $0x60] sm:$0xf]  ;;  %v4341_v33 = vor.u32 %v4541_v30, %v4340_v7  ;;  %v4538_v9 = vld [vmem:[%s6761_s13 + $0x44] sm:$0xf] }
 0x260   :  { %v4332_v17 = vld [vmem:[%s6761_s13 + $0x40] sm:$0xf]  ;;  %v4334_v37 = vld [vmem:[%s6761_s13 + $0x48] sm:$0xf0]  ;;  %v4536_v12 = vld [vmem:[%s6761_s13 + $0x34] sm:$0xf] }
 0x261   :  { %v4326_v27 = vld [vmem:[%s6761_s13 + $0x38] sm:$0xf0]  ;;  %v4535_v3 = vld [vmem:[%s6761_s13 + $0x24] sm:$0xf0]  ;;  %v4534_v39 = vld [vmem:[%s6761_s13 + $0x24] sm:$0xf] }
 0x262   :  { %2450 = vmatmul.bf16.vlgmr.msra.gmra.mxu1 %v6332_v20  ;;  %3163 = vmatpush.bf16.msra.mxu2 %v4223_v15  ;;  %v4067_v20 = vor.u32 %v4481_v49, %v4066_v41  ;;  %v4544_v15 = vld [vmem:[%s6761_s13 + $0x74] sm:$0xf]  ;;  %v4542_v49 = vld [vmem:[%s6761_s13 + $0x64] sm:$0xf]  ;;  %v4329_v2 = vor.u32 %v4536_v12, %v4326_v27  ;;  %v4318_v44 = vld [vmem:[%s6761_s13 + $0x28] sm:$0xf0] }
 0x263   :  { %2679 = vmatpush.bf16.msrb.mxu1 %v4083_v8  ;;  %v4357_v8 = vor.u32 %v4545_v28, %v4356_v60  ;;  %v4361_v41 = vor.u32 %v4544_v15, %v4358_v10  ;;  %v3407_v60 = vld [vmem:[%s6763_s15 + $0xe8] sm:$0xff]  ;;  %v3390_v28 = vld [vmem:[%s6763_s15 + $0x60] sm:$0xff]  ;;  %v3405_v10 = vld [vmem:[%s6763_s15 + $0xd8] sm:$0xff] }
 0x264   :  { %v3406_v15 = vld [vmem:[%s6763_s15 + $0xe0] sm:$0xff]  ;;  %v3401_v7 = vld [vmem:[%s6763_s15 + $0xb8] sm:$0xff]  ;;  %v3384_v30 = vld [vmem:[%s6763_s15 + $0x30] sm:$0xff] }
 0x265   :  { %3164 = vmatmul.bf16.vlgmr.msra.gmra.mxu2 %v3061_v57  ;;  %3348 = vmatpush.bf16.msrb.mxu0 %v4357_v8  ;;  %v3389_v8 = vld [vmem:[%s6763_s15 + $0x58] sm:$0xff]  ;;  %v3396_v12 = vld [vmem:[%s6763_s15 + $0x90] sm:$0xff]  ;;  %v3379_v27 = vld [vmem:[%s6763_s15 + $0x8] sm:$0xff] }
 0x267   :  { %2680 = vmatpush.bf16.msrb.mxu1 %v4075_v14  ;;  %v4543_v14 = vld [vmem:[%s6761_s13 + $0x64] sm:$0xf0] }
 0x268   :  { %v4349_v16 = vor.u32 %v4543_v14, %v4348_v25  ;;  %v3388_v25 = vld [vmem:[%s6763_s15 + $0x50] sm:$0xff] }
 0x269   :  { %v3404_v14 = vld [vmem:[%s6763_s15 + $0xd0] sm:$0xff] }
 0x26a   :  { %3349 = vmatpush.bf16.msrb.mxu0 %v4349_v16  ;;  %v3402_v16 = vld [vmem:[%s6763_s15 + $0xc0] sm:$0xff] }
 0x26b   :  { %2681 = vmatpush.bf16.msrb.mxu1 %v4067_v20  ;;  %v4350_v20 = vld [vmem:[%s6761_s13 + $0x68] sm:$0xf0] }
 0x26c   :  { %v4353_v35 = vor.u32 %v4542_v49, %v4350_v20  ;;  %v3403_v49 = vld [vmem:[%s6763_s15 + $0xc8] sm:$0xff]  ;;  %v3386_v20 = vld [vmem:[%s6763_s15 + $0x40] sm:$0xff] }
 0x26e   :  { %3350 = vmatpush.bf16.msrb.mxu0 %v4341_v33  ;;  %v3399_v33 = vld [vmem:[%s6763_s15 + $0xa8] sm:$0xff] }
 0x26f   :  { %2682 = vmatpush.bf16.msrb.mxu1 %v4059_v53  ;;  %v4540_v53 = vld [vmem:[%s6761_s13 + $0x54] sm:$0xf] }
 0x272   :  { %2683 = vmatmul.bf16.vlgmr.msrb.gmra.mxu1 %v6357_v56  ;;  %v4501_v56 = vld [vmem:[%s6756_s8 + $0x134] sm:$0xf0] }
 0x273   :  { %2897 = vmatpush.bf16.msra.mxu1 %v4195_v6  ;;  %v4163_v52 = vor.u32 %v4501_v56, %v4162_v59  ;;  %v4342_v6 = vld [vmem:[%s6761_s13 + $0x58] sm:$0xf0]  ;;  %v4337_v59 = vor.u32 %v4538_v9, %v4334_v37  ;;  %v4324_v56 = vld [vmem:[%s6761_s13 + $0x30] sm:$0xf] }
 0x274   :  { %v3397_v9 = vld [vmem:[%s6763_s15 + $0x98] sm:$0xff] }
 0x277   :  { %2898 = vmatpush.bf16.msra.mxu1 %v4187_v29  ;;  %v4345_v29 = vor.u32 %v4540_v53, %v4342_v6  ;;  %v3400_v53 = vld [vmem:[%s6763_s15 + $0xb0] sm:$0xff]  ;;  %v3383_v6 = vld [vmem:[%s6763_s15 + $0x28] sm:$0xff] }
 0x27b   :  { %2899 = vmatpush.bf16.msra.mxu1 %v4179_v31 }
 0x27f   :  { %2900 = vmatpush.bf16.msra.mxu1 %v4171_v1  ;;  %v4333_v1 = vor.u32 %v4539_v36, %v4332_v17  ;;  %v4552_v17 = vld [vmem:[%s6760_s12] ss:$0 sm:$0xff]  ;;  %v3381_v36 = vld [vmem:[%s6763_s15 + $0x18] sm:$0xff] }
 0x281   :  { %3351 = vmatpush.bf16.msrb.mxu0 %v4333_v1 }
 0x283   :  { %2901 = vmatpush.bf16.msra.mxu1 %v4163_v52  ;;  %v4537_v52 = vld [vmem:[%s6761_s13 + $0x34] sm:$0xf0] }
 0x287   :  { %2902 = vmatpush.bf16.msra.mxu1 %v4155_v0  ;;  %v4325_v0 = vor.u32 %v4537_v52, %v4324_v56  ;;  %v3380_v52 = vld [vmem:[%s6763_s15 + $0x10] sm:$0xff] }
 0x289   :  { %3352 = vmatpush.bf16.msrb.mxu0 %v4325_v0  ;;  %v3395_v0 = vld [vmem:[%s6763_s15 + $0x88] sm:$0xff] }
 0x28b   :  { %2903 = vmatpush.bf16.msra.mxu1 %v4147_v50  ;;  %v4316_v50 = vld [vmem:[%s6761_s13 + $0x20] sm:$0xf] }
 0x28f   :  { %2904 = vmatpush.bf16.msra.mxu1 %v4139_v32  ;;  %v4317_v32 = vor.u32 %v4535_v3, %v4316_v50 }
 0x291   :  { %3353 = vmatpush.bf16.msrb.mxu0 %v4317_v32 }
 0x292   :  { %2905 = vmatmul.bf16.vlgmr.msra.gmra.mxu1 %v6415_v22 }
 0x293   :  { %3191 = vmatpush.bf16.msrb.mxu1 %v3182_v62  ;;  %v4321_v62 = vor.u32 %v4534_v39, %v4318_v44 }
 0x297   :  { %3361 = vmatpush.bf16.msra.mxu1 %v4361_v41  ;;  %v3387_v41 = vld [vmem:[%s6763_s15 + $0x48] sm:$0xff] }
 0x29b   :  { %3362 = vmatpush.bf16.msra.mxu1 %v4353_v35  ;;  %v3385_v35 = vld [vmem:[%s6763_s15 + $0x38] sm:$0xff] }
 0x29f   :  { %3363 = vmatpush.bf16.msra.mxu1 %v4345_v29  ;;  %v3398_v29 = vld [vmem:[%s6763_s15 + $0xa0] sm:$0xff] }
 0x2a2   :  { %4280 = vmatmul.msk.bf16.vlgmr.msrb.gmra.mxu1 %vm3177_vm0, %v3171_v19  ;;  %v4308_v19 = vld [vmem:[%s6761_s13 + $0x10] sm:$0xf] }
 0x2a3   :  { %3364 = vmatpush.bf16.msra.mxu1 %v4337_v59 }
 0x2a7   :  { %3365 = vmatpush.bf16.msra.mxu1 %v4329_v2  ;;  %v3394_v2 = vld [vmem:[%s6763_s15 + $0x80] sm:$0xff] }
 0x2ab   :  { %3366 = vmatpush.bf16.msra.mxu1 %v4321_v62 }
 0x2cf   :  { %v2438_v11 = vpop.f32.mrf.mxu1 }
 0x2d0   :  { %v2455_v26 = vadd.f32 %v2438_v11, %v5923_v38  ;;  %v4529_v38 = vld [vmem:[%s6759_s11 + $0x18] sm:$0xff] }
 0x2d1   :  { %3242 = vmatpush.bf16.msrb.mxu3 %v4529_v38  ;;  %v4533_v11 = vld [vmem:[%s6761_s13 + $0x14] sm:$0xf0] }
 0x2d7   :  { %v2440_v5 = vpop.f32.mrf.mxu1  ;;  %v2697_v24 = vpop.f32.mrf.mxu2 }
 0x2d8   :  { %v4532_v5 = vld [vmem:[%s6761_s13 + $0x14] sm:$0xf] }
 0x2d9   :  { %v6521_v48 = vpop.f32.mrf.mxu0 }
 0x2dd   :  { %v2919_v13 = vpop.f32.mrf.mxu3 }
 0x2df   :  { %v2451_v58 = vpop.f32.mrf.mxu1  ;;  %v2699_v46 = vpop.f32.mrf.mxu2 }
 0x2e0   :  { %v2456_v55 = vadd.f32 %v2451_v58, %v5940_v51  ;;  %v4528_v51 = vld [vmem:[%s6759_s11 + $0x10] sm:$0xff]  ;;  %v4309_v58 = vor.u32 %v4533_v11, %v4308_v19 }
 0x2e1   :  { %v3154_v18 = vpop.f32.mrf.mxu0  ;;  %3243 = vmatpush.bf16.msrb.mxu3 %v4528_v51  ;;  %v3409_v51 = vld [vmem:[%s6763_s15 + $0xf8] sm:$0xff] }
 0x2e2   :  { %v2702_v61 = vadd.f32 %v2697_v24, %v2456_v55  ;;  %v4310_v24 = vld [vmem:[%s6761_s13 + $0x18] sm:$0xf0]  ;;  %3354 = vmatpush.bf16.msrb.mxu0 %v4309_v58 }
 0x2e3   :  { %v4313_v55 = vor.u32 %v4532_v5, %v4310_v24  ;;  %v4553_v5 = vld [vmem:[%s6764_s16] ss:$0 sm:$0xff] }
 0x2e4   :  { %v2924_v22 = vadd.f32 %v2919_v13, %v2702_v61 }
 0x2e5   :  { %v2921_v43 = vpop.f32.mrf.mxu3  ;;  %3244 = vmatpush.bf16.msrb.mxu3 %v4527_v42  ;;  %3367 = vmatpush.bf16.msra.mxu1 %v4313_v55  ;;  %v3392_v42 = vld [vmem:[%s6763_s15 + $0x70] sm:$0xff] }
 0x2e6   :  { %v4531_v43 = vld [vmem:[%s6761_s13 + $0x4] sm:$0xf0] }
 0x2e7   :  { %v2453_v63 = vpop.f32.mrf.mxu1 }
 0x2e8   :  { %v3165_v40 = vpop.f32.mrf.mxu2  ;;  %v4300_v63 = vld [vmem:[%s6761_s13] sm:$0xf] }
 0x2e9   :  { %v6524_v45 = vadd.f32 %v3165_v40, %v2924_v22  ;;  %3245 = vmatpush.bf16.msrb.mxu3 %v4526_v4  ;;  %v4530_v40 = vld [vmem:[%s6761_s13 + $0x4] sm:$0xf]  ;;  %v4301_v38 = vor.u32 %v4531_v43, %v4300_v63  ;;  %v3391_v4 = vld [vmem:[%s6763_s15 + $0x68] sm:$0xff] }
 0x2eb   :  { %3355 = vmatpush.bf16.msrb.mxu0 %v4301_v38 }
 0x2ed   :  { %3434 = vmatpush.msra.mxu3 %v3409_v51 }
 0x2ef   :  { %v2684_v23 = vpop.f32.mrf.mxu1 }
 0x2f0   :  { %v2701_v57 = vadd.f32 %v2684_v23, %v2455_v26  ;;  %v3167_v54 = vpop.f32.mrf.mxu2  ;;  %v4551_v26 = vld [vmem:[%s6758_s10] ss:$0 sm:$0xff]  ;;  %v4302_v23 = vld [vmem:[%s6761_s13 + $0x8] sm:$0xf0] }
 0x2f1   :  { %v3393_v54 = vld [vmem:[%s6763_s15 + $0x78] sm:$0xff] }
 0x2f2   :  { %3414 = vmatpush.msrb.mxu2 %v3393_v54 }
 0x2f4   :  { %3415 = vmatpush.msrb.mxu2 %v3392_v42 }
 0x2f6   :  { %3416 = vmatpush.msrb.mxu2 %v3391_v4 }
 0x2f7   :  { %v2686_v21 = vpop.f32.mrf.mxu1 }
 0x2f8   :  { %v3408_v21 = vld [vmem:[%s6763_s15 + $0xf0] sm:$0xff]  ;;  %3417 = vmatpush.msrb.mxu2 %v3390_v28 }
 0x2f9   :  { %3435 = vmatpush.msra.mxu3 %v3408_v21 }
 0x2fa   :  { %3418 = vmatpush.msrb.mxu2 %v3389_v8 }
 0x2fb   :  { %3436 = vmatpush.msra.mxu3 %v3407_v60 }
 0x2fc   :  { %3419 = vmatpush.msrb.mxu2 %v3388_v25 }
 0x2fd   :  { %3437 = vmatpush.msra.mxu3 %v3406_v15 }
 0x2fe   :  { %3420 = vmatpush.msrb.mxu2 %v3387_v41 }
 0x2ff   :  { %3438 = vmatpush.msra.mxu3 %v3405_v10 }
 0x300   :  { %3421 = vmatpush.msrb.mxu2 %v3386_v20 }
 0x301   :  { %3439 = vmatpush.msra.mxu3 %v3404_v14 }
 0x302   :  { %3422 = vmatpush.msrb.mxu2 %v3385_v35 }
 0x303   :  { %3440 = vmatpush.msra.mxu3 %v3403_v49 }
 0x304   :  { %3423 = vmatpush.msrb.mxu2 %v3384_v30 }
 0x305   :  { %3441 = vmatpush.msra.mxu3 %v3402_v16 }
 0x306   :  { %3424 = vmatpush.msrb.mxu2 %v3383_v6 }
 0x307   :  { %3442 = vmatpush.msra.mxu3 %v3401_v7 }
 0x309   :  { %3443 = vmatpush.msra.mxu3 %v3400_v53 }
 0x30b   :  { %3444 = vmatpush.msra.mxu3 %v3399_v33 }
 0x30d   :  { %3445 = vmatpush.msra.mxu3 %v3398_v29 }
 0x30f   :  { %v2906_v47 = vpop.f32.mrf.mxu1  ;;  %3446 = vmatpush.msra.mxu3 %v3397_v9 }
 0x310   :  { %v6580_v31 = vadd.f32 %v2906_v47, %v2701_v57  ;;  %v4305_v57 = vor.u32 %v4530_v40, %v4302_v23  ;;  %v3382_v47 = vld [vmem:[%s6763_s15 + $0x20] sm:$0xff] }
 0x311   :  { %3425 = vmatpush.msrb.mxu2 %v3382_v47  ;;  %3447 = vmatpush.msra.mxu3 %v3396_v12 }
 0x312   :  { %3368 = vmatpush.bf16.msra.mxu1 %v4305_v57  ;;  %v3169_v50 = vadd.f32 %v6521_v48, %v6580_v31 }
 0x313   :  { %3426 = vmatpush.msrb.mxu2 %v3381_v36  ;;  %3448 = vmatpush.msra.mxu3 %v3395_v0 }
 0x315   :  { %3427 = vmatpush.msrb.mxu2 %v3380_v52  ;;  %3449 = vmatpush.msra.mxu3 %v3394_v2 }
 0x317   :  { %v2908_v34 = vpop.f32.mrf.mxu1  ;;  %3428 = vmatpush.msrb.mxu2 %v3379_v27 }
 0x318   :  { %v3378_v34 = vld [vmem:[%s6763_s15] sm:$0xff] }
 0x319   :  { %3429 = vmatpush.msrb.mxu2 %v3378_v34 }
 0x31f   :  { %v3193_v13 = vpop.f32.mrf.mxu1 }
 0x320   :  { %v3194_v46 = vadd.f32 %v4551_v26, %v3193_v13 }
 0x322   :  { %v3197_v61 = vmax.f32 %v3194_v46, 0.0 }
 0x324   :  { %v3198_v22 = vpack.c.bf16 %v3197_v61, %v3197_v61 }
 0x326   :  { %4297 = vmatmul.msk.bf16.vlgmr.msrb.gmra.mxu3 %vm258_vm4, %v3198_v22 }
 0x327   :  { %v3195_v18 = vpop.f32.mrf.mxu1 }
 0x3a9   :  { %v3247_v37 = vpop.f32.mrf.mxu3 }
 0x3aa   :  { %v3248_v1 = vadd.f32 %v4552_v17, %v3247_v37 }
 0x3ac   :  { %v3251_v59 = vpack.c.bf16 %v3248_v1, %v3248_v1 }
 0x3ae   :  { %3356 = vmatmul.bf16.vlgmr.msrb.gmra.mxu0 %v3251_v59  ;;  %3369 = vmatmul.bf16.vlgmr.msra.gmra.mxu1 %v3251_v59 }
 0x3b1   :  { %v3249_v56 = vpop.f32.mrf.mxu3 }
 0x42b   :  { %v3357_v3 = vpop.f32.mrf.mxu0  ;;  %v3370_v39 = vpop.f32.mrf.mxu1 }
 0x42c   :  { %v3374_v44 = vadd.f32 %v3357_v3, %v3169_v50  ;;  %v3375_v32 = vadd.f32 %v3370_v39, %v6524_v45 }
 0x42e   :  { %v3376_v62 = vmax.f32 %v3374_v44, 0.0  ;;  %v3377_v19 = vmax.f32 %v3375_v32, 0.0 }
 0x430   :  { %3430 = vmatmul.f32.vlgmr.msrb.gmra.mxu2 %v3376_v62  ;;  %3450 = vmatmul.f32.vlgmr.msra.gmra.mxu3 %v3377_v19 }
 0x433   :  { %v3359_v11 = vpop.f32.mrf.mxu0  ;;  %v3372_v26 = vpop.f32.mrf.mxu1 }
 0x4b3   :  { %v3431_v24 = vpop.f32.mrf.mxu2  ;;  %v3451_v13 = vpop.f32.mrf.mxu3 }
 0x4b4   :  { %v3432_v58 = vadd.f32 %v4553_v5, %v3431_v24 }
 0x4b6   :  { %v3452_v55 = vadd.f32 %v3451_v13, %v3432_v58 }
 0x4b8   :  { %3454 = vst [vmem:[%s6765_s17] sm:$0xff] %v3452_v55 }
 0x4b9   :  { %3459 = vsyncpa [#allocation3], 1 }

</bundles_post_ra>
